<compile_context>
chip_gen: v7x
topology: tpu7x:2x2x1
jax: 0.10.0
libtpu: 0.0.40
codegen_flags: <defaults>
</compile_context>

<pallas_src>
import functools
import math

import jax
import jax.numpy as jnp
import numpy as np
from jax import lax
from jax.experimental import pallas as pl
from jax.experimental.pallas import tpu as pltpu

_EPS = 1e-12            # F.normalize default eps
_EPS2 = _EPS * _EPS
_VMEM_LIMIT = 32 * 1024 * 1024


def _mm(a, b):
    """A @ B on the MXU with f32 accumulation."""
    return lax.dot_general(a, b, dimension_numbers=(((1,), (0,)), ((), ())),
                           preferred_element_type=jnp.float32)


def _mm_t(a, b):
    """A @ B.T on the MXU with f32 accumulation."""
    return lax.dot_general(a, b, dimension_numbers=(((1,), (1,)), ((), ())),
                           preferred_element_type=jnp.float32)


def _prune_score_kernel(q_ref, k_ref, score_ref, *, num_heads, head_dim):
    """One batch per grid step: per-head L2-normalized sum_abs_prune scores [H, Lk].

    q is channel-last [Lq, E]; k is channel-first [E, Lk] (head chunks = sublane rows).
    Exact per-head reductions keep the top-k selection numerically stable.
    """
    q = q_ref[0]                                                   # [Lq, E]
    k = k_ref[0]                                                   # [E, Lk]
    for h in range(num_heads):
        lo, hi = h * head_dim, (h + 1) * head_dim
        qh = q[:, lo:hi]                                           # [Lq, D]
        kh = k[lo:hi, :]                                           # [D, Lk]
        qn = qh * lax.rsqrt(
            jnp.maximum(jnp.sum(qh * qh, axis=1, keepdims=True), _EPS2))
        inv_k = lax.rsqrt(
            jnp.maximum(jnp.sum(kh * kh, axis=0, keepdims=True), _EPS2))   # [1, Lk]
        q_probe = jnp.sum(qn, axis=0, keepdims=True)               # [1, D]
        k_abs = (jnp.abs(kh) + kh) * inv_k                         # [D, Lk] (normalized |k|+k)
        score_ref[0, pl.ds(h, 1), :] = _mm(q_probe, k_abs)         # [1, Lk]


def _attention_kernel(q_ref, k_ref, v_ref, m_eh_ref, m_he_ref,
                      w_in_ref, b_q_ref, b_kv_ref, bias_kv_ref,
                      w_out_ref, b_out_ref, out_ref, *, num_heads, head_dim):
    """One (batch, q-tile) per grid step: full MultiheadAttention forward, heads fused."""
    E = num_heads * head_dim
    bf16 = jnp.bfloat16

    q = q_ref[0]                        # [TQ, E]  raw query, channel-last
    k = k_ref[0]                        # [E, Lk]  pruned raw keys, channel-first
    v = v_ref[0]                        # [E, Lk]  pruned raw values, channel-first
    m_eh = m_eh_ref[...]                # [E, H]   head-membership mask (block diagonal)
    m_he = m_he_ref[...]                # [H, E]

    # Per-head L2 normalization as block-diagonal matmul reductions (no masked VALU passes).
    def head_norm_rows(x):              # x: [L, E], head chunks along last dim
        ss = _mm(x * x, m_eh)                                       # [L, H]
        return x * _mm(lax.rsqrt(jnp.maximum(ss, _EPS2)), m_he)     # [L, E]

    def head_norm_cols(x):              # x: [E, L], head chunks along first dim
        ss = _mm(m_he, x * x)                                       # [H, L]
        return x * _mm(m_eh, lax.rsqrt(jnp.maximum(ss, _EPS2)))     # [E, L]

    qn = head_norm_rows(q).astype(bf16)                             # [TQ, E]
    kn = head_norm_cols(k).astype(bf16)                             # [E, Lk]
    vb = v.astype(bf16)                                             # [E, Lk]

    # Packed in-projection: full [*,E]x[E,E] MXU matmuls, bf16 operands, f32 accumulation.
    w_in = w_in_ref[...]                                            # [3E, E] bf16
    b_kv = b_kv_ref[...]                                            # [2E, 1] f32
    scale = 1.0 / math.sqrt(head_dim)
    qp = (_mm_t(qn, w_in[0:E]) + b_q_ref[...]) * scale              # [TQ, E]  (scale hoisted)
    kp = _mm(w_in[E:2 * E], kn) + b_kv[0:E]                         # [E, Lk]  channel-first
    vp = _mm(w_in[2 * E:3 * E], vb) + b_kv[E:2 * E]                 # [E, Lk]  channel-first

    # bias_k / bias_v extra key position (add_bias_kv=True): logits for all heads at once.
    bias_kv = bias_kv_ref[...]                                      # [2, E] f32
    e_all = _mm(qp * bias_kv[0:1], m_eh)                            # [TQ, H]

    w_out = w_out_ref[...]                                          # [E, E] bf16
    out_cf = jnp.zeros((E, q.shape[0]), jnp.float32)                # channel-first accumulator

    for h in range(num_heads):
        lo, hi = h * head_dim, (h + 1) * head_dim
        qh = qp[:, lo:hi].astype(bf16)                              # [TQ, D]
        kh = kp[lo:hi, :].astype(bf16)                              # [D, Lk]  (sublane-aligned)
        vh = vp[lo:hi, :].astype(bf16)                              # [D, Lk]

        s = _mm(qh, kh)                                             # [TQ, Lk] f32 logits
        e_h = e_all[:, h:h + 1]                                     # [TQ, 1]  bias-kv logit
        m_row = jnp.maximum(jnp.max(s, axis=-1, keepdims=True), e_h)
        p = jnp.exp(s - m_row)                                      # [TQ, Lk]
        pe = jnp.exp(e_h - m_row)                                   # [TQ, 1]
        inv_den = pl.reciprocal(jnp.sum(p, axis=-1, keepdims=True) + pe, approx=True)

        o = _mm_t(p.astype(bf16), vh)                               # [TQ, D]
        o = (o + pe * bias_kv[1:2, lo:hi]) * inv_den                # [TQ, D]
        # Output projection accumulated per head -> full-lane [E, TQ] accumulation.
        out_cf = out_cf + _mm_t(w_out[:, lo:hi], o.astype(bf16))    # [E, TQ]

    out_ref[0] = out_cf + b_out_ref[...]                            # channel-first store


def _pick_q_tile(lq):
    if lq <= 512:
        return lq
    for t in (512, 384, 256, 128):
        if lq % t == 0:
            return t
    return lq


@functools.partial(jax.jit, static_argnames=("num_heads", "top_k"))
def pruned_multihead_attention(query, keys, values,
                               w_in, b_in, bias_k, bias_v, w_out, b_out,
                               *, num_heads, top_k=None):
    """query/keys/values: [B, E, *spatial] channel-first, like the PyTorch module."""
    B, E = query.shape[0], query.shape[1]
    H = num_heads
    C = E // H                      # pruning chunk == attention head dim here
    Lq = int(np.prod(query.shape[2:]))
    Lk = int(np.prod(keys.shape[2:]))

    # K/V stay channel-first (free reshape); only Q is transposed to channel-last.
    qcl = query.reshape(B, E, Lq).transpose(0, 2, 1)                # [B, Lq, E]
    kcf = keys.reshape(B, E, Lk)                                    # [B, E, Lk]
    vcf = values.reshape(B, E, Lk)                                  # [B, E, Lk]

    tk = (Lq // H) if top_k is None else top_k

    if tk < Lk:
        score = pl.pallas_call(
            functools.partial(_prune_score_kernel, num_heads=H, head_dim=C),
            out_shape=jax.ShapeDtypeStruct((B, H, Lk), jnp.float32),
            grid_spec=pltpu.PrefetchScalarGridSpec(
                num_scalar_prefetch=0,
                grid=(B,),
                in_specs=[
                    pl.BlockSpec((1, Lq, E), lambda b: (b, 0, 0)),
                    pl.BlockSpec((1, E, Lk), lambda b: (b, 0, 0)),
                ],
                out_specs=pl.BlockSpec((1, H, Lk), lambda b: (b, 0, 0)),
            ),
            compiler_params=pltpu.CompilerParams(
                dimension_semantics=("parallel",),
                vmem_limit_bytes=_VMEM_LIMIT),
        )(qcl, kcf)

        # TODO(synk): top-k + per-(batch,head) gather stay in XLA (data-dependent indices).
        idx = jax.lax.top_k(score, tk)[1]                           # [B, H, tk]
        idx_full = jnp.repeat(idx, C, axis=1)                       # [B, E, tk] (row e -> head e//C)
        k_sel = jnp.take_along_axis(kcf, idx_full, axis=2)          # [B, E, tk]
        v_sel = jnp.take_along_axis(vcf, idx_full, axis=2)          # [B, E, tk]
        Lk_p = tk
    else:
        k_sel, v_sel = kcf, vcf
        Lk_p = Lk

    # Block-diagonal head-membership masks (reducer / expander for per-head normalization).
    m_eh = jnp.repeat(jnp.eye(H, dtype=jnp.float32), C, axis=0)     # [E, H]
    m_he = m_eh.T                                                   # [H, E]

    # Weights as bf16 MXU operands; biases kept f32 in the orientation the kernel needs.
    w_in_b = w_in.astype(jnp.bfloat16)                              # [3E, E]
    w_out_b = w_out.astype(jnp.bfloat16)                            # [E, E]
    b_q_row = b_in[:E].reshape(1, E)                                # [1, E]
    b_kv_col = b_in[E:].reshape(2 * E, 1)                           # [2E, 1]
    bias_kv = jnp.stack([bias_k, bias_v], axis=0)                   # [2, E]
    b_out_col = b_out.reshape(E, 1)                                 # [E, 1]

    TQ = _pick_q_tile(Lq)

    out = pl.pallas_call(
        functools.partial(_attention_kernel, num_heads=H, head_dim=E // H),
        out_shape=jax.ShapeDtypeStruct((B, E, Lq), jnp.float32),
        grid_spec=pltpu.PrefetchScalarGridSpec(
            num_scalar_prefetch=0,
            grid=(B, Lq // TQ),
            in_specs=[
                pl.BlockSpec((1, TQ, E), lambda b, i: (b, i, 0)),       # raw query (channel-last)
                pl.BlockSpec((1, E, Lk_p), lambda b, i: (b, 0, 0)),     # selected keys (channel-first)
                pl.BlockSpec((1, E, Lk_p), lambda b, i: (b, 0, 0)),     # selected values
                pl.BlockSpec((E, H), lambda b, i: (0, 0)),              # head mask (expander)
                pl.BlockSpec((H, E), lambda b, i: (0, 0)),              # head mask (reducer)
                pl.BlockSpec((3 * E, E), lambda b, i: (0, 0)),          # in_proj_weight (bf16, resident)
                pl.BlockSpec((1, E), lambda b, i: (0, 0)),              # q bias (row)
                pl.BlockSpec((2 * E, 1), lambda b, i: (0, 0)),          # k/v bias (columns)
                pl.BlockSpec((2, E), lambda b, i: (0, 0)),              # bias_k / bias_v
                pl.BlockSpec((E, E), lambda b, i: (0, 0)),              # out_proj weight (bf16)
                pl.BlockSpec((E, 1), lambda b, i: (0, 0)),              # out_proj bias (column)
            ],
            out_specs=pl.BlockSpec((1, E, TQ), lambda b, i: (b, 0, i)), # channel-first output
        ),
        compiler_params=pltpu.CompilerParams(
            dimension_semantics=("parallel", "parallel"),
            vmem_limit_bytes=_VMEM_LIMIT),
    )(qcl, k_sel, v_sel, m_eh, m_he, w_in_b, b_q_row, b_kv_col, bias_kv, w_out_b, b_out_col)

    # Channel-first output == out.permute(0, 2, 1).view(query_shape): reshape only.
    return out.reshape(query.shape)


def reference(query, keys, values, w_in, b_in, bias_k, bias_v, w_out, b_out,
              num_heads, top_k=None):
    """Pure-JAX transcription of the PyTorch forward (default flags)."""
    B, E = query.shape[0], query.shape[1]
    H = num_heads
    C = E // H
    D = E // H
    Lq = int(np.prod(query.shape[2:]))
    Lk = int(np.prod(keys.shape[2:]))

    def extract(x, L):                                   # 'B (h C) ... -> (B h) (...) C'
        return x.reshape(B, H, C, L).transpose(0, 1, 3, 2).reshape(B * H, L, C)

    q = extract(query, Lq)
    k = extract(keys, Lk)
    v = extract(values, Lk)

    def l2n(x):
        n = jnp.sqrt(jnp.sum(x * x, axis=-1, keepdims=True))
        return x / jnp.maximum(n, _EPS)

    q = l2n(q)
    k = l2n(k)

    tk = (Lq // H) if top_k is None else top_k
    if tk < Lk:
        q_probe = jnp.sum(q, axis=1)
        k_abs = jnp.abs(k) + k
        score = jnp.sum(q_probe[:, None, :] * k_abs, axis=2)            # [BH, Lk]
        idx = jax.lax.top_k(score, tk)[1]
        idx_e = jnp.broadcast_to(idx[:, :, None], (B * H, tk, C))
        k = jnp.take_along_axis(k, idx_e, axis=1)
        v = jnp.take_along_axis(v, idx_e, axis=1)

    def collect(x):                                      # '(B h) L C -> B L (h C)'
        L = x.shape[1]
        return x.reshape(B, H, L, C).transpose(0, 2, 1, 3).reshape(B, L, E)

    qc, kc, vc = collect(q), collect(k), collect(v)

    qp = qc @ w_in[:E].T + b_in[:E]
    kp = kc @ w_in[E:2 * E].T + b_in[E:2 * E]
    vp = vc @ w_in[2 * E:].T + b_in[2 * E:]
    kp = jnp.concatenate([kp, jnp.broadcast_to(bias_k[None, None, :], (B, 1, E))], axis=1)
    vp = jnp.concatenate([vp, jnp.broadcast_to(bias_v[None, None, :], (B, 1, E))], axis=1)

    def heads(x):
        return x.reshape(B, x.shape[1], H, D).transpose(0, 2, 1, 3)     # [B, H, L, D]

    qh, kh, vh = heads(qp), heads(kp), heads(vp)
    s = jnp.einsum('bhqd,bhkd->bhqk', qh, kh) / math.sqrt(D)
    p = jax.nn.softmax(s, axis=-1)
    o = jnp.einsum('bhqk,bhkd->bhqd', p, vh)
    o = o.transpose(0, 2, 1, 3).reshape(B, Lq, E)
    o = o @ w_out.T + b_out
    return o.transpose(0, 2, 1).reshape(query.shape)


if __name__ == "__main__":
    B, E, H = 2, 32, 4          # embed_dim == channels == 32, num_heads == 4
    spatial = (8, 8)            # L = 64, default top_k = 64 // 4 = 16 -> pruning active

    key = jax.random.PRNGKey(0)
    ks = jax.random.split(key, 9)
    query = jax.random.normal(ks[0], (B, E) + spatial, jnp.float32)
    keys_ = jax.random.normal(ks[1], (B, E) + spatial, jnp.float32)
    values = jax.random.normal(ks[2], (B, E) + spatial, jnp.float32)

    bound = 1.0 / math.sqrt(E)
    w_in = jax.random.uniform(ks[3], (3 * E, E), jnp.float32, -bound, bound)
    b_in = jax.random.uniform(ks[4], (3 * E,), jnp.float32, -bound, bound)
    bias_k = 0.3 * jax.random.normal(ks[5], (E,), jnp.float32)   # ~xavier_normal scale
    bias_v = 0.3 * jax.random.normal(ks[6], (E,), jnp.float32)
    w_out = jax.random.uniform(ks[7], (E, E), jnp.float32, -bound, bound)
    b_out = jax.random.uniform(ks[8], (E,), jnp.float32, -bound, bound)

    out = pruned_multihead_attention(query, keys_, values,
                                     w_in, b_in, bias_k, bias_v, w_out, b_out,
                                     num_heads=H)
    out = jax.block_until_ready(out)

    ref = reference(query, keys_, values, w_in, b_in, bias_k, bias_v, w_out, b_out, H)
    # bf16 MXU operands in the attention kernel -> compare at bf16-level tolerance.
    np.testing.assert_allclose(np.asarray(out), np.asarray(ref), rtol=2e-2, atol=2e-2)
    assert out.shape == query.shape

    print("KERNEL_OK")
</pallas_src>

<mosaic_0001>
module attributes {stable_mosaic.version = 11 : i64} {
  func.func @_prune_score_kernel(%arg0: i32, %arg1: memref<1x64x32xf32, #tpu.memory_space<vmem>>, %arg2: memref<1x32x64xf32, #tpu.memory_space<vmem>>, %arg3: memref<1x4x64xf32, #tpu.memory_space<vmem>>) attributes {dimension_semantics = [#tpu.dimension_semantics<parallel>], iteration_bounds = array<i64: 2>, scalar_prefetch = 0 : i64, scratch_operands = 0 : i64, tpu.core_type = #tpu.core_type<tc>, window_params = [{transform_indices = @transform_0, window_bounds = array<i64: 1, 64, 32>}, {transform_indices = @transform_1, window_bounds = array<i64: 1, 32, 64>}, {transform_indices = @transform_2, window_bounds = array<i64: 1, 4, 64>}]} {
    %c0 = arith.constant 0 : index
    %c0_0 = arith.constant 0 : index
    %c0_1 = arith.constant 0 : index
    %0 = vector.load %arg1[%c0, %c0_0, %c0_1] : memref<1x64x32xf32, #tpu.memory_space<vmem>>, vector<1x64x32xf32>
    %1 = vector.shape_cast %0 : vector<1x64x32xf32> to vector<64x32xf32>
    %c0_2 = arith.constant 0 : index
    %c0_3 = arith.constant 0 : index
    %c0_4 = arith.constant 0 : index
    %2 = vector.load %arg2[%c0_2, %c0_3, %c0_4] : memref<1x32x64xf32, #tpu.memory_space<vmem>>, vector<1x32x64xf32>
    %3 = vector.shape_cast %2 : vector<1x32x64xf32> to vector<32x64xf32>
    %4 = vector.extract_strided_slice %1 {offsets = [0, 0], sizes = [64, 8], strides = [1, 1]} : vector<64x32xf32> to vector<64x8xf32>
    %5 = vector.extract_strided_slice %3 {offsets = [0, 0], sizes = [8, 64], strides = [1, 1]} : vector<32x64xf32> to vector<8x64xf32>
    %6 = arith.mulf %4, %4 : vector<64x8xf32>
    %cst = arith.constant dense<0.000000e+00> : vector<64xf32>
    %7 = vector.multi_reduction <add>, %6, %cst [1] : vector<64x8xf32> to vector<64xf32>
    %8 = vector.shape_cast %7 : vector<64xf32> to vector<64x1xf32>
    %cst_5 = arith.constant 1.000000e-24 : f32
    %9 = vector.broadcast %cst_5 : f32 to vector<64x1xf32>
    %10 = arith.maximumf %8, %9 : vector<64x1xf32>
    %11 = math.rsqrt %10 : vector<64x1xf32>
    %12 = vector.broadcast %11 : vector<64x1xf32> to vector<64x8xf32>
    %13 = arith.mulf %4, %12 : vector<64x8xf32>
    %14 = arith.mulf %5, %5 : vector<8x64xf32>
    %cst_6 = arith.constant dense<0.000000e+00> : vector<64xf32>
    %15 = vector.multi_reduction <add>, %14, %cst_6 [0] : vector<8x64xf32> to vector<64xf32>
    %16 = vector.shape_cast %15 : vector<64xf32> to vector<1x64xf32>
    %cst_7 = arith.constant 1.000000e-24 : f32
    %17 = vector.broadcast %cst_7 : f32 to vector<1x64xf32>
    %18 = arith.maximumf %16, %17 : vector<1x64xf32>
    %19 = math.rsqrt %18 : vector<1x64xf32>
    %cst_8 = arith.constant dense<0.000000e+00> : vector<8xf32>
    %20 = vector.multi_reduction <add>, %13, %cst_8 [0] : vector<64x8xf32> to vector<8xf32>
    %21 = vector.shape_cast %20 : vector<8xf32> to vector<1x8xf32>
    %22 = math.absf %5 : vector<8x64xf32>
    %23 = arith.addf %22, %5 : vector<8x64xf32>
    %24 = vector.broadcast %19 : vector<1x64xf32> to vector<8x64xf32>
    %25 = arith.mulf %23, %24 : vector<8x64xf32>
    %cst_9 = arith.constant dense<0.000000e+00> : vector<1x64xf32>
    %26 = tpu.matmul %21, %25, %cst_9 {dimension_numbers = #tpu.dot_dimension_numbers<[1], [0], [0], [1], [0, 0, 1, 1], [], []>} : vector<1x8xf32>, vector<8x64xf32>, vector<1x64xf32> -> vector<1x64xf32>
    %c0_10 = arith.constant 0 : index
    %c0_11 = arith.constant 0 : index
    %c0_12 = arith.constant 0 : index
    %27 = vector.load %arg3[%c0_10, %c0_11, %c0_12] : memref<1x4x64xf32, #tpu.memory_space<vmem>>, vector<1x1x64xf32>
    %28 = vector.shape_cast %27 : vector<1x1x64xf32> to vector<1x64xf32>
    %29 = vector.shape_cast %26 : vector<1x64xf32> to vector<1x1x64xf32>
    tpu.vector_store %arg3[%c0_10, %c0_11, %c0_12], %29 {strides = array<i32>} : memref<1x4x64xf32, #tpu.memory_space<vmem>>, vector<1x1x64xf32>,
    %30 = vector.extract_strided_slice %1 {offsets = [0, 8], sizes = [64, 8], strides = [1, 1]} : vector<64x32xf32> to vector<64x8xf32>
    %31 = vector.extract_strided_slice %3 {offsets = [8, 0], sizes = [8, 64], strides = [1, 1]} : vector<32x64xf32> to vector<8x64xf32>
    %32 = arith.mulf %30, %30 : vector<64x8xf32>
    %cst_13 = arith.constant dense<0.000000e+00> : vector<64xf32>
    %33 = vector.multi_reduction <add>, %32, %cst_13 [1] : vector<64x8xf32> to vector<64xf32>
    %34 = vector.shape_cast %33 : vector<64xf32> to vector<64x1xf32>
    %cst_14 = arith.constant 1.000000e-24 : f32
    %35 = vector.broadcast %cst_14 : f32 to vector<64x1xf32>
    %36 = arith.maximumf %34, %35 : vector<64x1xf32>
    %37 = math.rsqrt %36 : vector<64x1xf32>
    %38 = vector.broadcast %37 : vector<64x1xf32> to vector<64x8xf32>
    %39 = arith.mulf %30, %38 : vector<64x8xf32>
    %40 = arith.mulf %31, %31 : vector<8x64xf32>
    %cst_15 = arith.constant dense<0.000000e+00> : vector<64xf32>
    %41 = vector.multi_reduction <add>, %40, %cst_15 [0] : vector<8x64xf32> to vector<64xf32>
    %42 = vector.shape_cast %41 : vector<64xf32> to vector<1x64xf32>
    %cst_16 = arith.constant 1.000000e-24 : f32
    %43 = vector.broadcast %cst_16 : f32 to vector<1x64xf32>
    %44 = arith.maximumf %42, %43 : vector<1x64xf32>
    %45 = math.rsqrt %44 : vector<1x64xf32>
    %cst_17 = arith.constant dense<0.000000e+00> : vector<8xf32>
    %46 = vector.multi_reduction <add>, %39, %cst_17 [0] : vector<64x8xf32> to vector<8xf32>
    %47 = vector.shape_cast %46 : vector<8xf32> to vector<1x8xf32>
    %48 = math.absf %31 : vector<8x64xf32>
    %49 = arith.addf %48, %31 : vector<8x64xf32>
    %50 = vector.broadcast %45 : vector<1x64xf32> to vector<8x64xf32>
    %51 = arith.mulf %49, %50 : vector<8x64xf32>
    %cst_18 = arith.constant dense<0.000000e+00> : vector<1x64xf32>
    %52 = tpu.matmul %47, %51, %cst_18 {dimension_numbers = #tpu.dot_dimension_numbers<[1], [0], [0], [1], [0, 0, 1, 1], [], []>} : vector<1x8xf32>, vector<8x64xf32>, vector<1x64xf32> -> vector<1x64xf32>
    %c0_19 = arith.constant 0 : index
    %c1 = arith.constant 1 : index
    %c0_20 = arith.constant 0 : index
    %53 = vector.load %arg3[%c0_19, %c1, %c0_20] : memref<1x4x64xf32, #tpu.memory_space<vmem>>, vector<1x1x64xf32>
    %54 = vector.shape_cast %53 : vector<1x1x64xf32> to vector<1x64xf32>
    %55 = vector.shape_cast %52 : vector<1x64xf32> to vector<1x1x64xf32>
    tpu.vector_store %arg3[%c0_19, %c1, %c0_20], %55 {strides = array<i32>} : memref<1x4x64xf32, #tpu.memory_space<vmem>>, vector<1x1x64xf32>,
    %56 = vector.extract_strided_slice %1 {offsets = [0, 16], sizes = [64, 8], strides = [1, 1]} : vector<64x32xf32> to vector<64x8xf32>
    %57 = vector.extract_strided_slice %3 {offsets = [16, 0], sizes = [8, 64], strides = [1, 1]} : vector<32x64xf32> to vector<8x64xf32>
    %58 = arith.mulf %56, %56 : vector<64x8xf32>
    %cst_21 = arith.constant dense<0.000000e+00> : vector<64xf32>
    %59 = vector.multi_reduction <add>, %58, %cst_21 [1] : vector<64x8xf32> to vector<64xf32>
    %60 = vector.shape_cast %59 : vector<64xf32> to vector<64x1xf32>
    %cst_22 = arith.constant 1.000000e-24 : f32
    %61 = vector.broadcast %cst_22 : f32 to vector<64x1xf32>
    %62 = arith.maximumf %60, %61 : vector<64x1xf32>
    %63 = math.rsqrt %62 : vector<64x1xf32>
    %64 = vector.broadcast %63 : vector<64x1xf32> to vector<64x8xf32>
    %65 = arith.mulf %56, %64 : vector<64x8xf32>
    %66 = arith.mulf %57, %57 : vector<8x64xf32>
    %cst_23 = arith.constant dense<0.000000e+00> : vector<64xf32>
    %67 = vector.multi_reduction <add>, %66, %cst_23 [0] : vector<8x64xf32> to vector<64xf32>
    %68 = vector.shape_cast %67 : vector<64xf32> to vector<1x64xf32>
    %cst_24 = arith.constant 1.000000e-24 : f32
    %69 = vector.broadcast %cst_24 : f32 to vector<1x64xf32>
    %70 = arith.maximumf %68, %69 : vector<1x64xf32>
    %71 = math.rsqrt %70 : vector<1x64xf32>
    %cst_25 = arith.constant dense<0.000000e+00> : vector<8xf32>
    %72 = vector.multi_reduction <add>, %65, %cst_25 [0] : vector<64x8xf32> to vector<8xf32>
    %73 = vector.shape_cast %72 : vector<8xf32> to vector<1x8xf32>
    %74 = math.absf %57 : vector<8x64xf32>
    %75 = arith.addf %74, %57 : vector<8x64xf32>
    %76 = vector.broadcast %71 : vector<1x64xf32> to vector<8x64xf32>
    %77 = arith.mulf %75, %76 : vector<8x64xf32>
    %cst_26 = arith.constant dense<0.000000e+00> : vector<1x64xf32>
    %78 = tpu.matmul %73, %77, %cst_26 {dimension_numbers = #tpu.dot_dimension_numbers<[1], [0], [0], [1], [0, 0, 1, 1], [], []>} : vector<1x8xf32>, vector<8x64xf32>, vector<1x64xf32> -> vector<1x64xf32>
    %c0_27 = arith.constant 0 : index
    %c2 = arith.constant 2 : index
    %c0_28 = arith.constant 0 : index
    %79 = vector.load %arg3[%c0_27, %c2, %c0_28] : memref<1x4x64xf32, #tpu.memory_space<vmem>>, vector<1x1x64xf32>
    %80 = vector.shape_cast %79 : vector<1x1x64xf32> to vector<1x64xf32>
    %81 = vector.shape_cast %78 : vector<1x64xf32> to vector<1x1x64xf32>
    tpu.vector_store %arg3[%c0_27, %c2, %c0_28], %81 {strides = array<i32>} : memref<1x4x64xf32, #tpu.memory_space<vmem>>, vector<1x1x64xf32>,
    %82 = vector.extract_strided_slice %1 {offsets = [0, 24], sizes = [64, 8], strides = [1, 1]} : vector<64x32xf32> to vector<64x8xf32>
    %83 = vector.extract_strided_slice %3 {offsets = [24, 0], sizes = [8, 64], strides = [1, 1]} : vector<32x64xf32> to vector<8x64xf32>
    %84 = arith.mulf %82, %82 : vector<64x8xf32>
    %cst_29 = arith.constant dense<0.000000e+00> : vector<64xf32>
    %85 = vector.multi_reduction <add>, %84, %cst_29 [1] : vector<64x8xf32> to vector<64xf32>
    %86 = vector.shape_cast %85 : vector<64xf32> to vector<64x1xf32>
    %cst_30 = arith.constant 1.000000e-24 : f32
    %87 = vector.broadcast %cst_30 : f32 to vector<64x1xf32>
    %88 = arith.maximumf %86, %87 : vector<64x1xf32>
    %89 = math.rsqrt %88 : vector<64x1xf32>
    %90 = vector.broadcast %89 : vector<64x1xf32> to vector<64x8xf32>
    %91 = arith.mulf %82, %90 : vector<64x8xf32>
    %92 = arith.mulf %83, %83 : vector<8x64xf32>
    %cst_31 = arith.constant dense<0.000000e+00> : vector<64xf32>
    %93 = vector.multi_reduction <add>, %92, %cst_31 [0] : vector<8x64xf32> to vector<64xf32>
    %94 = vector.shape_cast %93 : vector<64xf32> to vector<1x64xf32>
    %cst_32 = arith.constant 1.000000e-24 : f32
    %95 = vector.broadcast %cst_32 : f32 to vector<1x64xf32>
    %96 = arith.maximumf %94, %95 : vector<1x64xf32>
    %97 = math.rsqrt %96 : vector<1x64xf32>
    %cst_33 = arith.constant dense<0.000000e+00> : vector<8xf32>
    %98 = vector.multi_reduction <add>, %91, %cst_33 [0] : vector<64x8xf32> to vector<8xf32>
    %99 = vector.shape_cast %98 : vector<8xf32> to vector<1x8xf32>
    %100 = math.absf %83 : vector<8x64xf32>
    %101 = arith.addf %100, %83 : vector<8x64xf32>
    %102 = vector.broadcast %97 : vector<1x64xf32> to vector<8x64xf32>
    %103 = arith.mulf %101, %102 : vector<8x64xf32>
    %cst_34 = arith.constant dense<0.000000e+00> : vector<1x64xf32>
    %104 = tpu.matmul %99, %103, %cst_34 {dimension_numbers = #tpu.dot_dimension_numbers<[1], [0], [0], [1], [0, 0, 1, 1], [], []>} : vector<1x8xf32>, vector<8x64xf32>, vector<1x64xf32> -> vector<1x64xf32>
    %c0_35 = arith.constant 0 : index
    %c3 = arith.constant 3 : index
    %c0_36 = arith.constant 0 : index
    %105 = vector.load %arg3[%c0_35, %c3, %c0_36] : memref<1x4x64xf32, #tpu.memory_space<vmem>>, vector<1x1x64xf32>
    %106 = vector.shape_cast %105 : vector<1x1x64xf32> to vector<1x64xf32>
    %107 = vector.shape_cast %104 : vector<1x64xf32> to vector<1x1x64xf32>
    tpu.vector_store %arg3[%c0_35, %c3, %c0_36], %107 {strides = array<i32>} : memref<1x4x64xf32, #tpu.memory_space<vmem>>, vector<1x1x64xf32>,
    return
  }
  func.func @transform_0(%arg0: i32) -> (i32, i32, i32) {
    %c0_i32 = arith.constant 0 : i32
    %c0_i32_0 = arith.constant 0 : i32
    %c0_i32_1 = arith.constant 0 : i32
    return %arg0, %c0_i32, %c0_i32_0 : i32, i32, i32
  }
  func.func @transform_1(%arg0: i32) -> (i32, i32, i32) {
    %c0_i32 = arith.constant 0 : i32
    %c0_i32_0 = arith.constant 0 : i32
    %c0_i32_1 = arith.constant 0 : i32
    return %arg0, %c0_i32, %c0_i32_0 : i32, i32, i32
  }
  func.func @transform_2(%arg0: i32) -> (i32, i32, i32) {
    %c0_i32 = arith.constant 0 : i32
    %c0_i32_0 = arith.constant 0 : i32
    %c0_i32_1 = arith.constant 0 : i32
    return %arg0, %c0_i32, %c0_i32_0 : i32, i32, i32
  }
}

module attributes {stable_mosaic.version = 11 : i64} {
  func.func @_attention_kernel(%arg0: i32, %arg1: i32, %arg2: memref<1x64x32xf32, #tpu.memory_space<vmem>>, %arg3: memref<1x32x16xf32, #tpu.memory_space<vmem>>, %arg4: memref<1x32x16xf32, #tpu.memory_space<vmem>>, %arg5: memref<32x4xf32, #tpu.memory_space<vmem>>, %arg6: memref<4x32xf32, #tpu.memory_space<vmem>>, %arg7: memref<96x32xbf16, #tpu.memory_space<vmem>>, %arg8: memref<1x32xf32, #tpu.memory_space<vmem>>, %arg9: memref<64x1xf32, #tpu.memory_space<vmem>>, %arg10: memref<2x32xf32, #tpu.memory_space<vmem>>, %arg11: memref<32x32xbf16, #tpu.memory_space<vmem>>, %arg12: memref<32x1xf32, #tpu.memory_space<vmem>>, %arg13: memref<1x32x64xf32, #tpu.memory_space<vmem>>) attributes {dimension_semantics = [#tpu.dimension_semantics<parallel>, #tpu.dimension_semantics<parallel>], iteration_bounds = array<i64: 2, 1>, scalar_prefetch = 0 : i64, scratch_operands = 0 : i64, tpu.core_type = #tpu.core_type<tc>, window_params = [{transform_indices = @transform_0, window_bounds = array<i64: 1, 64, 32>}, {transform_indices = @transform_1, window_bounds = array<i64: 1, 32, 16>}, {transform_indices = @transform_2, window_bounds = array<i64: 1, 32, 16>}, {pipeline_mode = #tpu.pipeline_mode<synchronous>, transform_indices = @transform_3, window_bounds = array<i64: 32, 4>}, {pipeline_mode = #tpu.pipeline_mode<synchronous>, transform_indices = @transform_4, window_bounds = array<i64: 4, 32>}, {pipeline_mode = #tpu.pipeline_mode<synchronous>, transform_indices = @transform_5, window_bounds = array<i64: 96, 32>}, {pipeline_mode = #tpu.pipeline_mode<synchronous>, transform_indices = @transform_6, window_bounds = array<i64: 1, 32>}, {pipeline_mode = #tpu.pipeline_mode<synchronous>, transform_indices = @transform_7, window_bounds = array<i64: 64, 1>}, {pipeline_mode = #tpu.pipeline_mode<synchronous>, transform_indices = @transform_8, window_bounds = array<i64: 2, 32>}, {pipeline_mode = #tpu.pipeline_mode<synchronous>, transform_indices = @transform_9, window_bounds = array<i64: 32, 32>}, {pipeline_mode = #tpu.pipeline_mode<synchronous>, transform_indices = @transform_10, window_bounds = array<i64: 32, 1>}, {transform_indices = @transform_11, window_bounds = array<i64: 1, 32, 64>}]} {
    %c0 = arith.constant 0 : index
    %c0_0 = arith.constant 0 : index
    %c0_1 = arith.constant 0 : index
    %0 = vector.load %arg2[%c0, %c0_0, %c0_1] : memref<1x64x32xf32, #tpu.memory_space<vmem>>, vector<1x64x32xf32>
    %1 = vector.shape_cast %0 : vector<1x64x32xf32> to vector<64x32xf32>
    %c0_2 = arith.constant 0 : index
    %c0_3 = arith.constant 0 : index
    %c0_4 = arith.constant 0 : index
    %2 = vector.load %arg3[%c0_2, %c0_3, %c0_4] : memref<1x32x16xf32, #tpu.memory_space<vmem>>, vector<1x32x16xf32>
    %3 = vector.shape_cast %2 : vector<1x32x16xf32> to vector<32x16xf32>
    %c0_5 = arith.constant 0 : index
    %c0_6 = arith.constant 0 : index
    %c0_7 = arith.constant 0 : index
    %4 = vector.load %arg4[%c0_5, %c0_6, %c0_7] : memref<1x32x16xf32, #tpu.memory_space<vmem>>, vector<1x32x16xf32>
    %5 = vector.shape_cast %4 : vector<1x32x16xf32> to vector<32x16xf32>
    %c0_8 = arith.constant 0 : index
    %c0_9 = arith.constant 0 : index
    %6 = vector.load %arg5[%c0_8, %c0_9] : memref<32x4xf32, #tpu.memory_space<vmem>>, vector<32x4xf32>
    %c0_10 = arith.constant 0 : index
    %c0_11 = arith.constant 0 : index
    %7 = vector.load %arg6[%c0_10, %c0_11] : memref<4x32xf32, #tpu.memory_space<vmem>>, vector<4x32xf32>
    %8 = arith.mulf %1, %1 : vector<64x32xf32>
    %cst = arith.constant dense<0.000000e+00> : vector<64x4xf32>
    %9 = tpu.matmul %8, %6, %cst {dimension_numbers = #tpu.dot_dimension_numbers<[1], [0], [0], [1], [0, 0, 1, 1], [], []>} : vector<64x32xf32>, vector<32x4xf32>, vector<64x4xf32> -> vector<64x4xf32>
    %cst_12 = arith.constant 1.000000e-24 : f32
    %10 = vector.broadcast %cst_12 : f32 to vector<64x4xf32>
    %11 = arith.maximumf %9, %10 : vector<64x4xf32>
    %12 = math.rsqrt %11 : vector<64x4xf32>
    %cst_13 = arith.constant dense<0.000000e+00> : vector<64x32xf32>
    %13 = tpu.matmul %12, %7, %cst_13 {dimension_numbers = #tpu.dot_dimension_numbers<[1], [0], [0], [1], [0, 0, 1, 1], [], []>} : vector<64x4xf32>, vector<4x32xf32>, vector<64x32xf32> -> vector<64x32xf32>
    %14 = arith.mulf %1, %13 : vector<64x32xf32>
    %15 = arith.truncf %14 : vector<64x32xf32> to vector<64x32xbf16>
    %16 = arith.mulf %3, %3 : vector<32x16xf32>
    %cst_14 = arith.constant dense<0.000000e+00> : vector<4x16xf32>
    %17 = tpu.matmul %7, %16, %cst_14 {dimension_numbers = #tpu.dot_dimension_numbers<[1], [0], [0], [1], [0, 0, 1, 1], [], []>} : vector<4x32xf32>, vector<32x16xf32>, vector<4x16xf32> -> vector<4x16xf32>
    %cst_15 = arith.constant 1.000000e-24 : f32
    %18 = vector.broadcast %cst_15 : f32 to vector<4x16xf32>
    %19 = arith.maximumf %17, %18 : vector<4x16xf32>
    %20 = math.rsqrt %19 : vector<4x16xf32>
    %cst_16 = arith.constant dense<0.000000e+00> : vector<32x16xf32>
    %21 = tpu.matmul %6, %20, %cst_16 {dimension_numbers = #tpu.dot_dimension_numbers<[1], [0], [0], [1], [0, 0, 1, 1], [], []>} : vector<32x4xf32>, vector<4x16xf32>, vector<32x16xf32> -> vector<32x16xf32>
    %22 = arith.mulf %3, %21 : vector<32x16xf32>
    %23 = arith.truncf %22 : vector<32x16xf32> to vector<32x16xbf16>
    %24 = arith.truncf %5 : vector<32x16xf32> to vector<32x16xbf16>
    %c0_17 = arith.constant 0 : index
    %c0_18 = arith.constant 0 : index
    %25 = vector.load %arg7[%c0_17, %c0_18] : memref<96x32xbf16, #tpu.memory_space<vmem>>, vector<96x32xbf16>
    %c0_19 = arith.constant 0 : index
    %c0_20 = arith.constant 0 : index
    %26 = vector.load %arg9[%c0_19, %c0_20] : memref<64x1xf32, #tpu.memory_space<vmem>>, vector<64x1xf32>
    %27 = vector.extract_strided_slice %25 {offsets = [0, 0], sizes = [32, 32], strides = [1, 1]} : vector<96x32xbf16> to vector<32x32xbf16>
    %cst_21 = arith.constant dense<0.000000e+00> : vector<64x32xf32>
    %28 = tpu.matmul %15, %27, %cst_21 {dimension_numbers = #tpu.dot_dimension_numbers<[1], [1], [0], [0], [0, 0, 1, 0], [], []>} : vector<64x32xbf16>, vector<32x32xbf16>, vector<64x32xf32> -> vector<64x32xf32>
    %c0_22 = arith.constant 0 : index
    %c0_23 = arith.constant 0 : index
    %29 = vector.load %arg8[%c0_22, %c0_23] : memref<1x32xf32, #tpu.memory_space<vmem>>, vector<1x32xf32>
    %30 = vector.broadcast %29 : vector<1x32xf32> to vector<64x32xf32>
    %31 = arith.addf %28, %30 : vector<64x32xf32>
    %cst_24 = arith.constant 0.353553385 : f32
    %32 = vector.broadcast %cst_24 : f32 to vector<64x32xf32>
    %33 = arith.mulf %31, %32 : vector<64x32xf32>
    %34 = vector.extract_strided_slice %25 {offsets = [32, 0], sizes = [32, 32], strides = [1, 1]} : vector<96x32xbf16> to vector<32x32xbf16>
    %cst_25 = arith.constant dense<0.000000e+00> : vector<32x16xf32>
    %35 = tpu.matmul %34, %23, %cst_25 {dimension_numbers = #tpu.dot_dimension_numbers<[1], [0], [0], [1], [0, 0, 1, 1], [], []>} : vector<32x32xbf16>, vector<32x16xbf16>, vector<32x16xf32> -> vector<32x16xf32>
    %36 = vector.extract_strided_slice %26 {offsets = [0, 0], sizes = [32, 1], strides = [1, 1]} : vector<64x1xf32> to vector<32x1xf32>
    %37 = vector.broadcast %36 : vector<32x1xf32> to vector<32x16xf32>
    %38 = arith.addf %35, %37 : vector<32x16xf32>
    %39 = vector.extract_strided_slice %25 {offsets = [64, 0], sizes = [32, 32], strides = [1, 1]} : vector<96x32xbf16> to vector<32x32xbf16>
    %cst_26 = arith.constant dense<0.000000e+00> : vector<32x16xf32>
    %40 = tpu.matmul %39, %24, %cst_26 {dimension_numbers = #tpu.dot_dimension_numbers<[1], [0], [0], [1], [0, 0, 1, 1], [], []>} : vector<32x32xbf16>, vector<32x16xbf16>, vector<32x16xf32> -> vector<32x16xf32>
    %41 = vector.extract_strided_slice %26 {offsets = [32, 0], sizes = [32, 1], strides = [1, 1]} : vector<64x1xf32> to vector<32x1xf32>
    %42 = vector.broadcast %41 : vector<32x1xf32> to vector<32x16xf32>
    %43 = arith.addf %40, %42 : vector<32x16xf32>
    %c0_27 = arith.constant 0 : index
    %c0_28 = arith.constant 0 : index
    %44 = vector.load %arg10[%c0_27, %c0_28] : memref<2x32xf32, #tpu.memory_space<vmem>>, vector<2x32xf32>
    %45 = vector.extract_strided_slice %44 {offsets = [0, 0], sizes = [1, 32], strides = [1, 1]} : vector<2x32xf32> to vector<1x32xf32>
    %46 = vector.broadcast %45 : vector<1x32xf32> to vector<64x32xf32>
    %47 = arith.mulf %33, %46 : vector<64x32xf32>
    %cst_29 = arith.constant dense<0.000000e+00> : vector<64x4xf32>
    %48 = tpu.matmul %47, %6, %cst_29 {dimension_numbers = #tpu.dot_dimension_numbers<[1], [0], [0], [1], [0, 0, 1, 1], [], []>} : vector<64x32xf32>, vector<32x4xf32>, vector<64x4xf32> -> vector<64x4xf32>
    %c0_30 = arith.constant 0 : index
    %c0_31 = arith.constant 0 : index
    %49 = vector.load %arg11[%c0_30, %c0_31] : memref<32x32xbf16, #tpu.memory_space<vmem>>, vector<32x32xbf16>
    %cst_32 = arith.constant 0.000000e+00 : f32
    %50 = vector.broadcast %cst_32 : f32 to vector<32x64xf32>
    %51 = vector.extract_strided_slice %33 {offsets = [0, 0], sizes = [64, 8], strides = [1, 1]} : vector<64x32xf32> to vector<64x8xf32>
    %52 = arith.truncf %51 : vector<64x8xf32> to vector<64x8xbf16>
    %53 = vector.extract_strided_slice %38 {offsets = [0, 0], sizes = [8, 16], strides = [1, 1]} : vector<32x16xf32> to vector<8x16xf32>
    %54 = arith.truncf %53 : vector<8x16xf32> to vector<8x16xbf16>
    %55 = vector.extract_strided_slice %43 {offsets = [0, 0], sizes = [8, 16], strides = [1, 1]} : vector<32x16xf32> to vector<8x16xf32>
    %56 = arith.truncf %55 : vector<8x16xf32> to vector<8x16xbf16>
    %cst_33 = arith.constant dense<0.000000e+00> : vector<64x16xf32>
    %57 = tpu.matmul %52, %54, %cst_33 {dimension_numbers = #tpu.dot_dimension_numbers<[1], [0], [0], [1], [0, 0, 1, 1], [], []>} : vector<64x8xbf16>, vector<8x16xbf16>, vector<64x16xf32> -> vector<64x16xf32>
    %58 = vector.extract_strided_slice %48 {offsets = [0, 0], sizes = [64, 1], strides = [1, 1]} : vector<64x4xf32> to vector<64x1xf32>
    %cst_34 = arith.constant dense<0xFF800000> : vector<64xf32>
    %59 = vector.multi_reduction <maximumf>, %57, %cst_34 [1] : vector<64x16xf32> to vector<64xf32>
    %60 = vector.shape_cast %59 : vector<64xf32> to vector<64x1xf32>
    %61 = arith.maximumf %60, %58 : vector<64x1xf32>
    %62 = vector.broadcast %61 : vector<64x1xf32> to vector<64x16xf32>
    %63 = arith.subf %57, %62 : vector<64x16xf32>
    %64 = math.exp %63 : vector<64x16xf32>
    %65 = arith.subf %58, %61 : vector<64x1xf32>
    %66 = math.exp %65 : vector<64x1xf32>
    %cst_35 = arith.constant dense<0.000000e+00> : vector<64xf32>
    %67 = vector.multi_reduction <add>, %64, %cst_35 [1] : vector<64x16xf32> to vector<64xf32>
    %68 = vector.shape_cast %67 : vector<64xf32> to vector<64x1xf32>
    %69 = arith.addf %68, %66 : vector<64x1xf32>
    %70 = tpu.reciprocal %69 {approx = true} : vector<64x1xf32> -> vector<64x1xf32>
    %71 = arith.truncf %64 : vector<64x16xf32> to vector<64x16xbf16>
    %cst_36 = arith.constant dense<0.000000e+00> : vector<64x8xf32>
    %72 = tpu.matmul %71, %56, %cst_36 {dimension_numbers = #tpu.dot_dimension_numbers<[1], [1], [0], [0], [0, 0, 1, 0], [], []>} : vector<64x16xbf16>, vector<8x16xbf16>, vector<64x8xf32> -> vector<64x8xf32>
    %73 = vector.extract_strided_slice %44 {offsets = [1, 0], sizes = [1, 8], strides = [1, 1]} : vector<2x32xf32> to vector<1x8xf32>
    %74 = vector.broadcast %66 : vector<64x1xf32> to vector<64x8xf32>
    %75 = vector.broadcast %73 : vector<1x8xf32> to vector<64x8xf32>
    %76 = arith.mulf %74, %75 : vector<64x8xf32>
    %77 = arith.addf %72, %76 : vector<64x8xf32>
    %78 = vector.broadcast %70 : vector<64x1xf32> to vector<64x8xf32>
    %79 = arith.mulf %77, %78 : vector<64x8xf32>
    %80 = vector.extract_strided_slice %49 {offsets = [0, 0], sizes = [32, 8], strides = [1, 1]} : vector<32x32xbf16> to vector<32x8xbf16>
    %81 = arith.truncf %79 : vector<64x8xf32> to vector<64x8xbf16>
    %cst_37 = arith.constant dense<0.000000e+00> : vector<32x64xf32>
    %82 = tpu.matmul %80, %81, %cst_37 {dimension_numbers = #tpu.dot_dimension_numbers<[1], [1], [0], [0], [0, 0, 1, 0], [], []>} : vector<32x8xbf16>, vector<64x8xbf16>, vector<32x64xf32> -> vector<32x64xf32>
    %83 = arith.addf %50, %82 : vector<32x64xf32>
    %84 = vector.extract_strided_slice %33 {offsets = [0, 8], sizes = [64, 8], strides = [1, 1]} : vector<64x32xf32> to vector<64x8xf32>
    %85 = arith.truncf %84 : vector<64x8xf32> to vector<64x8xbf16>
    %86 = vector.extract_strided_slice %38 {offsets = [8, 0], sizes = [8, 16], strides = [1, 1]} : vector<32x16xf32> to vector<8x16xf32>
    %87 = arith.truncf %86 : vector<8x16xf32> to vector<8x16xbf16>
    %88 = vector.extract_strided_slice %43 {offsets = [8, 0], sizes = [8, 16], strides = [1, 1]} : vector<32x16xf32> to vector<8x16xf32>
    %89 = arith.truncf %88 : vector<8x16xf32> to vector<8x16xbf16>
    %cst_38 = arith.constant dense<0.000000e+00> : vector<64x16xf32>
    %90 = tpu.matmul %85, %87, %cst_38 {dimension_numbers = #tpu.dot_dimension_numbers<[1], [0], [0], [1], [0, 0, 1, 1], [], []>} : vector<64x8xbf16>, vector<8x16xbf16>, vector<64x16xf32> -> vector<64x16xf32>
    %91 = vector.extract_strided_slice %48 {offsets = [0, 1], sizes = [64, 1], strides = [1, 1]} : vector<64x4xf32> to vector<64x1xf32>
    %cst_39 = arith.constant dense<0xFF800000> : vector<64xf32>
    %92 = vector.multi_reduction <maximumf>, %90, %cst_39 [1] : vector<64x16xf32> to vector<64xf32>
    %93 = vector.shape_cast %92 : vector<64xf32> to vector<64x1xf32>
    %94 = arith.maximumf %93, %91 : vector<64x1xf32>
    %95 = vector.broadcast %94 : vector<64x1xf32> to vector<64x16xf32>
    %96 = arith.subf %90, %95 : vector<64x16xf32>
    %97 = math.exp %96 : vector<64x16xf32>
    %98 = arith.subf %91, %94 : vector<64x1xf32>
    %99 = math.exp %98 : vector<64x1xf32>
    %cst_40 = arith.constant dense<0.000000e+00> : vector<64xf32>
    %100 = vector.multi_reduction <add>, %97, %cst_40 [1] : vector<64x16xf32> to vector<64xf32>
    %101 = vector.shape_cast %100 : vector<64xf32> to vector<64x1xf32>
    %102 = arith.addf %101, %99 : vector<64x1xf32>
    %103 = tpu.reciprocal %102 {approx = true} : vector<64x1xf32> -> vector<64x1xf32>
    %104 = arith.truncf %97 : vector<64x16xf32> to vector<64x16xbf16>
    %cst_41 = arith.constant dense<0.000000e+00> : vector<64x8xf32>
    %105 = tpu.matmul %104, %89, %cst_41 {dimension_numbers = #tpu.dot_dimension_numbers<[1], [1], [0], [0], [0, 0, 1, 0], [], []>} : vector<64x16xbf16>, vector<8x16xbf16>, vector<64x8xf32> -> vector<64x8xf32>
    %106 = vector.extract_strided_slice %44 {offsets = [1, 8], sizes = [1, 8], strides = [1, 1]} : vector<2x32xf32> to vector<1x8xf32>
    %107 = vector.broadcast %99 : vector<64x1xf32> to vector<64x8xf32>
    %108 = vector.broadcast %106 : vector<1x8xf32> to vector<64x8xf32>
    %109 = arith.mulf %107, %108 : vector<64x8xf32>
    %110 = arith.addf %105, %109 : vector<64x8xf32>
    %111 = vector.broadcast %103 : vector<64x1xf32> to vector<64x8xf32>
    %112 = arith.mulf %110, %111 : vector<64x8xf32>
    %113 = vector.extract_strided_slice %49 {offsets = [0, 8], sizes = [32, 8], strides = [1, 1]} : vector<32x32xbf16> to vector<32x8xbf16>
    %114 = arith.truncf %112 : vector<64x8xf32> to vector<64x8xbf16>
    %cst_42 = arith.constant dense<0.000000e+00> : vector<32x64xf32>
    %115 = tpu.matmul %113, %114, %cst_42 {dimension_numbers = #tpu.dot_dimension_numbers<[1], [1], [0], [0], [0, 0, 1, 0], [], []>} : vector<32x8xbf16>, vector<64x8xbf16>, vector<32x64xf32> -> vector<32x64xf32>
    %116 = arith.addf %83, %115 : vector<32x64xf32>
    %117 = vector.extract_strided_slice %33 {offsets = [0, 16], sizes = [64, 8], strides = [1, 1]} : vector<64x32xf32> to vector<64x8xf32>
    %118 = arith.truncf %117 : vector<64x8xf32> to vector<64x8xbf16>
    %119 = vector.extract_strided_slice %38 {offsets = [16, 0], sizes = [8, 16], strides = [1, 1]} : vector<32x16xf32> to vector<8x16xf32>
    %120 = arith.truncf %119 : vector<8x16xf32> to vector<8x16xbf16>
    %121 = vector.extract_strided_slice %43 {offsets = [16, 0], sizes = [8, 16], strides = [1, 1]} : vector<32x16xf32> to vector<8x16xf32>
    %122 = arith.truncf %121 : vector<8x16xf32> to vector<8x16xbf16>
    %cst_43 = arith.constant dense<0.000000e+00> : vector<64x16xf32>
    %123 = tpu.matmul %118, %120, %cst_43 {dimension_numbers = #tpu.dot_dimension_numbers<[1], [0], [0], [1], [0, 0, 1, 1], [], []>} : vector<64x8xbf16>, vector<8x16xbf16>, vector<64x16xf32> -> vector<64x16xf32>
    %124 = vector.extract_strided_slice %48 {offsets = [0, 2], sizes = [64, 1], strides = [1, 1]} : vector<64x4xf32> to vector<64x1xf32>
    %cst_44 = arith.constant dense<0xFF800000> : vector<64xf32>
    %125 = vector.multi_reduction <maximumf>, %123, %cst_44 [1] : vector<64x16xf32> to vector<64xf32>
    %126 = vector.shape_cast %125 : vector<64xf32> to vector<64x1xf32>
    %127 = arith.maximumf %126, %124 : vector<64x1xf32>
    %128 = vector.broadcast %127 : vector<64x1xf32> to vector<64x16xf32>
    %129 = arith.subf %123, %128 : vector<64x16xf32>
    %130 = math.exp %129 : vector<64x16xf32>
    %131 = arith.subf %124, %127 : vector<64x1xf32>
    %132 = math.exp %131 : vector<64x1xf32>
    %cst_45 = arith.constant dense<0.000000e+00> : vector<64xf32>
    %133 = vector.multi_reduction <add>, %130, %cst_45 [1] : vector<64x16xf32> to vector<64xf32>
    %134 = vector.shape_cast %133 : vector<64xf32> to vector<64x1xf32>
    %135 = arith.addf %134, %132 : vector<64x1xf32>
    %136 = tpu.reciprocal %135 {approx = true} : vector<64x1xf32> -> vector<64x1xf32>
    %137 = arith.truncf %130 : vector<64x16xf32> to vector<64x16xbf16>
    %cst_46 = arith.constant dense<0.000000e+00> : vector<64x8xf32>
    %138 = tpu.matmul %137, %122, %cst_46 {dimension_numbers = #tpu.dot_dimension_numbers<[1], [1], [0], [0], [0, 0, 1, 0], [], []>} : vector<64x16xbf16>, vector<8x16xbf16>, vector<64x8xf32> -> vector<64x8xf32>
    %139 = vector.extract_strided_slice %44 {offsets = [1, 16], sizes = [1, 8], strides = [1, 1]} : vector<2x32xf32> to vector<1x8xf32>
    %140 = vector.broadcast %132 : vector<64x1xf32> to vector<64x8xf32>
    %141 = vector.broadcast %139 : vector<1x8xf32> to vector<64x8xf32>
    %142 = arith.mulf %140, %141 : vector<64x8xf32>
    %143 = arith.addf %138, %142 : vector<64x8xf32>
    %144 = vector.broadcast %136 : vector<64x1xf32> to vector<64x8xf32>
    %145 = arith.mulf %143, %144 : vector<64x8xf32>
    %146 = vector.extract_strided_slice %49 {offsets = [0, 16], sizes = [32, 8], strides = [1, 1]} : vector<32x32xbf16> to vector<32x8xbf16>
    %147 = arith.truncf %145 : vector<64x8xf32> to vector<64x8xbf16>
    %cst_47 = arith.constant dense<0.000000e+00> : vector<32x64xf32>
    %148 = tpu.matmul %146, %147, %cst_47 {dimension_numbers = #tpu.dot_dimension_numbers<[1], [1], [0], [0], [0, 0, 1, 0], [], []>} : vector<32x8xbf16>, vector<64x8xbf16>, vector<32x64xf32> -> vector<32x64xf32>
    %149 = arith.addf %116, %148 : vector<32x64xf32>
    %150 = vector.extract_strided_slice %33 {offsets = [0, 24], sizes = [64, 8], strides = [1, 1]} : vector<64x32xf32> to vector<64x8xf32>
    %151 = arith.truncf %150 : vector<64x8xf32> to vector<64x8xbf16>
    %152 = vector.extract_strided_slice %38 {offsets = [24, 0], sizes = [8, 16], strides = [1, 1]} : vector<32x16xf32> to vector<8x16xf32>
    %153 = arith.truncf %152 : vector<8x16xf32> to vector<8x16xbf16>
    %154 = vector.extract_strided_slice %43 {offsets = [24, 0], sizes = [8, 16], strides = [1, 1]} : vector<32x16xf32> to vector<8x16xf32>
    %155 = arith.truncf %154 : vector<8x16xf32> to vector<8x16xbf16>
    %cst_48 = arith.constant dense<0.000000e+00> : vector<64x16xf32>
    %156 = tpu.matmul %151, %153, %cst_48 {dimension_numbers = #tpu.dot_dimension_numbers<[1], [0], [0], [1], [0, 0, 1, 1], [], []>} : vector<64x8xbf16>, vector<8x16xbf16>, vector<64x16xf32> -> vector<64x16xf32>
    %157 = vector.extract_strided_slice %48 {offsets = [0, 3], sizes = [64, 1], strides = [1, 1]} : vector<64x4xf32> to vector<64x1xf32>
    %cst_49 = arith.constant dense<0xFF800000> : vector<64xf32>
    %158 = vector.multi_reduction <maximumf>, %156, %cst_49 [1] : vector<64x16xf32> to vector<64xf32>
    %159 = vector.shape_cast %158 : vector<64xf32> to vector<64x1xf32>
    %160 = arith.maximumf %159, %157 : vector<64x1xf32>
    %161 = vector.broadcast %160 : vector<64x1xf32> to vector<64x16xf32>
    %162 = arith.subf %156, %161 : vector<64x16xf32>
    %163 = math.exp %162 : vector<64x16xf32>
    %164 = arith.subf %157, %160 : vector<64x1xf32>
    %165 = math.exp %164 : vector<64x1xf32>
    %cst_50 = arith.constant dense<0.000000e+00> : vector<64xf32>
    %166 = vector.multi_reduction <add>, %163, %cst_50 [1] : vector<64x16xf32> to vector<64xf32>
    %167 = vector.shape_cast %166 : vector<64xf32> to vector<64x1xf32>
    %168 = arith.addf %167, %165 : vector<64x1xf32>
    %169 = tpu.reciprocal %168 {approx = true} : vector<64x1xf32> -> vector<64x1xf32>
    %170 = arith.truncf %163 : vector<64x16xf32> to vector<64x16xbf16>
    %cst_51 = arith.constant dense<0.000000e+00> : vector<64x8xf32>
    %171 = tpu.matmul %170, %155, %cst_51 {dimension_numbers = #tpu.dot_dimension_numbers<[1], [1], [0], [0], [0, 0, 1, 0], [], []>} : vector<64x16xbf16>, vector<8x16xbf16>, vector<64x8xf32> -> vector<64x8xf32>
    %172 = vector.extract_strided_slice %44 {offsets = [1, 24], sizes = [1, 8], strides = [1, 1]} : vector<2x32xf32> to vector<1x8xf32>
    %173 = vector.broadcast %165 : vector<64x1xf32> to vector<64x8xf32>
    %174 = vector.broadcast %172 : vector<1x8xf32> to vector<64x8xf32>
    %175 = arith.mulf %173, %174 : vector<64x8xf32>
    %176 = arith.addf %171, %175 : vector<64x8xf32>
    %177 = vector.broadcast %169 : vector<64x1xf32> to vector<64x8xf32>
    %178 = arith.mulf %176, %177 : vector<64x8xf32>
    %179 = vector.extract_strided_slice %49 {offsets = [0, 24], sizes = [32, 8], strides = [1, 1]} : vector<32x32xbf16> to vector<32x8xbf16>
    %180 = arith.truncf %178 : vector<64x8xf32> to vector<64x8xbf16>
    %cst_52 = arith.constant dense<0.000000e+00> : vector<32x64xf32>
    %181 = tpu.matmul %179, %180, %cst_52 {dimension_numbers = #tpu.dot_dimension_numbers<[1], [1], [0], [0], [0, 0, 1, 0], [], []>} : vector<32x8xbf16>, vector<64x8xbf16>, vector<32x64xf32> -> vector<32x64xf32>
    %182 = arith.addf %149, %181 : vector<32x64xf32>
    %c0_53 = arith.constant 0 : index
    %c0_54 = arith.constant 0 : index
    %183 = vector.load %arg12[%c0_53, %c0_54] : memref<32x1xf32, #tpu.memory_space<vmem>>, vector<32x1xf32>
    %184 = vector.broadcast %183 : vector<32x1xf32> to vector<32x64xf32>
    %185 = arith.addf %182, %184 : vector<32x64xf32>
    %c0_55 = arith.constant 0 : index
    %c0_56 = arith.constant 0 : index
    %c0_57 = arith.constant 0 : index
    %186 = vector.load %arg13[%c0_55, %c0_56, %c0_57] : memref<1x32x64xf32, #tpu.memory_space<vmem>>, vector<1x32x64xf32>
    %187 = vector.shape_cast %186 : vector<1x32x64xf32> to vector<32x64xf32>
    %188 = vector.shape_cast %185 : vector<32x64xf32> to vector<1x32x64xf32>
    tpu.vector_store %arg13[%c0_55, %c0_56, %c0_57], %188 {strides = array<i32>} : memref<1x32x64xf32, #tpu.memory_space<vmem>>, vector<1x32x64xf32>,
    return
  }
  func.func @transform_0(%arg0: i32, %arg1: i32) -> (i32, i32, i32) {
    %c0_i32 = arith.constant 0 : i32
    %c0_i32_0 = arith.constant 0 : i32
    return %arg0, %arg1, %c0_i32 : i32, i32, i32
  }
  func.func @transform_1(%arg0: i32, %arg1: i32) -> (i32, i32, i32) {
    %c0_i32 = arith.constant 0 : i32
    %c0_i32_0 = arith.constant 0 : i32
    %c0_i32_1 = arith.constant 0 : i32
    return %arg0, %c0_i32, %c0_i32_0 : i32, i32, i32
  }
  func.func @transform_2(%arg0: i32, %arg1: i32) -> (i32, i32, i32) {
    %c0_i32 = arith.constant 0 : i32
    %c0_i32_0 = arith.constant 0 : i32
    %c0_i32_1 = arith.constant 0 : i32
    return %arg0, %c0_i32, %c0_i32_0 : i32, i32, i32
  }
  func.func @transform_3(%arg0: i32, %arg1: i32) -> (i32, i32) {
    %c0_i32 = arith.constant 0 : i32
    %c0_i32_0 = arith.constant 0 : i32
    %c0_i32_1 = arith.constant 0 : i32
    return %c0_i32, %c0_i32_0 : i32, i32
  }
  func.func @transform_4(%arg0: i32, %arg1: i32) -> (i32, i32) {
    %c0_i32 = arith.constant 0 : i32
    %c0_i32_0 = arith.constant 0 : i32
    %c0_i32_1 = arith.constant 0 : i32
    return %c0_i32, %c0_i32_0 : i32, i32
  }
  func.func @transform_5(%arg0: i32, %arg1: i32) -> (i32, i32) {
    %c0_i32 = arith.constant 0 : i32
    %c0_i32_0 = arith.constant 0 : i32
    %c0_i32_1 = arith.constant 0 : i32
    return %c0_i32, %c0_i32_0 : i32, i32
  }
  func.func @transform_6(%arg0: i32, %arg1: i32) -> (i32, i32) {
    %c0_i32 = arith.constant 0 : i32
    %c0_i32_0 = arith.constant 0 : i32
    %c0_i32_1 = arith.constant 0 : i32
    return %c0_i32, %c0_i32_0 : i32, i32
  }
  func.func @transform_7(%arg0: i32, %arg1: i32) -> (i32, i32) {
    %c0_i32 = arith.constant 0 : i32
    %c0_i32_0 = arith.constant 0 : i32
    %c0_i32_1 = arith.constant 0 : i32
    return %c0_i32, %c0_i32_0 : i32, i32
  }
  func.func @transform_8(%arg0: i32, %arg1: i32) -> (i32, i32) {
    %c0_i32 = arith.constant 0 : i32
    %c0_i32_0 = arith.constant 0 : i32
    %c0_i32_1 = arith.constant 0 : i32
    return %c0_i32, %c0_i32_0 : i32, i32
  }
  func.func @transform_9(%arg0: i32, %arg1: i32) -> (i32, i32) {
    %c0_i32 = arith.constant 0 : i32
    %c0_i32_0 = arith.constant 0 : i32
    %c0_i32_1 = arith.constant 0 : i32
    return %c0_i32, %c0_i32_0 : i32, i32
  }
  func.func @transform_10(%arg0: i32, %arg1: i32) -> (i32, i32) {
    %c0_i32 = arith.constant 0 : i32
    %c0_i32_0 = arith.constant 0 : i32
    %c0_i32_1 = arith.constant 0 : i32
    return %c0_i32, %c0_i32_0 : i32, i32
  }
  func.func @transform_11(%arg0: i32, %arg1: i32) -> (i32, i32, i32) {
    %c0_i32 = arith.constant 0 : i32
    %c0_i32_0 = arith.constant 0 : i32
    return %arg0, %c0_i32, %arg1 : i32, i32, i32
  }
}

</mosaic_0001>

<bundles_post_ra>
// kernel: pruned_multihead_attention.2
= control target key start
LH: loop header
LB: loop body
LE: loop exit
PB: predicated region body
PF: predicated region fallthrough
CT: control target
= control target key end

     0   :  { %s1122_s9 = smov 0   ;;  %s1392_s0 = inlined_call_operand.vmem [shape: f32[2,64,32], index: 0, kind: input, shape index: {}]   ;;  %s1393_s1 = inlined_call_operand.vmem [shape: f32[2,32,64], index: 1, kind: input, shape index: {}]   ;;  %s1394_s2 = inlined_call_operand.vmem [shape: f32[2,4,64], index: 2, kind: output, shape index: {}]  }
   0x1 LB: > { %s963_s10 = sadd.s32 4294967295, %s1100_s9   ;;  %p967_p0 = scmp.ge.s32.totalorder %s1100_s9, 1  ;;  %s1100_s9 = sphi %s1122_s9, %s12_s9  }
   0x2   : > { %p122_p1 = scmp.lt.s32.totalorder %s1100_s9, 3 }
   0x4   : > { %p123_p2 = pnand %p967_p0, %p122_p1 }
   0x5   : > { %p148_p3 = scmp.lt.s32.totalorder (!%p123_p2), %s963_s10, 1  ;;  %s1102_s15 = smov (!%p123_p2), 120   ;;  %vm182_vm0 = vcmask (!%p123_p2), 64512   ;;  %vm1106_vm1 = vmmov (!%p123_p2), 0   ;;  %vm232_vm2 = vcmask (!%p123_p2), 523264   ;;  %vm431_vm3 = vcmask (!%p123_p2), 130112  }
   0x6   : > { %126 = sbr.rel (%p123_p2) target bundleno = 683 (0x2ab), region = 28  ;;  %s1103_s16 = smov (!%p123_p2), 112   ;;  %vm614_vm4 = vcmask (!%p123_p2), 195712   ;;  %vm797_vm5 = vcmask (!%p123_p2), 261312   ;;  %vm339_vm6 = vcmask (!%p123_p2), 516096  }
   0x7   : > { %s1104_s17 = smov (!%p123_p2), 104  }
   0xd   : > { %s1396_s10 = smov (!%p148_p3, %s963_s10), 1 }
   0xe   : > { %s979_s11 = sshll.u32 %s1396_s10, 6  ;;  %s980_s18 = sshll.u32 %s1396_s10, 5 }
   0xf   : > { %s1136_s14 = scalar_lea.vmem %s1392_s0, %s979_s11  ;;  %s1287_s21 = scalar_lea.vmem %s1393_s1, %s980_s18 }
  0x10   : > { %v1139_v0 = vld [vmem:[%s1136_s14] sm:$0xff]  ;;  %v1142_v1 = vld [vmem:[%s1136_s14 + $0x10] sm:$0xff]  ;;  %v1145_v2 = vld [vmem:[%s1136_s14 + $0x8] sm:$0xff]  ;;  %s972_s22 = sshll.u32 %s1396_s10, 2 }
  0x11   : > { %v1149_v3 = vmul.f32 %v1139_v0, %v1139_v0  ;;  %v1153_v4 = vmul.f32 %v1142_v1, %v1142_v1  ;;  %v1156_v5 = vld [vmem:[%s1136_s14 + $0x18] sm:$0xff]  ;;  %v1164_v6 = vmul.f32 %v1145_v2, %v1145_v2  ;;  %v1179_v8 = vld [vmem:[%s1136_s14 + $0x20] sm:$0xff]  ;;  %v1190_v10 = vld [vmem:[%s1136_s14 + $0x28] sm:$0xff]  ;;  %s161_s25 = scalar_lea.vmem %s1394_s2, %s972_s22 }
  0x12   : > { %v1168_v7 = vmul.f32 %v1156_v5, %v1156_v5  ;;  %v1187_v9 = vmul.f32 %v1179_v8, %v1179_v8  ;;  %v1198_v11 = vmul.f32 %v1190_v10, %v1190_v10  ;;  %v1205_v12 = vld [vmem:[%s1136_s14 + $0x30] sm:$0xff]  ;;  %v1216_v14 = vld [vmem:[%s1136_s14 + $0x38] sm:$0xff] }
  0x13   : > { %349 = vrot.lane.b32.xlu0 %v1149_v3, %s1102_s15  ;;  %353 = vrot.lane.b32.xlu1 %v1153_v4, %s1102_s15  ;;  %v1213_v13 = vmul.f32 %v1205_v12, %v1205_v12  ;;  %v1224_v15 = vmul.f32 %v1216_v14, %v1216_v14 }
  0x17   : > { %351 = vrot.lane.b32.xlu0 %v1164_v6, %s1102_s15  ;;  %355 = vrot.lane.b32.xlu1 %v1168_v7, %s1102_s15 }
  0x1b   : > { %532 = vrot.lane.b32.xlu0 %v1149_v3, %s1103_s16  ;;  %534 = vrot.lane.b32.xlu1 %v1164_v6, %s1103_s16 }
  0x1f   : > { %715 = vrot.lane.b32.xlu0 %v1149_v3, %s1104_s17  ;;  %717 = vrot.lane.b32.xlu1 %v1164_v6, %s1104_s17 }
  0x23   : > { %357 = vrot.lane.b32.xlu0 %v1187_v9, %s1102_s15  ;;  %536 = vrot.lane.b32.xlu1 %v1153_v4, %s1103_s16 }
  0x27   : > { %719 = vrot.lane.b32.xlu0 %v1153_v4, %s1104_s17  ;;  %359 = vrot.lane.b32.xlu1 %v1198_v11, %s1102_s15 }
  0x2b   : > { %538 = vrot.lane.b32.xlu0 %v1168_v7, %s1103_s16  ;;  %721 = vrot.lane.b32.xlu1 %v1168_v7, %s1104_s17 }
  0x2f   : > { %361 = vrot.lane.b32.xlu0 %v1213_v13, %s1102_s15  ;;  %540 = vrot.lane.b32.xlu1 %v1187_v9, %s1103_s16 }
  0x33   : > { %723 = vrot.lane.b32.xlu0 %v1187_v9, %s1104_s17  ;;  %363 = vrot.lane.b32.xlu1 %v1224_v15, %s1102_s15 }
  0x37   : > { %542 = vrot.lane.b32.xlu0 %v1198_v11, %s1103_s16  ;;  %725 = vrot.lane.b32.xlu1 %v1198_v11, %s1104_s17 }
  0x3b   : > { %544 = vrot.lane.b32.xlu0 %v1213_v13, %s1103_s16  ;;  %727 = vrot.lane.b32.xlu1 %v1213_v13, %s1104_s17 }
  0x3f   : > { %546 = vrot.lane.b32.xlu0 %v1224_v15, %s1103_s16  ;;  %729 = vrot.lane.b32.xlu1 %v1224_v15, %s1104_s17 }
  0x85   : > { %v350_v16 = vpop.permute.xlu0 %349  ;;  %v354_v17 = vpop.permute.xlu1 %353 }
  0x86   : > { %v373_v18 = vsel %vm182_vm0, %v350_v16, 0.0  ;;  %v379_v19 = vsel %vm182_vm0, %v354_v17, 0.0  ;;  %v183_v16 = vsel %vm182_vm0, %v1149_v3, 0.0  ;;  %v186_v17 = vsel %vm182_vm0, %v1164_v6, 0.0 }
  0x87   : > { %374 = vadd.xlane.f32.xlu0 %v373_v18  ;;  %v189_v18 = vsel %vm182_vm0, %v1153_v4, 0.0  ;;  %v198_v3 = vsel %vm182_vm0, %v1198_v11, 0.0  ;;  %v204_v4 = vsel %vm182_vm0, %v1224_v15, 0.0  ;;  %v1105_v6 = vmov 0.0  }
  0x88   : > { %989 = vmatprep.subr.mxu0 %v1105_v6  ;;  %991 = vmatprep.mubr.msk.f32.mxu0 %vm1106_vm1, %v1105_v6 }
  0x89   : > { %v352_v20 = vpop.permute.xlu0 %351  ;;  %v356_v21 = vpop.permute.xlu1 %355  ;;  %994 = vmatprep.subr.mxu1 %v1105_v6  ;;  %996 = vmatprep.mubr.msk.f32.mxu1 %vm1106_vm1, %v1105_v6 }
  0x8a   : > { %v376_v22 = vsel %vm182_vm0, %v352_v20, 0.0  ;;  %v382_v23 = vsel %vm182_vm0, %v356_v21, 0.0  ;;  %v195_v20 = vsel %vm182_vm0, %v1187_v9, 0.0  ;;  %v201_v21 = vsel %vm182_vm0, %v1213_v13, 0.0 }
  0x8b   : > { %380 = vadd.xlane.f32.xlu0 %v379_v19  ;;  %377 = vadd.xlane.f32.xlu1 %v376_v22  ;;  %v192_v19 = vsel %vm182_vm0, %v1168_v7, 0.0  ;;  %v170_v7 = vld [vmem:[%s1287_s21] sm:$0xff] }
  0x8c   : > { %v231_v9 = vmul.f32 %v170_v7, %v170_v7 }
  0x8d   : > { %v533_v24 = vpop.permute.xlu0 %532  ;;  %v535_v25 = vpop.permute.xlu1 %534 }
  0x8e   : > { %v556_v26 = vsel %vm182_vm0, %v533_v24, 0.0  ;;  %v559_v27 = vsel %vm182_vm0, %v535_v25, 0.0  ;;  %v233_v11 = vsel %vm232_vm2, %v231_v9, 0.0  ;;  %v171_v25 = vld [vmem:[%s1287_s21 + $0x8] sm:$0xff] }
  0x8f   : > { %383 = vadd.xlane.f32.xlu0 %v382_v23  ;;  %557 = vadd.xlane.f32.xlu1 %v556_v26  ;;  %v234_v13 = vrot.slane %v233_v11, 4 }
  0x91   : > { %v716_v28 = vpop.permute.xlu0 %715  ;;  %v718_v29 = vpop.permute.xlu1 %717  ;;  %v235_v15 = vadd.f32 %v234_v13, %v233_v11 }
  0x92   : > { %v739_v30 = vsel %vm182_vm0, %v716_v28, 0.0  ;;  %v742_v31 = vsel %vm182_vm0, %v718_v29, 0.0 }
  0x93   : > { %560 = vadd.xlane.f32.xlu0 %v559_v27  ;;  %740 = vadd.xlane.f32.xlu1 %v739_v30  ;;  %v236_v22 = vrot.slane %v235_v15, 2  ;;  %v421_v27 = vmul.f32 %v171_v25, %v171_v25 }
  0x95   : > { %v358_v32 = vpop.permute.xlu0 %357  ;;  %v537_v33 = vpop.permute.xlu1 %536  ;;  %v237_v23 = vadd.f32 %v236_v22, %v235_v15  ;;  %v422_v29 = vsel %vm232_vm2, %v421_v27, 0.0 }
  0x96   : > { %v385_v34 = vsel %vm182_vm0, %v358_v32, 0.0  ;;  %v562_v35 = vsel %vm182_vm0, %v537_v33, 0.0  ;;  %v423_v30 = vrot.slane %v422_v29, 4  ;;  %v263_v32 = vand.u32 2147483647, %v170_v7 }
  0x97   : > { %743 = vadd.xlane.f32.xlu0 %v742_v31  ;;  %386 = vadd.xlane.f32.xlu1 %v385_v34  ;;  %v238_v24 = vrot.slane %v237_v23, 1 }
  0x98   : > { %v424_v31 = vadd.f32 %v423_v30, %v422_v29 }
  0x99   : > { %v720_v36 = vpop.permute.xlu0 %719  ;;  %v360_v37 = vpop.permute.xlu1 %359  ;;  %v239_v26 = vadd.f32 %v238_v24, %v237_v23 }
  0x9a   : > { %v745_v38 = vsel %vm182_vm0, %v720_v36, 0.0  ;;  %v388_v39 = vsel %vm182_vm0, %v360_v37, 0.0  ;;  %v425_v33 = vrot.slane %v424_v31, 2 }
  0x9b   : > { %563 = vadd.xlane.f32.xlu0 %v562_v35  ;;  %746 = vadd.xlane.f32.xlu1 %v745_v38  ;;  %v240_v28 = vmax.f32 %v239_v26, 1e-24  ;;  %v264_v35 = vadd.f32 %v263_v32, %v170_v7 }
  0x9c   : > { %v426_v34 = vadd.f32 %v425_v33, %v424_v31 }
  0x9d   : > { %v539_v40 = vpop.permute.xlu0 %538  ;;  %v722_v41 = vpop.permute.xlu1 %721  ;;  %1022 = vrsqrt.f32 %v240_v28 }
  0x9e   : > { %v565_v42 = vsel %vm182_vm0, %v539_v40, 0.0  ;;  %v748_v43 = vsel %vm182_vm0, %v722_v41, 0.0  ;;  %v427_v36 = vrot.slane %v426_v34, 1  ;;  %v453_v41 = vand.u32 2147483647, %v171_v25 }
  0x9f   : > { %389 = vadd.xlane.f32.xlu0 %v388_v39  ;;  %566 = vadd.xlane.f32.xlu1 %v565_v42 }
  0xa0   : > { %v428_v37 = vadd.f32 %v427_v36, %v426_v34  ;;  %v454_v42 = vadd.f32 %v453_v41, %v171_v25 }
  0xa1   : > { %v362_v44 = vpop.permute.xlu0 %361  ;;  %v541_v45 = vpop.permute.xlu1 %540 }
  0xa2   : > { %v391_v46 = vsel %vm182_vm0, %v362_v44, 0.0  ;;  %v568_v47 = vsel %vm182_vm0, %v541_v45, 0.0  ;;  %v429_v40 = vmax.f32 %v428_v37, 1e-24 }
  0xa3   : > { %749 = vadd.xlane.f32.xlu0 %v748_v43  ;;  %392 = vadd.xlane.f32.xlu1 %v391_v46 }
  0xa4   : > { %1024 = vrsqrt.f32 %v429_v40 }
  0xa5   : > { %v724_v48 = vpop.permute.xlu0 %723  ;;  %v364_v49 = vpop.permute.xlu1 %363 }
  0xa6   : > { %v751_v50 = vsel %vm182_vm0, %v724_v48, 0.0  ;;  %v394_v51 = vsel %vm182_vm0, %v364_v49, 0.0 }
  0xa7   : > { %569 = vadd.xlane.f32.xlu0 %v568_v47  ;;  %752 = vadd.xlane.f32.xlu1 %v751_v50  ;;  %v1023_v38 = vpop.eup %1022 }
  0xa8   : > { %v265_v39 = vmul.f32 %v1023_v38, %v264_v35 }
  0xa9   : > { %v543_v52 = vpop.permute.xlu0 %542  ;;  %v726_v53 = vpop.permute.xlu1 %725 }
  0xaa   : > { %v571_v54 = vsel %vm182_vm0, %v543_v52, 0.0  ;;  %v754_v55 = vsel %vm182_vm0, %v726_v53, 0.0  ;;  %990 = vmatpush3.msra.mxu0 %v265_v39 }
  0xab   : > { %395 = vadd.xlane.f32.xlu0 %v394_v51  ;;  %572 = vadd.xlane.f32.xlu1 %v571_v54 }
  0xac   : > { %999 = vmatprep.subr.mxu0 %v1105_v6 }
  0xad   : > { %v545_v56 = vpop.permute.xlu0 %544  ;;  %v728_v57 = vpop.permute.xlu1 %727 }
  0xae   : > { %v574_v58 = vsel %vm182_vm0, %v545_v56, 0.0  ;;  %v757_v59 = vsel %vm182_vm0, %v728_v57, 0.0  ;;  %v1025_v43 = vpop.eup %1024 }
  0xaf   : > { %755 = vadd.xlane.f32.xlu0 %v754_v55  ;;  %575 = vadd.xlane.f32.xlu1 %v574_v58  ;;  %v455_v44 = vmul.f32 %v1025_v43, %v454_v42 }
  0xb1   : > { %v547_v60 = vpop.permute.xlu0 %546  ;;  %v730_v61 = vpop.permute.xlu1 %729  ;;  %995 = vmatpush3.msra.mxu1 %v455_v44 }
  0xb2   : > { %v577_v62 = vsel %vm182_vm0, %v547_v60, 0.0  ;;  %v760_v63 = vsel %vm182_vm0, %v730_v61, 0.0  ;;  %1004 = vmatprep.subr.mxu1 %v1105_v6 }
  0xb3   : > { %758 = vadd.xlane.f32.xlu0 %v757_v59  ;;  %578 = vadd.xlane.f32.xlu1 %v577_v62 }
  0xb7   : > { %761 = vadd.xlane.f32.xlu0 %v760_v63  ;;  %184 = vadd.xlane.f32.xlu1 %v183_v16 }
  0xbb   : > { %187 = vadd.xlane.f32.xlu0 %v186_v17  ;;  %190 = vadd.xlane.f32.xlu1 %v189_v18 }
  0xbf   : > { %193 = vadd.xlane.f32.xlu0 %v192_v19  ;;  %196 = vadd.xlane.f32.xlu1 %v195_v20 }
  0xc3   : > { %199 = vadd.xlane.f32.xlu0 %v198_v3  ;;  %202 = vadd.xlane.f32.xlu1 %v201_v21 }
  0xc7   : > { %205 = vadd.xlane.f32.xlu0 %v204_v4 }
 0x114   : > { %v375_v45 = vpop.xlane.xlu0 %374 }
 0x115   : > { %v397_v53 = vmax.f32 %v375_v45, 1e-24 }
 0x118   : > { %v378_v46 = vpop.xlane.xlu1 %377  ;;  %v381_v47 = vpop.xlane.xlu0 %380 }
 0x119   : > { %v398_v50 = vmax.f32 %v378_v46, 1e-24  ;;  %v399_v54 = vmax.f32 %v381_v47, 1e-24 }
 0x11b   : > { %1026 = vrsqrt.f32 %v398_v50 }
 0x11c   : > { %v558_v48 = vpop.xlane.xlu1 %557  ;;  %v384_v49 = vpop.xlane.xlu0 %383  ;;  %1028 = vrsqrt.f32 %v397_v53 }
 0x11d   : > { %v580_v57 = vmax.f32 %v558_v48, 1e-24  ;;  %v400_v58 = vmax.f32 %v384_v49, 1e-24  ;;  %1030 = vrsqrt.f32 %v399_v54 }
 0x11f   : > { %1032 = vrsqrt.f32 %v580_v57 }
 0x120   : > { %v741_v51 = vpop.xlane.xlu1 %740  ;;  %v561_v52 = vpop.xlane.xlu0 %560  ;;  %1034 = vrsqrt.f32 %v400_v58 }
 0x121   : > { %v763_v59 = vmax.f32 %v741_v51, 1e-24  ;;  %v581_v60 = vmax.f32 %v561_v52, 1e-24  ;;  %v1313_v52 = vld [vmem:[%s1287_s21 + $0x10] sm:$0xff] }
 0x123   : > { %1036 = vrsqrt.f32 %v763_v59 }
 0x124   : > { %v387_v55 = vpop.xlane.xlu1 %386  ;;  %v744_v56 = vpop.xlane.xlu0 %743  ;;  %1038 = vrsqrt.f32 %v581_v60 }
 0x125   : > { %v401_v63 = vmax.f32 %v387_v55, 1e-24  ;;  %v764_v16 = vmax.f32 %v744_v56, 1e-24  ;;  %v1027_v3 = vpop.eup %1026 }
 0x126   : > { %v1029_v7 = vpop.eup %1028  ;;  %v414_v13 = vmul.f32 %v1027_v3, %v1145_v2 }
 0x127   : > { %1040 = vrsqrt.f32 %v401_v63  ;;  %v1031_v22 = vpop.eup %1030  ;;  %v413_v24 = vmul.f32 %v1029_v7, %v1139_v0 }
 0x128   : > { %v747_v61 = vpop.xlane.xlu1 %746  ;;  %v564_v62 = vpop.xlane.xlu0 %563  ;;  %1042 = vrsqrt.f32 %v764_v16  ;;  %v433_v30 = vsel %vm431_vm3, %v414_v13, 0.0  ;;  %v415_v36 = vmul.f32 %v1031_v22, %v1142_v1 }
 0x129   : > { %v765_v17 = vmax.f32 %v747_v61, 1e-24  ;;  %v582_v20 = vmax.f32 %v564_v62, 1e-24  ;;  %v1033_v23 = vpop.eup %1032  ;;  %v432_v35 = vsel %vm431_vm3, %v413_v24, 0.0 }
 0x12a   : > { %v1035_v26 = vpop.eup %1034  ;;  %v434_v38 = vadd.f32 %v433_v30, %v432_v35  ;;  %v596_v41 = vmul.f32 %v1033_v23, %v1139_v0  ;;  %v435_v50 = vsel %vm431_vm3, %v415_v36, 0.0 }
 0x12b   : > { %1044 = vrsqrt.f32 %v765_v17  ;;  %v416_v42 = vmul.f32 %v1035_v26, %v1156_v5 }
 0x12c   : > { %v567_v18 = vpop.xlane.xlu1 %566  ;;  %v390_v19 = vpop.xlane.xlu0 %389  ;;  %1046 = vrsqrt.f32 %v582_v20  ;;  %v436_v54 = vadd.f32 %v435_v50, %v434_v38  ;;  %v615_v58 = vsel %vm614_vm4, %v596_v41, 0.0 }
 0x12d   : > { %v402_v21 = vmax.f32 %v390_v19, 1e-24  ;;  %v583_v4 = vmax.f32 %v567_v18, 1e-24  ;;  %v1037_v29 = vpop.eup %1036  ;;  %v437_v59 = vsel %vm431_vm3, %v416_v42, 0.0  ;;  %v604_v18 = vmul.f32 %v1313_v52, %v1313_v52 }
 0x12e   : > { %v1039_v32 = vpop.eup %1038  ;;  %v779_v46 = vmul.f32 %v1037_v29, %v1139_v0 }
 0x12f   : > { %1048 = vrsqrt.f32 %v402_v21  ;;  %v597_v47 = vmul.f32 %v1039_v32, %v1145_v2  ;;  %v438_v21 = vadd.f32 %v437_v59, %v436_v54  ;;  %v605_v30 = vsel %vm232_vm2, %v604_v18, 0.0 }
 0x130   : > { %v393_v9 = vpop.xlane.xlu1 %392  ;;  %v750_v11 = vpop.xlane.xlu0 %749  ;;  %1050 = vrsqrt.f32 %v583_v4  ;;  %v798_v63 = vsel %vm797_vm5, %v779_v46, 0.0  ;;  %v606_v46 = vrot.slane %v605_v30, 4 }
 0x131   : > { %v403_v15 = vmax.f32 %v393_v9, 1e-24  ;;  %v766_v25 = vmax.f32 %v750_v11, 1e-24  ;;  %v1041_v34 = vpop.eup %1040  ;;  %v616_v16 = vsel %vm614_vm4, %v597_v47, 0.0 }
 0x132   : > { %v1043_v37 = vpop.eup %1042  ;;  %v417_v48 = vmul.f32 %v1041_v34, %v1179_v8 }
 0x133   : > { %1052 = vrsqrt.f32 %v403_v15  ;;  %v780_v51 = vmul.f32 %v1043_v37, %v1145_v2 }
 0x134   : > { %v753_v27 = vpop.xlane.xlu1 %752  ;;  %v570_v28 = vpop.xlane.xlu0 %569  ;;  %1054 = vrsqrt.f32 %v766_v25  ;;  %v439_v17 = vsel %vm431_vm3, %v417_v48, 0.0  ;;  %v617_v25 = vadd.f32 %v616_v16, %v615_v58 }
 0x135   : > { %v584_v31 = vmax.f32 %v570_v28, 1e-24  ;;  %v767_v33 = vmax.f32 %v753_v27, 1e-24  ;;  %v1045_v45 = vpop.eup %1044  ;;  %v799_v19 = vsel %vm797_vm5, %v780_v51, 0.0  ;;  %v440_v26 = vadd.f32 %v439_v17, %v438_v21 }
 0x136   : > { %v1047_v49 = vpop.eup %1046  ;;  %v781_v4 = vmul.f32 %v1045_v45, %v1142_v1  ;;  %v800_v27 = vadd.f32 %v799_v19, %v798_v63  ;;  %v607_v17 = vadd.f32 %v606_v46, %v605_v30 }
 0x137   : > { %1056 = vrsqrt.f32 %v584_v31  ;;  %v598_v20 = vmul.f32 %v1047_v49, %v1142_v1 }
 0x138   : > { %v573_v39 = vpop.xlane.xlu1 %572  ;;  %v396_v40 = vpop.xlane.xlu0 %395  ;;  %1058 = vrsqrt.f32 %v767_v33  ;;  %v801_v32 = vsel %vm797_vm5, %v781_v4, 0.0 }
 0x139   : > { %v585_v43 = vmax.f32 %v573_v39, 1e-24  ;;  %v404_v44 = vmax.f32 %v396_v40, 1e-24  ;;  %v1049_v53 = vpop.eup %1048  ;;  %v618_v28 = vsel %vm614_vm4, %v598_v20, 0.0  ;;  %v802_v47 = vadd.f32 %v801_v32, %v800_v27 }
 0x13a   : > { %v1051_v57 = vpop.eup %1050  ;;  %v418_v3 = vmul.f32 %v1049_v53, %v1190_v10 }
 0x13b   : > { %1060 = vrsqrt.f32 %v585_v43  ;;  %v599_v7 = vmul.f32 %v1051_v57, %v1156_v5  ;;  %v619_v43 = vadd.f32 %v618_v28, %v617_v25  ;;  %v608_v28 = vrot.slane %v607_v17, 2 }
 0x13c   : > { %1062 = vrsqrt.f32 %v404_v44  ;;  %v576_v55 = vpop.xlane.xlu1 %575  ;;  %v756_v56 = vpop.xlane.xlu0 %755  ;;  %v441_v29 = vsel %vm431_vm3, %v418_v3, 0.0 }
 0x13d   : > { %v586_v60 = vmax.f32 %v576_v55, 1e-24  ;;  %v768_v61 = vmax.f32 %v756_v56, 1e-24  ;;  %v1053_v62 = vpop.eup %1052  ;;  %v620_v33 = vsel %vm614_vm4, %v599_v7, 0.0  ;;  %v442_v45 = vadd.f32 %v441_v29, %v440_v26 }
 0x13e   : > { %v1055_v13 = vpop.eup %1054  ;;  %v419_v15 = vmul.f32 %v1053_v62, %v1205_v12  ;;  %v621_v50 = vadd.f32 %v620_v33, %v619_v43 }
 0x13f   : > { %1064 = vrsqrt.f32 %v586_v60  ;;  %v782_v38 = vmul.f32 %v1055_v13, %v1156_v5 }
 0x140   : > { %1066 = vrsqrt.f32 %v768_v61  ;;  %v579_v9 = vpop.xlane.xlu1 %578  ;;  %v759_v11 = vpop.xlane.xlu0 %758  ;;  %v443_v40 = vsel %vm431_vm3, %v419_v15, 0.0 }
 0x141   : > { %v587_v22 = vmax.f32 %v579_v9, 1e-24  ;;  %v769_v23 = vmax.f32 %v759_v11, 1e-24  ;;  %v1057_v24 = vpop.eup %1056  ;;  %v444_v53 = vadd.f32 %v443_v40, %v442_v45  ;;  %v803_v57 = vsel %vm797_vm5, %v782_v38, 0.0 }
 0x142   : > { %v1059_v31 = vpop.eup %1058  ;;  %v600_v34 = vmul.f32 %v1057_v24, %v1179_v8  ;;  %v804_v3 = vadd.f32 %v803_v57, %v802_v47 }
 0x143   : > { %1068 = vrsqrt.f32 %v587_v22  ;;  %v783_v48 = vmul.f32 %v1059_v31, %v1179_v8 }
 0x144   : > { %1070 = vrsqrt.f32 %v769_v23  ;;  %v762_v35 = vpop.xlane.xlu0 %761  ;;  %v185_v36 = vpop.xlane.xlu1 %184  ;;  %v622_v51 = vsel %vm614_vm4, %v600_v34, 0.0 }
 0x145   : > { %v1061_v37 = vpop.eup %1060  ;;  %v770_v39 = vmax.f32 %v762_v35, 1e-24  ;;  %v207_v41 = vmax.f32 %v185_v36, 1e-24  ;;  %v805_v18 = vsel %vm797_vm5, %v783_v48, 0.0  ;;  %v623_v19 = vadd.f32 %v622_v51, %v621_v50 }
 0x146   : > { %v1063_v42 = vpop.eup %1062  ;;  %v601_v44 = vmul.f32 %v1061_v37, %v1190_v10  ;;  %v806_v25 = vadd.f32 %v805_v18, %v804_v3 }
 0x147   : > { %v420_v49 = vmul.f32 %v1063_v42, %v1216_v14  ;;  %1072 = vrsqrt.f32 %v770_v39 }
 0x148   : > { %1074 = vrsqrt.f32 %v207_v41  ;;  %v188_v54 = vpop.xlane.xlu0 %187  ;;  %v191_v55 = vpop.xlane.xlu1 %190  ;;  %v624_v62 = vsel %vm614_vm4, %v601_v44, 0.0  ;;  %v609_v44 = vadd.f32 %v608_v28, %v607_v17 }
 0x149   : > { %v1065_v56 = vpop.eup %1064  ;;  %v445_v58 = vsel %vm431_vm3, %v420_v49, 0.0  ;;  %v208_v59 = vmax.f32 %v188_v54, 1e-24  ;;  %v209_v60 = vmax.f32 %v191_v55, 1e-24  ;;  %v625_v15 = vadd.f32 %v624_v62, %v623_v19 }
 0x14a   : > { %v1067_v61 = vpop.eup %1066  ;;  %v602_v63 = vmul.f32 %v1065_v56, %v1205_v12  ;;  %v446_v16 = vadd.f32 %v445_v58, %v444_v53 }
 0x14b   : > { %v784_v20 = vmul.f32 %v1067_v61, %v1190_v10  ;;  %1076 = vrsqrt.f32 %v208_v59 }
 0x14c   : > { %v447_v21 = vrot.slane %v446_v16, 4  ;;  %v626_v4 = vsel %vm614_vm4, %v602_v63, 0.0  ;;  %1078 = vrsqrt.f32 %v209_v60  ;;  %v194_v7 = vpop.xlane.xlu0 %193  ;;  %v197_v9 = vpop.xlane.xlu1 %196  ;;  %v610_v60 = vrot.slane %v609_v44, 1 }
 0x14d   : > { %v1069_v11 = vpop.eup %1068  ;;  %v807_v13 = vsel %vm797_vm5, %v784_v20, 0.0  ;;  %v210_v22 = vmax.f32 %v194_v7, 1e-24  ;;  %v211_v23 = vmax.f32 %v197_v9, 1e-24  ;;  %v627_v30 = vadd.f32 %v626_v4, %v625_v15 }
 0x14e   : > { %v1071_v24 = vpop.eup %1070  ;;  %v603_v26 = vmul.f32 %v1069_v11, %v1216_v14  ;;  %v448_v27 = vadd.f32 %v447_v21, %v446_v16  ;;  %v808_v33 = vadd.f32 %v807_v13, %v806_v25 }
 0x14f   : > { %v785_v29 = vmul.f32 %v1071_v24, %v1205_v12  ;;  %1080 = vrsqrt.f32 %v210_v22 }
 0x150   : > { %v449_v31 = vrot.slane %v448_v27, 2  ;;  %v628_v32 = vsel %vm614_vm4, %v603_v26, 0.0  ;;  %1082 = vrsqrt.f32 %v211_v23  ;;  %v200_v34 = vpop.xlane.xlu0 %199  ;;  %v203_v35 = vpop.xlane.xlu1 %202 }
 0x151   : > { %v1073_v36 = vpop.eup %1072  ;;  %v629_v37 = vadd.f32 %v628_v32, %v627_v30  ;;  %v809_v38 = vsel %vm797_vm5, %v785_v29, 0.0  ;;  %v212_v39 = vmax.f32 %v200_v34, 1e-24  ;;  %v213_v40 = vmax.f32 %v203_v35, 1e-24 }
 0x152   : > { %v1075_v41 = vpop.eup %1074  ;;  %v786_v42 = vmul.f32 %v1073_v36, %v1216_v14  ;;  %v450_v43 = vadd.f32 %v449_v31, %v448_v27  ;;  %v810_v46 = vadd.f32 %v809_v38, %v808_v33 }
 0x153   : > { %v630_v45 = vrot.slane %v629_v37, 4  ;;  %v223_v47 = vmul.f32 %v1075_v41, %v1139_v0  ;;  %1084 = vrsqrt.f32 %v212_v39 }
 0x154   : > { %v451_v48 = vrot.slane %v450_v43, 1  ;;  %v811_v49 = vsel %vm797_vm5, %v786_v42, 0.0  ;;  %1086 = vrsqrt.f32 %v213_v40  ;;  %v206_v50 = vpop.xlane.xlu0 %205 }
 0x155   : > { %v1077_v51 = vpop.eup %1076  ;;  %v631_v53 = vadd.f32 %v630_v45, %v629_v37  ;;  %v812_v54 = vadd.f32 %v811_v49, %v810_v46  ;;  %v214_v55 = vmax.f32 %v206_v50, 1e-24  ;;  %v242_v58 = vsel %vm182_vm0, %v223_v47, 0.0  ;;  %v173_v45 = vld [vmem:[%s1287_s21 + $0x18] sm:$0xff] }
 0x156   : > { %v1079_v56 = vpop.eup %1078  ;;  %v452_v57 = vadd.f32 %v451_v48, %v450_v43  ;;  %v224_v59 = vmul.f32 %v1077_v51, %v1145_v2  ;;  %v611_v2 = vadd.f32 %v610_v60, %v609_v44  ;;  %v787_v46 = vmul.f32 %v173_v45, %v173_v45 }
 0x157   : > { %v632_v61 = vrot.slane %v631_v53, 2  ;;  %v813_v62 = vrot.slane %v812_v54, 4  ;;  %v225_v0 = vmul.f32 %v1079_v56, %v1142_v1  ;;  %1088 = vrsqrt.f32 %v214_v55 }
 0x158   : > { %457 = vrot.lane.b32.xlu1 %v452_v57, %s1102_s15  ;;  %v243_v63 = vsel %vm182_vm0, %v224_v59, 0.0  ;;  %v612_v29 = vmax.f32 %v611_v2, 1e-24  ;;  %v788_v47 = vsel %vm232_vm2, %v787_v46, 0.0  ;;  %v819_v55 = vand.u32 2147483647, %v173_v45 }
 0x159   : > { %v1081_v16 = vpop.eup %1080  ;;  %v633_v17 = vadd.f32 %v632_v61, %v631_v53  ;;  %v814_v18 = vadd.f32 %v813_v62, %v812_v54  ;;  %v244_v19 = vadd.f32 %v243_v63, %v242_v58  ;;  %v245_v20 = vsel %vm182_vm0, %v225_v0, 0.0 }
 0x15a   : > { %v1083_v3 = vpop.eup %1082  ;;  %v226_v21 = vmul.f32 %v1081_v16, %v1156_v5  ;;  %1090 = vrsqrt.f32 %v612_v29  ;;  %v789_v48 = vrot.slane %v788_v47, 4  ;;  %v820_v56 = vadd.f32 %v819_v55, %v173_v45 }
 0x15b   : > { %v634_v4 = vrot.slane %v633_v17, 1  ;;  %v815_v7 = vrot.slane %v814_v18, 2  ;;  %v246_v9 = vadd.f32 %v245_v20, %v244_v19  ;;  %v227_v1 = vmul.f32 %v1083_v3, %v1179_v8 }
 0x15c   : > { %v247_v11 = vsel %vm182_vm0, %v226_v21, 0.0  ;;  %v790_v49 = vadd.f32 %v789_v48, %v788_v47 }
 0x15d   : > { %v1085_v13 = vpop.eup %1084  ;;  %v635_v15 = vadd.f32 %v634_v4, %v633_v17  ;;  %v816_v22 = vadd.f32 %v815_v7, %v814_v18  ;;  %v248_v23 = vadd.f32 %v247_v11, %v246_v9  ;;  %v249_v24 = vsel %vm182_vm0, %v227_v1, 0.0 }
 0x15e   : > { %v1087_v25 = vpop.eup %1086  ;;  %v228_v26 = vmul.f32 %v1085_v13, %v1190_v10  ;;  %v791_v50 = vrot.slane %v790_v49, 2 }
 0x15f   : > { %640 = vrot.lane.b32.xlu0 %v635_v15, %s1103_s16  ;;  %v817_v5 = vrot.slane %v816_v22, 1  ;;  %v250_v27 = vadd.f32 %v249_v24, %v248_v23  ;;  %v229_v28 = vmul.f32 %v1087_v25, %v1205_v12  ;;  %v636_v12 = vand.u32 2147483647, %v1313_v52 }
 0x160   : > { %v251_v8 = vsel %vm182_vm0, %v228_v26, 0.0  ;;  %v792_v51 = vadd.f32 %v791_v50, %v790_v49 }
 0x161   : > { %v1089_v30 = vpop.eup %1088  ;;  %v818_v31 = vadd.f32 %v817_v5, %v816_v22  ;;  %v252_v32 = vadd.f32 %v251_v8, %v250_v27  ;;  %v253_v33 = vsel %vm182_vm0, %v229_v28, 0.0  ;;  %v637_v40 = vadd.f32 %v636_v12, %v1313_v52 }
 0x162   : > { %v230_v34 = vmul.f32 %v1089_v30, %v1216_v14  ;;  %v793_v52 = vrot.slane %v792_v51, 1 }
 0x163   : > { %823 = vrot.lane.b32.xlu1 %v818_v31, %s1104_s17  ;;  %v254_v35 = vadd.f32 %v253_v33, %v252_v32 }
 0x164   : > { %v255_v10 = vsel %vm182_vm0, %v230_v34, 0.0  ;;  %v1091_v41 = vpop.eup %1090  ;;  %v794_v53 = vadd.f32 %v793_v52, %v792_v51 }
 0x165   : > { %v256_v36 = vadd.f32 %v255_v10, %v254_v35  ;;  %v638_v44 = vmul.f32 %v1091_v41, %v637_v40 }
 0x166   : > { %v795_v54 = vmax.f32 %v794_v53, 1e-24 }
 0x167   : > { %v257_v37 = vrot.slane %v256_v36, 4 }
 0x168   : > { %1092 = vrsqrt.f32 %v795_v54 }
 0x169   : > { %v258_v38 = vadd.f32 %v257_v37, %v256_v36 }
 0x16b   : > { %v259_v39 = vrot.slane %v258_v38, 2 }
 0x16d   : > { %v260_v42 = vadd.f32 %v259_v39, %v258_v38 }
 0x16f   : > { %v261_v43 = vrot.slane %v260_v42, 1 }
 0x171   : > { %v262_v14 = vadd.f32 %v261_v43, %v260_v42 }
 0x172   : > { %v1093_v57 = vpop.eup %1092 }
 0x173   : > { %992 = vmatmul.mubr.msk.f32.vlgmr.msra.gmra.mrb[0].mxu0 %vm182_vm0, %v262_v14  ;;  %v821_v58 = vmul.f32 %v1093_v57, %v820_v56 }
 0x174   : > { %1000 = vmatpush3.msra.mxu0 %v638_v44  ;;  %1001 = vmatprep.mubr.msk.f32.mxu0 %vm1106_vm1, %v1105_v6 }
 0x1ca   : > { %v458_v59 = vpop.permute.xlu1 %457 }
 0x1cb   : > { %997 = vmatmul.mubr.msk.f32.vlgmr.msra.gmra.mrb[0].mxu1 %vm182_vm0, %v458_v59 }
 0x1cc   : > { %1005 = vmatpush3.msra.mxu1 %v821_v58  ;;  %1006 = vmatprep.mubr.msk.f32.mxu1 %vm1106_vm1, %v1105_v6 }
 0x1d1   : > { %v641_v60 = vpop.permute.xlu0 %640 }
 0x1d2   : > { %1002 = vmatmul.mubr.msk.f32.vlgmr.msra.gmra.mrb[2].mxu0 %vm182_vm0, %v641_v60 }
 0x1d5   : > { %v824_v61 = vpop.permute.xlu1 %823 }
 0x1d6   : > { %1007 = vmatmul.mubr.msk.f32.vlgmr.msra.gmra.mrb[2].mxu1 %vm182_vm0, %v824_v61 }
 0x246   : > { %v335_v62 = vpop.f32.mrb[0].mxu0 }
 0x247   : > { %340 = vst.msk [vmem:[%s161_s25] sm:$0x1] %vm339_vm6, %v335_v62  ;;  %v993_v0 = vpop.f32.mrb[1].mxu0 }
 0x29e   : > { %v527_v63 = vpop.f32.mrb[0].mxu1 }
 0x29f   : > { %531 = vst.msk [vmem:[%s161_s25 + $0x1] sm:$0x1] %vm339_vm6, %v527_v63  ;;  %v998_v16 = vpop.f32.mrb[1].mxu1 }
 0x2a5   : > { %v710_v17 = vpop.f32.mrb[2].mxu0 }
 0x2a6   : > { %714 = vst.msk [vmem:[%s161_s25 + $0x2] sm:$0x1] %vm339_vm6, %v710_v17  ;;  %v1003_v6 = vpop.f32.mrb[3].mxu0 }
 0x2a9   : > { %v893_v18 = vpop.f32.mrb[2].mxu1 }
 0x2aa   : > { %897 = vst.msk [vmem:[%s161_s25 + $0x3] sm:$0x1] %vm339_vm6, %v893_v18  ;;  %v1008_v19 = vpop.f32.mrb[3].mxu1 }
 0x2ab PF: > { %s12_s9 = sadd.s32 1, %s1100_s9  }
 0x2ac   : > { %p9_p4 = scmp.ge.s32.totalorder %s12_s9, 4  }
 0x2ae   :  { %11 = sbr.rel (!%p9_p4) target bundleno = 1 (0x1), region = 61 }

// kernel: pruned_multihead_attention.3
= control target key start
LH: loop header
LB: loop body
LE: loop exit
PB: predicated region body
PF: predicated region fallthrough
CT: control target
= control target key end

     0   :  { %s4591_s17 = smov 0   ;;  %s4593_s18 = smov 0   ;;  %s5869_s0 = inlined_call_operand.vmem [shape: f32[2,64,32], index: 0, kind: input, shape index: {}]   ;;  %s5870_s1 = inlined_call_operand.vmem [shape: f32[2,32,16], index: 1, kind: input, shape index: {}]   ;;  %s5871_s2 = inlined_call_operand.vmem [shape: f32[2,32,16], index: 2, kind: input, shape index: {}]   ;;  %s5872_s3 = inlined_call_operand.vmem [shape: f32[32,4], index: 3, kind: input, shape index: {}]   ;;  %s5873_s4 = inlined_call_operand.vmem [shape: f32[4,32], index: 4, kind: input, shape index: {}]   ;;  %s5874_s5 = inlined_call_operand.vmem [shape: bf16[96,32], index: 5, kind: input, shape index: {}]   ;;  %s5875_s6 = inlined_call_operand.vmem [shape: f32[1,32], index: 6, kind: input, shape index: {}]   ;;  %s5876_s7 = inlined_call_operand.vmem [shape: f32[64,1], index: 7, kind: input, shape index: {}]   ;;  %s5877_s8 = inlined_call_operand.vmem [shape: f32[2,32], index: 8, kind: input, shape index: {}]   ;;  %s5878_s9 = inlined_call_operand.vmem [shape: bf16[32,32], index: 9, kind: input, shape index: {}]   ;;  %s5879_s10 = inlined_call_operand.vmem [shape: f32[32,1], index: 10, kind: input, shape index: {}]   ;;  %s5880_s11 = inlined_call_operand.vmem [shape: f32[2,32,64], index: 11, kind: output, shape index: {}]  }
   0x1   :  { %s4595_s19 = smov 0  }
   0x2 LB: > { %s33_s20 = sadd.s32 1, %s4515_s18  ;;  %p3695_p0 = scmp.ge.s32.totalorder %s4519_s19, 1  ;;  %s4519_s19 = sphi %s4595_s19, %s21_s19   ;;  %s4515_s18 = sphi %s4593_s18, %s5961_s18   ;;  %s4511_s17 = sphi %s4591_s17, %s5960_s17  }
   0x3   : > { %p35_p1 = scmp.ge.s32.totalorder %s33_s20, 2  ;;  %p378_p2 = scmp.lt.s32.totalorder %s4519_s19, 3 }
   0x5   : > { %s5963_s20 = smov (%p35_p1, %s33_s20), 0  ;;  %p379_p3 = pnand %p3695_p0, %p378_p2 }
   0x7   : > { %382 = sbr.rel (%p379_p3) target bundleno = 3506 (0xdb2), region = 64 }
   0xe   : > { %v4612_v0 = vld [vmem:[%s5872_s3] sm:$0xff]  ;;  %v4617_v1 = vld [vmem:[%s5872_s3 + $0x8] sm:$0xff]  ;;  %v4622_v2 = vld [vmem:[%s5872_s3 + $0x10] sm:$0xff]  ;;  %p436_p4 = scmp.lt.s32.totalorder %s4511_s17, 1  ;;  %vm493_vm0 = vcmask 261120   ;;  %vm664_vm1 = vcmask 1043456  }
   0xf   : > { %v4626_v3 = vpack.c.bf16 %v4617_v1, %v4612_v0  ;;  %v4631_v4 = vld [vmem:[%s5872_s3 + $0x18] sm:$0xff]  ;;  %v4690_v22 = vld [vmem:[%s5873_s4] sm:$0xf]  ;;  %v4521_v23 = vmov 0.0|0.0   ;;  %vm639_vm2 = vcmask 31744   ;;  %vm4522_vm3 = vmmov 0  }
  0x10   : > { %v4635_v5 = vpack.c.bf16 %v4631_v4, %v4622_v2  ;;  %s5965_s17 = smov (!%p436_p4, %s4511_s17), 1  ;;  %3939 = vmatprep.subr.msk.mxu1 %vm664_vm1, %v4690_v22  ;;  %v4277_v24 = vld [vmem:[%s5874_s5] sm:$0xff]   ;;  %v4523_v60 = vmov 0.0   ;;  %v4278_v61 = vld [vmem:[%s5874_s5 + $0x8] sm:$0xff]   ;;  %s4525_s23 = smov 120   ;;  %vm1421_vm4 = vcmask 64512  }
  0x11   : > { %4149 = vmatprep.subr.bf16.mxu0 %v4626_v3  ;;  %s3794_s29 = sshll.u32 %s5965_s17, 6  ;;  %3940 = vmatpush3.msk.msra.mxu1 %vm664_vm1, %v4690_v22  ;;  %v1021_v25 = vsel %vm493_vm0, %v4277_v24, 0  ;;  %s4702_s22 = sshll.u32 %s5965_s17, 5  ;;  %v1024_v62 = vsel %vm493_vm0, %v4278_v61, 0  ;;  %v983_v63 = vld [vmem:[%s5876_s7] sm:$0xff]  ;;  %vm1502_vm5 = vcmask 130048  }
  0x12   : > { %4151 = vmatpush3.bf16.msra.mxu0 %v4626_v3  ;;  %s443_s13 = scalar_lea.vmem %s5869_s0, %s3794_s29  ;;  %4156 = vmatprep.subr.bf16.mxu1 %v4521_v23  ;;  %s449_s25 = scalar_lea.vmem %s5870_s1, %s4702_s22  ;;  %vm3579_vm6 = vcmask 523264  }
  0x13   : > { %4153 = vmatprep.subr.bf16.mxu0 %v4635_v5  ;;  %v4646_v6 = vld [vmem:[%s443_s13] sm:$0xff]  ;;  %v4648_v7 = vld [vmem:[%s443_s13 + $0x8] sm:$0xff]  ;;  %v4650_v8 = vld [vmem:[%s443_s13 + $0x10] sm:$0xff]  ;;  %s454_s17 = scalar_lea.vmem %s5871_s2, %s4702_s22  ;;  %s4527_s26 = smov 112  }
  0x14   : > { %v485_v9 = vmul.f32 %v4646_v6, %v4646_v6  ;;  %v486_v10 = vmul.f32 %v4648_v7, %v4648_v7  ;;  %v487_v11 = vmul.f32 %v4650_v8, %v4650_v8  ;;  %v4659_v12 = vld [vmem:[%s443_s13 + $0x18] sm:$0xff]  ;;  %v4661_v13 = vld [vmem:[%s443_s13 + $0x20] sm:$0xff]  ;;  %v4670_v16 = vld [vmem:[%s443_s13 + $0x28] sm:$0xff]  ;;  %s462_s15 = scalar_lea.vmem %s5880_s11, %s4702_s22 }
  0x15   : > { %v488_v14 = vmul.f32 %v4659_v12, %v4659_v12  ;;  %v489_v15 = vmul.f32 %v4661_v13, %v4661_v13  ;;  %v4672_v17 = vld [vmem:[%s443_s13 + $0x30] sm:$0xff]  ;;  %v490_v18 = vmul.f32 %v4670_v16, %v4670_v16  ;;  %v4680_v20 = vld [vmem:[%s443_s13 + $0x38] sm:$0xff]  ;;  %v4708_v33 = vld [vmem:[%s449_s25] sm:$0xff] }
  0x16   : > { %4155 = vmatpush3.bf16.msra.mxu0 %v4635_v5  ;;  %3927 = vmatprep.mubr.msk.f32.mxu0 %vm493_vm0, %v485_v9  ;;  %v491_v19 = vmul.f32 %v4672_v17, %v4672_v17  ;;  %v492_v21 = vmul.f32 %v4680_v20, %v4680_v20  ;;  %v4710_v34 = vld [vmem:[%s449_s25 + $0x8] sm:$0xff]  ;;  %v785_v37 = vmul.f32 %v4708_v33, %v4708_v33  ;;  %v4716_v42 = vld [vmem:[%s449_s25 + $0x10] sm:$0xff]  ;;  %v4718_v43 = vld [vmem:[%s449_s25 + $0x18] sm:$0xff]  ;;  %v5881_v9 = vmov 0  }
  0x17   : > { %4186 = vmatprep.subr.msk.bf16.mxu0 %vm493_vm0, %v4277_v24  ;;  %v786_v38 = vmul.f32 %v4710_v34, %v4710_v34  ;;  %v787_v48 = vmul.f32 %v4716_v42, %v4716_v42  ;;  %v788_v49 = vmul.f32 %v4718_v43, %v4718_v43  ;;  %4246 = vset.pattern.permute.xlu0 %v5881_v9 }
  0x18   : > { %4247 = vset.pattern.permute.xlu1 %v5881_v9  ;;  %1101 = vperm.xlu0 %4246, %v983_v63  }
  0x19   : > { %3928 = vmatmul.mubr.msk.f32.vlgmr.msra.gmra.mrb[0].mxu0 %vm493_vm0, %v486_v10  ;;  %v4157_v45 = vpack.c.bf16 %v786_v38, %v785_v37  ;;  %v4160_v53 = vpack.c.bf16 %v788_v49, %v787_v48 }
  0x1a   : > { %3930 = vmatprep.mubr.msk.f32.mxu0 %vm493_vm0, %v487_v11 }
  0x1d   : > { %3931 = vmatmul.mubr.msk.f32.gmra.mrb[2].mxu0 %vm493_vm0, %v488_v14 }
  0x1e   : > { %3933 = vmatprep.mubr.msk.f32.mxu0 %vm493_vm0, %v489_v15 }
  0x1f   : > { %3973 = vmatpush3.bf16.xpose.msra.mxu0 %v1021_v25 }
  0x20   : > { %4187 = vmatprep.subr.msk.bf16.mxu0 %vm493_vm0, %v4278_v61 }
  0x21   : > { %3934 = vmatmul.mubr.msk.f32.gmra.mrb[4].mxu0 %vm493_vm0, %v490_v18 }
  0x22   : > { %3936 = vmatprep.mubr.msk.f32.mxu0 %vm493_vm0, %v491_v19 }
  0x25   : > { %3937 = vmatmul.mubr.msk.f32.gmra.mrb[6].mxu0 %vm493_vm0, %v492_v21 }
  0x27   : > { %3975 = vmatpush3.bf16.xpose.msra.mxu0 %v1024_v62 }
  0x28   : > { %4163 = vmatprep.subr.bf16.mxu0 %v4626_v3 }
  0xec   : > { %v3929_v26 = vpop.f32.mrb[0].mxu0 }
  0xed   : > { %v624_v27 = vmax.f32 %v3929_v26, 1e-24  ;;  %v584_v28 = vpop.f32.mrb[1].mxu0 }
  0xee   : > { %v623_v29 = vmax.f32 %v584_v28, 1e-24 }
  0xf0   : > { %4285 = vrsqrt.f32 %v623_v29  ;;  %v3932_v30 = vpop.f32.mrb[2].mxu0 }
  0xf1   : > { %4287 = vrsqrt.f32 %v624_v27  ;;  %v626_v31 = vmax.f32 %v3932_v30, 1e-24  ;;  %v594_v32 = vpop.f32.mrb[3].mxu0 }
  0xf2   : > { %v625_v35 = vmax.f32 %v594_v32, 1e-24 }
  0xf4   : > { %4289 = vrsqrt.f32 %v625_v35  ;;  %v3935_v36 = vpop.f32.mrb[4].mxu0 }
  0xf5   : > { %4291 = vrsqrt.f32 %v626_v31  ;;  %v628_v39 = vmax.f32 %v3935_v36, 1e-24  ;;  %v604_v40 = vpop.f32.mrb[5].mxu0  ;;  %v1269_v36 = vld [vmem:[%s5877_s8] sm:$0x3] }
  0xf6   : > { %v627_v41 = vmax.f32 %v604_v40, 1e-24 }
  0xf8   : > { %4293 = vrsqrt.f32 %v627_v41  ;;  %v3938_v44 = vpop.f32.mrb[6].mxu0 }
  0xf9   : > { %4295 = vrsqrt.f32 %v628_v39  ;;  %v630_v46 = vmax.f32 %v3938_v44, 1e-24  ;;  %v614_v47 = vpop.f32.mrb[7].mxu0 }
  0xfa   : > { %v4286_v50 = vpop.eup %4285  ;;  %v629_v51 = vmax.f32 %v614_v47, 1e-24 }
  0xfb   : > { %v4288_v52 = vpop.eup %4287  ;;  %3941 = vmatprep.mubr.msk.f32.mxu1 %vm639_vm2, %v4286_v50 }
  0xfc   : > { %4297 = vrsqrt.f32 %v629_v51  ;;  %3942 = vmatmul.mubr.msk.f32.vlgmr.msra.gmra.mrb[0].mxu1 %vm639_vm2, %v4288_v52 }
  0xfd   : > { %4299 = vrsqrt.f32 %v630_v46  ;;  %4158 = vmatpush3.bf16.msra.mxu1 %v4157_v45 }
  0xfe   : > { %v4290_v54 = vpop.eup %4289  ;;  %4159 = vmatprep.subr.bf16.mxu1 %v4521_v23 }
  0xff   : > { %v4292_v55 = vpop.eup %4291  ;;  %3944 = vmatprep.mubr.msk.f32.mxu1 %vm639_vm2, %v4290_v54 }
 0x100   : > { %3945 = vmatmul.mubr.msk.f32.gmra.mrb[2].mxu1 %vm639_vm2, %v4292_v55 }
 0x101   : > { %4161 = vmatpush3.bf16.msra.mxu1 %v4160_v53 }
 0x102   : > { %v4294_v56 = vpop.eup %4293 }
 0x103   : > { %v4296_v57 = vpop.eup %4295  ;;  %3947 = vmatprep.mubr.msk.f32.mxu1 %vm639_vm2, %v4294_v56 }
 0x104   : > { %3948 = vmatmul.mubr.msk.f32.gmra.mrb[4].mxu1 %vm639_vm2, %v4296_v57 }
 0x106   : > { %v4298_v58 = vpop.eup %4297 }
 0x107   : > { %v4300_v59 = vpop.eup %4299  ;;  %3950 = vmatprep.mubr.msk.f32.mxu1 %vm639_vm2, %v4298_v58 }
 0x108   : > { %3951 = vmatmul.mubr.msk.f32.gmra.mrb[6].mxu1 %vm639_vm2, %v4300_v59 }
 0x109   : > { %3961 = vmatprep.mubr.msk.f32.mxu1 %vm4522_vm3, %v4523_v60 }
 0x10c   : > { %3962 = vmatmul.mubr.msk.f32.vlgmr.msra.gmra.mrb[8].mxu1 %vm493_vm0, %v4690_v22 }
 0x10d   : > { %3966 = vmatprep.mubr.msk.f32.mxu1 %vm639_vm2, %v4612_v0 }
 0x1cf   : > { %v3943_v0 = vpop.f32.mrb[0].mxu1 }
 0x1d0   : > { %v774_v10 = vmul.f32 %v3943_v0, %v4648_v7  ;;  %v734_v11 = vpop.f32.mrb[1].mxu1 }
 0x1d1   : > { %v773_v14 = vmul.f32 %v734_v11, %v4646_v6 }
 0x1d3   : > { %v781_v15 = vpack.c.bf16 %v774_v10, %v773_v14  ;;  %v3946_v18 = vpop.f32.mrb[2].mxu1 }
 0x1d4   : > { %v776_v19 = vmul.f32 %v3946_v18, %v4659_v12  ;;  %v744_v21 = vpop.f32.mrb[3].mxu1 }
 0x1d5   : > { %v775_v22 = vmul.f32 %v744_v21, %v4650_v8  ;;  %3976 = vmatprep.mubr.msk.bf16.mxu0 %vm493_vm0, %v781_v15 }
 0x1d7   : > { %v782_v23 = vpack.c.bf16 %v776_v19, %v775_v22  ;;  %v3949_v24 = vpop.f32.mrb[4].mxu1 }
 0x1d8   : > { %v778_v25 = vmul.f32 %v3949_v24, %v4670_v16  ;;  %v754_v26 = vpop.f32.mrb[5].mxu1 }
 0x1d9   : > { %v777_v27 = vmul.f32 %v754_v26, %v4661_v13  ;;  %3977 = vmatmul.mubr.msk.bf16.vlgmr.msra.gmra.mrb[8].mxu0 %vm493_vm0, %v782_v23 }
 0x1da   : > { %4165 = vmatpush3.bf16.msra.mxu0 %v4626_v3 }
 0x1db   : > { %v783_v6 = vpack.c.bf16 %v778_v25, %v777_v27  ;;  %v3952_v7 = vpop.f32.mrb[6].mxu1  ;;  %4167 = vmatprep.subr.bf16.mxu0 %v4635_v5 }
 0x1dc   : > { %v780_v12 = vmul.f32 %v3952_v7, %v4680_v20  ;;  %v764_v8 = vpop.f32.mrb[7].mxu1  ;;  %v984_v20 = vld [vmem:[%s5876_s7 + $0x8] sm:$0xff] }
 0x1dd   : > { %v779_v28 = vmul.f32 %v764_v8, %v4672_v17  ;;  %3980 = vmatprep.mubr.msk.bf16.mxu0 %vm493_vm0, %v783_v6  ;;  %v1270_v17 = vlaneseq  ;;  %1106 = vperm.xlu0 %4246, %v984_v20  }
 0x1de   : > { %4169 = vmatpush3.bf16.msra.mxu0 %v4635_v5 }
 0x1df   : > { %v784_v16 = vpack.c.bf16 %v780_v12, %v779_v28  ;;  %v857_v29 = vpop.f32.mrb[8].mxu1  ;;  %v1271_v32 = vshrl.u32 %v1270_v17, 7  ;;  %v479_v17 = vld [vmem:[%s454_s17 + $0x18] sm:$0xff] }
 0x1e0   : > { %v861_v13 = vmax.f32 %v857_v29, 1e-24  ;;  %v3963_v30 = vpop.f32.mrb[9].mxu1  ;;  %v477_v29 = vld [vmem:[%s454_s17 + $0x8] sm:$0xff] }
 0x1e1   : > { %3981 = vmatmul.mubr.msk.bf16.gmra.mrb[12].mxu0 %vm493_vm0, %v784_v16  ;;  %v1709_v35 = vsub.s32 1, %v1271_v32  ;;  %v476_v16 = vld [vmem:[%s454_s17] sm:$0xff] }
 0x1e2   : > { %4301 = vrsqrt.f32 %v861_v13 }
 0x1e3   : > { %v4776_v37 = vrot.slane %v1269_v36, %v1709_v35 }
 0x1ec   : > { %v4302_v31 = vpop.eup %4301 }
 0x1ed   : > { %3964 = vmatprep.subr.msk.mxu1 %vm664_vm1, %v4302_v31 }
 0x1ee   : > { %3965 = vmatpush3.msk.msra.mxu1 %vm664_vm1, %v4302_v31  ;;  %v478_v31 = vld [vmem:[%s454_s17 + $0x10] sm:$0xff] }
 0x1ef   : > { %3967 = vmatmul.mubr.msk.f32.vlgmr.msra.gmra.mrb[10].mxu1 %vm639_vm2, %v4617_v1  ;;  %v4279_v1 = vld [vmem:[%s5874_s5 + $0x10] sm:$0xff]   ;;  %v970_v20 = vpack.c.bf16 %v479_v17, %v478_v31 }
 0x1f0   : > { %3969 = vmatprep.mubr.msk.f32.mxu1 %vm639_vm2, %v4622_v2  ;;  %v3727_v2 = vld [vmem:[%s5875_s6] ss:$0 sm:$0xff] }
 0x1f3   : > { %3970 = vmatmul.mubr.msk.f32.gmra.mrb[12].mxu1 %vm639_vm2, %v4631_v4  ;;  %v1272_v4 = vsub.s32 0, %v1271_v32 }
 0x1f4   : > { %3988 = vmatprep.mubr.msk.bf16.mxu1 %vm493_vm0, %v4279_v1 }
 0x1f5   : > { %v4785_v41 = vrot.slane %v1269_v36, %v1272_v4 }
 0x2ac   : > { %v3978_v38 = vpop.f32.mrb[8].mxu0 }
 0x2ad   : > { %v1069_v39 = vadd.f32 %v3978_v38, %v3727_v2  ;;  %v1060_v40 = vpop.f32.mrb[9].mxu0 }
 0x2ae   : > { %v1061_v44 = vadd.f32 %v3727_v2, %v1060_v40  ;;  %v3979_v45 = vpop.f32.mrb[10].mxu0 }
 0x2af   : > { %v1072_v46 = vadd.f32 %v3979_v45, %v3727_v2  ;;  %v1063_v47 = vpop.f32.mrb[11].mxu0  ;;  %v1093_v50 = vmul.f32 0.35355338, %v1069_v39 }
 0x2b0   : > { %v1091_v48 = vmul.f32 0.35355338, %v1061_v44  ;;  %v1064_v49 = vadd.f32 %v3727_v2, %v1063_v47 }
 0x2b1   : > { %v1094_v51 = vmul.f32 0.35355338, %v1072_v46  ;;  %v1276_v58 = vmul.f32 %v4785_v41, %v1093_v50 }
 0x2b2   : > { %v1274_v52 = vmul.f32 %v4785_v41, %v1091_v48  ;;  %v1092_v53 = vmul.f32 0.35355338, %v1064_v49 }
 0x2b3   : > { %v4788_v54 = vpack.c.bf16 %v1094_v51, %v1093_v50  ;;  %v1277_v10 = vmul.f32 %v4785_v41, %v1094_v51 }
 0x2b4   : > { %v1275_v55 = vmul.f32 %v4785_v41, %v1092_v53  ;;  %v4791_v56 = vpack.c.bf16 %v1092_v53, %v1091_v48  ;;  %v3982_v57 = vpop.f32.mrb[12].mxu0  ;;  %4008 = vmatprep.mubr.msk.f32.mxu0 %vm493_vm0, %v1274_v52 }
 0x2b5   : > { %v1085_v59 = vadd.f32 %v3982_v57, %v3727_v2  ;;  %v1076_v60 = vpop.f32.mrb[13].mxu0 }
 0x2b6   : > { %v1077_v61 = vadd.f32 %v3727_v2, %v1076_v60  ;;  %1857 = vrot.lane.b32.xlu1 %v4791_v56, %s4525_s23  ;;  %v3983_v62 = vpop.f32.mrb[14].mxu0  ;;  %4009 = vmatmul.mubr.msk.f32.vlgmr.msra.gmra.mrb[16].mxu0 %vm493_vm0, %v1275_v55 }
 0x2b7   : > { %v1088_v63 = vadd.f32 %v3983_v62, %v3727_v2  ;;  %v1079_v0 = vpop.f32.mrb[15].mxu0  ;;  %4011 = vmatprep.mubr.msk.f32.mxu0 %vm493_vm0, %v1276_v58  ;;  %v1097_v15 = vmul.f32 0.35355338, %v1085_v59 }
 0x2b8   : > { %v1095_v11 = vmul.f32 0.35355338, %v1077_v61  ;;  %v1080_v14 = vadd.f32 %v3727_v2, %v1079_v0 }
 0x2b9   : > { %v1098_v18 = vmul.f32 0.35355338, %v1088_v63  ;;  %v1280_v32 = vmul.f32 %v4785_v41, %v1097_v15 }
 0x2ba   : > { %v1278_v19 = vmul.f32 %v4785_v41, %v1095_v11  ;;  %v1096_v21 = vmul.f32 0.35355338, %v1080_v14  ;;  %1859 = vrot.lane.b32.xlu1 %v4788_v54, %s4525_s23  ;;  %4012 = vmatmul.mubr.msk.f32.gmra.mrb[18].mxu0 %vm493_vm0, %v1277_v10 }
 0x2bb   : > { %v4804_v22 = vpack.c.bf16 %v1098_v18, %v1097_v15  ;;  %v1281_v35 = vmul.f32 %v4785_v41, %v1098_v18 }
 0x2bc   : > { %v1279_v23 = vmul.f32 %v4785_v41, %v1096_v21  ;;  %v4807_v24 = vpack.c.bf16 %v1096_v21, %v1095_v11  ;;  %4014 = vmatprep.mubr.msk.f32.mxu0 %vm493_vm0, %v1278_v19 }
 0x2be   : > { %1863 = vrot.lane.b32.xlu1 %v4804_v22, %s4525_s23  ;;  %1861 = vrot.lane.b32.xlu0 %v4807_v24, %s4525_s23 }
 0x2bf   : > { %4015 = vmatmul.mubr.msk.f32.gmra.mrb[20].mxu0 %vm493_vm0, %v1279_v23 }
 0x2c2   : > { %v3968_v25 = vpop.f32.mrb[10].mxu1 }
 0x2c3   : > { %v964_v26 = vmul.f32 %v3968_v25, %v4710_v34  ;;  %v944_v27 = vpop.f32.mrb[11].mxu1  ;;  %v969_v34 = vpack.c.bf16 %v477_v29, %v476_v16 }
 0x2c4   : > { %v963_v6 = vmul.f32 %v944_v27, %v4708_v33  ;;  %v4280_v33 = vld [vmem:[%s5874_s5 + $0x18] sm:$0xff]  }
 0x2c6   : > { %v967_v7 = vpack.c.bf16 %v964_v26, %v963_v6  ;;  %v3971_v12 = vpop.f32.mrb[12].mxu1 }
 0x2c7   : > { %v966_v8 = vmul.f32 %v3971_v12, %v4718_v43  ;;  %v954_v28 = vpop.f32.mrb[13].mxu1  ;;  %v4281_v43 = vld [vmem:[%s5874_s5 + $0x20] sm:$0xff]  }
 0x2c8   : > { %v965_v13 = vmul.f32 %v954_v28, %v4716_v42  ;;  %3984 = vmatprep.subr.bf16.mxu1 %v967_v7  ;;  %v4282_v42 = vld [vmem:[%s5874_s5 + $0x28] sm:$0xff]  }
 0x2c9   : > { %3985 = vmatpush3.bf16.msra.mxu1 %v967_v7 }
 0x2ca   : > { %v968_v30 = vpack.c.bf16 %v966_v8, %v965_v13 }
 0x2cc   : > { %3986 = vmatprep.subr.bf16.mxu1 %v968_v30 }
 0x2cd   : > { %3987 = vmatpush3.bf16.msra.mxu1 %v968_v30 }
 0x2ce   : > { %3992 = vmatprep.subr.bf16.mxu1 %v969_v34 }
 0x2d0   : > { %3989 = vmatmul.mubr.msk.bf16.vlgmr.msra.gmra.mrb[16].mxu1 %vm493_vm0, %v4280_v33 }
 0x2d1   : > { %3993 = vmatpush3.bf16.msra.mxu1 %v969_v34  ;;  %3996 = vmatprep.mubr.msk.bf16.mxu1 %vm493_vm0, %v4281_v43 }
 0x2d2   : > { %3994 = vmatprep.subr.bf16.mxu1 %v970_v20 }
 0x2d5   : > { %3995 = vmatpush3.bf16.msra.mxu1 %v970_v20 }
 0x2d6   : > { %4170 = vmatprep.subr.bf16.mxu1 %v4626_v3 }
 0x2d8   : > { %3997 = vmatmul.mubr.msk.bf16.vlgmr.msra.gmra.mrb[20].mxu1 %vm493_vm0, %v4282_v42 }
 0x2d9   : > { %4172 = vmatpush3.bf16.msra.mxu1 %v4626_v3  ;;  %4017 = vmatprep.mubr.msk.f32.mxu1 %vm493_vm0, %v1280_v32 }
 0x2da   : > { %4171 = vmatprep.subr.bf16.mxu1 %v4635_v5 }
 0x2dd   : > { %4173 = vmatpush3.bf16.msra.mxu1 %v4635_v5  ;;  %v1102_v5 = vpop.permute.xlu0 %1101 }
 0x2e0   : > { %4018 = vmatmul.mubr.msk.f32.vlgmr.msra.gmra.mrb[14].mxu1 %vm493_vm0, %v1281_v35 }
 0x2e1   : > { %4022 = vmatprep.mubr.msk.bf16.mxu1 %vm1421_vm4, %v4791_v56  ;;  %v1107_v45 = vpop.permute.xlu0 %1106 }
 0x328   : > { %v1858_v60 = vpop.permute.xlu1 %1857 }
 0x32c   : > { %v1860_v61 = vpop.permute.xlu1 %1859 }
 0x330   : > { %v1862_v62 = vpop.permute.xlu0 %1861  ;;  %v1864_v63 = vpop.permute.xlu1 %1863 }
 0x389   : > { %v4845_v36 = vpop.f32.mrb[16].mxu0 }
 0x38a   : > { %v4847_v1 = vpop.f32.mrb[17].mxu0 }
 0x38d   : > { %v4849_v2 = vpop.f32.mrb[18].mxu0 }
 0x38e   : > { %v4851_v3 = vpop.f32.mrb[19].mxu0 }
 0x392   : > { %v4853_v4 = vpop.f32.mrb[20].mxu0 }
 0x393   : > { %v4855_v38 = vpop.f32.mrb[21].mxu0 }
 0x3a3   : > { %v4857_v39 = vpop.f32.mrb[16].mxu1 }
 0x3a4   : > { %v1169_v40 = vpop.f32.mrb[17].mxu1 }
 0x3a5   : > { %v1170_v41 = vadd.f32 %v1169_v40, %v1102_v5  ;;  %v4859_v44 = vpop.f32.mrb[18].mxu1 }
 0x3a6   : > { %v1172_v46 = vpop.f32.mrb[19].mxu1 }
 0x3a7   : > { %v1419_v47 = vpack.c.bf16 %v1170_v41, %v1170_v41  ;;  %v1173_v48 = vadd.f32 %v1172_v46, %v1107_v45  ;;  %v987_v41 = vld [vmem:[%s5876_s7 + $0x20] sm:$0xff] }
 0x3a9   : > { %v1435_v49 = vsel %vm664_vm1, %v1419_v47, 0  ;;  %v1851_v50 = vpack.c.bf16 %v1173_v48, %v1173_v48  ;;  %4188 = vmatprep.subr.msk.bf16.mxu1 %vm664_vm1, %v1419_v47 }
 0x3aa   : > { %4021 = vmatpush3.bf16.msra.mxu1 %v1435_v49 }
 0x3ab   : > { %4190 = vmatprep.subr.msk.bf16.mxu1 %vm664_vm1, %v1851_v50  ;;  %v4864_v51 = vpop.f32.mrb[20].mxu1  ;;  %v1878_v53 = vsel %vm664_vm1, %v1851_v50, 0 }
 0x3ac   : > { %v4866_v52 = vpop.f32.mrb[21].mxu1 }
 0x3ad   : > { %4023 = vmatmul.mubr.msk.bf16.vlgmr.msra.gmra.mrb[24].mxu1 %vm1421_vm4, %v4788_v54  ;;  %v4871_v55 = vpop.f32.mrb[22].mxu1 }
 0x3ae   : > { %4026 = vmatprep.mubr.msk.bf16.mxu1 %vm1421_vm4, %v4807_v24  ;;  %4041 = vmatpush3.bf16.msra.mxu1 %v1878_v53  ;;  %v4875_v57 = vpop.f32.mrb[23].mxu1 }
 0x3b3   : > { %v4877_v58 = vpop.f32.mrb[14].mxu1 }
 0x3b4   : > { %v4879_v59 = vpop.f32.mrb[15].mxu1 }
 0x3b5   : > { %4027 = vmatmul.mubr.msk.bf16.gmra.mrb[28].mxu1 %vm1421_vm4, %v4804_v22 }
 0x3b6   : > { %4042 = vmatprep.mubr.msk.bf16.mxu1 %vm1421_vm4, %v1858_v60 }
 0x3bd   : > { %4043 = vmatmul.mubr.msk.bf16.vlgmr.msra.gmra.mrb[32].mxu1 %vm1421_vm4, %v1860_v61 }
 0x3be   : > { %4046 = vmatprep.mubr.msk.bf16.mxu1 %vm1421_vm4, %v1862_v62 }
 0x3c5   : > { %4047 = vmatmul.mubr.msk.bf16.gmra.mrb[36].mxu1 %vm1421_vm4, %v1864_v63 }
 0x480   : > { %v4887_v0 = vpop.f32.mrb[24].mxu1 }
 0x481   : > { %v4889_v10 = vpop.f32.mrb[25].mxu1  ;;  %v1509_v19 = vsel %vm1502_vm5, %v4887_v0, -inf }
 0x482   : > { %v4891_v11 = vpop.f32.mrb[26].mxu1  ;;  %v1503_v14 = vsel %vm1502_vm5, %v4889_v10, -inf }
 0x483   : > { %v4895_v15 = vpop.f32.mrb[27].mxu1  ;;  %1504 = vmax.xlane.f32.xlu0 %v1503_v14  ;;  %v1512_v26 = vsel %vm1502_vm5, %v4891_v11, -inf }
 0x484   : > { %v1506_v18 = vsel %vm1502_vm5, %v4895_v15, -inf }
 0x485   : > { %1507 = vmax.xlane.f32.xlu1 %v1506_v18 }
 0x487   : > { %1510 = vmax.xlane.f32.xlu0 %v1509_v19 }
 0x488   : > { %v4901_v21 = vpop.f32.mrb[28].mxu1 }
 0x489   : > { %v4903_v23 = vpop.f32.mrb[29].mxu1  ;;  %v1521_v7 = vsel %vm1502_vm5, %v4901_v21, -inf }
 0x48a   : > { %v4905_v25 = vpop.f32.mrb[30].mxu1  ;;  %v1515_v27 = vsel %vm1502_vm5, %v4903_v23, -inf }
 0x48b   : > { %1513 = vmax.xlane.f32.xlu0 %v1512_v26  ;;  %1516 = vmax.xlane.f32.xlu1 %v1515_v27  ;;  %v4911_v6 = vpop.f32.mrb[31].mxu1  ;;  %v1524_v13 = vsel %vm1502_vm5, %v4905_v25, -inf }
 0x48c   : > { %v1518_v12 = vsel %vm1502_vm5, %v4911_v6, -inf }
 0x48f   : > { %1522 = vmax.xlane.f32.xlu1 %v1521_v7  ;;  %1519 = vmax.xlane.f32.xlu0 %v1518_v12 }
 0x490   : > { %v4917_v8 = vpop.f32.mrb[32].mxu1 }
 0x491   : > { %v4919_v28 = vpop.f32.mrb[33].mxu1  ;;  %v1951_v34 = vsel %vm1502_vm5, %v4917_v8, -inf }
 0x492   : > { %v4921_v16 = vpop.f32.mrb[34].mxu1  ;;  %v1945_v29 = vsel %vm1502_vm5, %v4919_v28, -inf }
 0x493   : > { %1946 = vmax.xlane.f32.xlu1 %v1945_v29  ;;  %v4927_v30 = vpop.f32.mrb[35].mxu1  ;;  %1525 = vmax.xlane.f32.xlu0 %v1524_v13  ;;  %v1954_v42 = vsel %vm1502_vm5, %v4921_v16, -inf }
 0x494   : > { %v1948_v31 = vsel %vm1502_vm5, %v4927_v30, -inf }
 0x497   : > { %1952 = vmax.xlane.f32.xlu1 %v1951_v34  ;;  %1949 = vmax.xlane.f32.xlu0 %v1948_v31 }
 0x498   : > { %v4933_v17 = vpop.f32.mrb[36].mxu1 }
 0x499   : > { %v4935_v33 = vpop.f32.mrb[37].mxu1  ;;  %v1963_v43 = vsel %vm1502_vm5, %v4933_v17, -inf }
 0x49a   : > { %v4939_v20 = vpop.f32.mrb[38].mxu1  ;;  %v1957_v35 = vsel %vm1502_vm5, %v4935_v33, -inf }
 0x49b   : > { %1964 = vmax.xlane.f32.xlu1 %v1963_v43  ;;  %v4943_v32 = vpop.f32.mrb[39].mxu1  ;;  %1955 = vmax.xlane.f32.xlu0 %v1954_v42  ;;  %v1966_v40 = vsel %vm1502_vm5, %v4939_v20, -inf }
 0x49c   : > { %v1960_v5 = vsel %vm1502_vm5, %v4943_v32, -inf }
 0x49f   : > { %1958 = vmax.xlane.f32.xlu1 %v1957_v35  ;;  %1961 = vmax.xlane.f32.xlu0 %v1960_v5 }
 0x4a3   : > { %1967 = vmax.xlane.f32.xlu0 %v1966_v40 }
 0x4b9   : > { %1186 = vperm.xlu0 %4246, %v987_v41  }
 0x510   : > { %v1505_v45 = vpop.xlane.xlu0 %1504 }
 0x511   : > { %v4955_v46 = vmax.f32 %v1505_v45, %v4847_v1 }
 0x512   : > { %v1508_v47 = vpop.xlane.xlu1 %1507 }
 0x513   : > { %v4960_v49 = vmax.f32 %v1508_v47, %v4845_v36 }
 0x514   : > { %v1511_v50 = vpop.xlane.xlu0 %1510 }
 0x515   : > { %v4965_v60 = vmax.f32 %v1511_v50, %v4851_v3  ;;  %1542 = vperm.xlu0 %4246, %v4960_v49  }
 0x517   : > { %1547 = vperm.xlu1 %4247, %v4965_v60  }
 0x518   : > { %v1514_v62 = vpop.xlane.xlu0 %1513  ;;  %v1517_v63 = vpop.xlane.xlu1 %1516 }
 0x519   : > { %v4972_v14 = vmax.f32 %v1514_v62, %v4849_v2  ;;  %v4975_v18 = vmax.f32 %v1517_v63, %v4855_v38 }
 0x51b   : > { %1537 = vperm.xlu1 %4247, %v4955_v46  }
 0x51c   : > { %v1523_v27 = vpop.xlane.xlu1 %1522  ;;  %v1520_v7 = vpop.xlane.xlu0 %1519 }
 0x51d   : > { %v4983_v12 = vmax.f32 %v1523_v27, %v4879_v59  ;;  %v4986_v29 = vmax.f32 %v1520_v7, %v4853_v4 }
 0x51f   : > { %1552 = vperm.xlu1 %4247, %v4972_v14  }
 0x520   : > { %v1947_v31 = vpop.xlane.xlu1 %1946  ;;  %v1526_v43 = vpop.xlane.xlu0 %1525 }
 0x521   : > { %v4994_v42 = vmax.f32 %v1526_v43, %v4877_v58  ;;  %v1969_v45 = vmax.f32 %v1947_v31, %v4847_v1  ;;  %v4526_v31 = vmov 1  }
 0x523   : > { %1567 = vperm.xlu1 %4247, %v4983_v12   ;;  %1572 = vperm.xlu0 %4246, %v4994_v42   ;;  %v2041_v7 = vsub.f32 %v4847_v1, %v1969_v45 }
 0x524   : > { %v1953_v5 = vpop.xlane.xlu1 %1952  ;;  %v1950_v40 = vpop.xlane.xlu0 %1949 }
 0x525   : > { %v1971_v41 = vmax.f32 %v1953_v5, %v4851_v3  ;;  %v1970_v27 = vmax.f32 %v1950_v40, %v4845_v36  ;;  %v988_v40 = vld [vmem:[%s5876_s7 + $0x28] sm:$0xff] }
 0x527   : > { %v2043_v47 = vsub.f32 %v4851_v3, %v1971_v41  ;;  %1562 = vperm.xlu0 %4246, %v4986_v29   ;;  %1557 = vperm.xlu1 %4247, %v4975_v18  }
 0x528   : > { %v1965_v50 = vpop.xlane.xlu1 %1964  ;;  %v1956_v62 = vpop.xlane.xlu0 %1955 }
 0x529   : > { %v5006_v63 = vmax.f32 %v1965_v50, %v4879_v59  ;;  %v2053_v43 = vmul.f32 1.442695, %v2043_v47  ;;  %v1972_v26 = vmax.f32 %v1956_v62, %v4849_v2  ;;  %v2049_v50 = vmul.f32 1.442695, %v2041_v7 }
 0x52a   : > { %v2042_v7 = vsub.f32 %v4845_v36, %v1970_v27 }
 0x52b   : > { %4249 = vset.pattern.permute.xlu0 %v4526_v31  ;;  %4248 = vset.pattern.permute.xlu1 %v4526_v31  ;;  %4303 = vpow2.f32 %v2053_v43 }
 0x52c   : > { %v1962_v35 = vpop.xlane.xlu0 %1961  ;;  %1984 = vperm.xlu0 %4249, %v1970_v27   ;;  %1989 = vperm.xlu1 %4248, %v1971_v41   ;;  %v2044_v41 = vsub.f32 %v4849_v2, %v1972_v26  ;;  %4305 = vpow2.f32 %v2049_v50 }
 0x52d   : > { %v5014_v53 = vmax.f32 %v1962_v35, %v4853_v4  ;;  %v1959_v35 = vpop.xlane.xlu1 %1958 }
 0x52e   : > { %v2055_v43 = vmul.f32 1.442695, %v2044_v41  ;;  %v1973_v19 = vmax.f32 %v1959_v35, %v4855_v38 }
 0x530   : > { %v1968_v13 = vpop.xlane.xlu0 %1967  ;;  %4250 = vset.pattern.permute.xlu0 %v5881_v9  ;;  %1979 = vperm.xlu1 %4248, %v1969_v45   ;;  %4307 = vpow2.f32 %v2055_v43 }
 0x531   : > { %v5024_v62 = vmax.f32 %v1968_v13, %v4877_v58  ;;  %1191 = vperm.xlu0 %4250, %v988_v40   ;;  %v2051_v13 = vmul.f32 1.442695, %v2042_v7  ;;  %v2045_v40 = vsub.f32 %v4855_v38, %v1973_v19 }
 0x533   : > { %4309 = vpow2.f32 %v2051_v13 }
 0x534   : > { %1994 = vperm.xlu1 %4248, %v1972_v26  }
 0x535   : > { %4251 = vset.pattern.permute.xlu0 %v4526_v31  ;;  %v5031_v61 = vpop.eup %4303  ;;  %v2057_v31 = vmul.f32 1.442695, %v2045_v40 }
 0x536   : > { %2009 = vperm.xlu0 %4251, %v5006_v63   ;;  %v5037_v27 = vpop.eup %4305 }
 0x537   : > { %4311 = vpow2.f32 %v2057_v31 }
 0x538   : > { %v1187_v45 = vpop.permute.xlu0 %1186  ;;  %1999 = vperm.xlu1 %4248, %v1973_v19  }
 0x539   : > { %v1255_v50 = vadd.f32 %v4866_v52, %v1187_v45 }
 0x53a   : > { %2121 = vperm.xlu0 %4251, %v5031_v61   ;;  %v5043_v52 = vpop.eup %4307 }
 0x53b   : > { %v1420_v26 = vpack.c.bf16 %v1255_v50, %v1255_v50 }
 0x53c   : > { %2004 = vperm.xlu1 %4248, %v5014_v53  }
 0x53d   : > { %4189 = vmatprep.subr.msk.bf16.mxu0 %vm1502_vm5, %v1420_v26  ;;  %v1732_v41 = vsel %vm1502_vm5, %v1420_v26, 0  ;;  %v5046_v19 = vpop.eup %4309 }
 0x53e   : > { %4031 = vmatpush3.bf16.xpose.msra.mxu0 %v1732_v41  ;;  %2111 = vperm.xlu0 %4251, %v5037_v27  }
 0x540   : > { %2014 = vperm.xlu1 %4248, %v5024_v62  }
 0x541   : > { %v5049_v35 = vpop.eup %4311 }
 0x544   : > { %2126 = vperm.xlu1 %4248, %v5043_v52  }
 0x548   : > { %2116 = vperm.xlu1 %4248, %v5046_v19  }
 0x54c   : > { %2131 = vperm.xlu1 %4248, %v5049_v35  }
 0x594   : > { %v1543_v7 = vpop.permute.xlu0 %1542 }
 0x595   : > { %v1576_v43 = vsub.f32 %v4895_v15, %v1543_v7 }
 0x596   : > { %v1548_v45 = vpop.permute.xlu1 %1547 }
 0x597   : > { %v1585_v13 = vmul.f32 1.442695, %v1576_v43  ;;  %v1577_v40 = vsub.f32 %v4887_v0, %v1548_v45 }
 0x599   : > { %4313 = vpow2.f32 %v1585_v13  ;;  %v1587_v41 = vmul.f32 1.442695, %v1577_v40 }
 0x59a   : > { %v1538_v50 = vpop.permute.xlu1 %1537 }
 0x59b   : > { %v1575_v26 = vsub.f32 %v4889_v10, %v1538_v50 }
 0x59d   : > { %v1583_v31 = vmul.f32 1.442695, %v1575_v26 }
 0x59e   : > { %v1553_v48 = vpop.permute.xlu1 %1552 }
 0x59f   : > { %4315 = vpow2.f32 %v1583_v31  ;;  %v1578_v9 = vsub.f32 %v4891_v11, %v1553_v48 }
 0x5a0   : > { %4317 = vpow2.f32 %v1587_v41 }
 0x5a1   : > { %v1589_v34 = vmul.f32 1.442695, %v1578_v9 }
 0x5a2   : > { %v1568_v5 = vpop.permute.xlu1 %1567  ;;  %v1573_v47 = vpop.permute.xlu0 %1572 }
 0x5a3   : > { %4319 = vpow2.f32 %v1589_v34  ;;  %v1581_v15 = vsub.f32 %v4901_v21, %v1568_v5  ;;  %v1582_v7 = vsub.f32 %v4905_v25, %v1573_v47  ;;  %v5060_v50 = vpop.eup %4313 }
 0x5a5   : > { %v1595_v0 = vmul.f32 1.442695, %v1581_v15  ;;  %v1597_v43 = vmul.f32 1.442695, %v1582_v7 }
 0x5a6   : > { %v1563_v45 = vpop.permute.xlu0 %1562  ;;  %v1558_v10 = vpop.permute.xlu1 %1557 }
 0x5a7   : > { %4321 = vpow2.f32 %v1595_v0  ;;  %v1580_v13 = vsub.f32 %v4911_v6, %v1563_v45  ;;  %v1579_v40 = vsub.f32 %v4903_v23, %v1558_v10 }
 0x5a8   : > { %4323 = vpow2.f32 %v1597_v43 }
 0x5a9   : > { %v5062_v9 = vpop.eup %4315  ;;  %v1593_v11 = vmul.f32 1.442695, %v1580_v13  ;;  %v1591_v48 = vmul.f32 1.442695, %v1579_v40 }
 0x5aa   : > { %v1663_v21 = vpack.c.bf16 %v5060_v50, %v5062_v9  ;;  %v5066_v5 = vpop.eup %4317 }
 0x5ab   : > { %4325 = vpow2.f32 %v1593_v11  ;;  %v1985_v25 = vpop.permute.xlu0 %1984  ;;  %v1990_v34 = vpop.permute.xlu1 %1989 }
 0x5ac   : > { %4327 = vpow2.f32 %v1591_v48  ;;  %v2018_v6 = vsub.f32 %v4927_v30, %v1985_v25  ;;  %v2019_v23 = vsub.f32 %v4917_v8, %v1990_v34  ;;  %4032 = vmatprep.mubr.msk.bf16.mxu0 %vm1502_vm5, %v1663_v21 }
 0x5ad   : > { %v5071_v47 = vpop.eup %4319 }
 0x5ae   : > { %v1664_v26 = vpack.c.bf16 %v5071_v47, %v5066_v5  ;;  %v2029_v31 = vmul.f32 1.442695, %v2019_v23  ;;  %v2027_v41 = vmul.f32 1.442695, %v2018_v6 }
 0x5af   : > { %v1980_v15 = vpop.permute.xlu1 %1979 }
 0x5b0   : > { %v2017_v7 = vsub.f32 %v4919_v28, %v1980_v15  ;;  %4033 = vmatmul.mubr.msk.bf16.vlgmr.msra.gmra.mrb[24].mxu0 %vm1502_vm5, %v1664_v26  ;;  %v1192_v0 = vpop.permute.xlu0 %1191  ;;  %4329 = vpow2.f32 %v2029_v31 }
 0x5b1   : > { %v5077_v43 = vpop.eup %4321  ;;  %v1258_v8 = vadd.f32 %v4875_v57, %v1192_v0  ;;  %4331 = vpow2.f32 %v2027_v41 }
 0x5b2   : > { %v5080_v30 = vpop.eup %4323  ;;  %v2025_v45 = vmul.f32 1.442695, %v2017_v7 }
 0x5b3   : > { %v1852_v10 = vpack.c.bf16 %v1258_v8, %v1258_v8  ;;  %v1995_v13 = vpop.permute.xlu1 %1994  ;;  %v1666_v40 = vpack.c.bf16 %v5080_v30, %v5077_v43 }
 0x5b4   : > { %4333 = vpow2.f32 %v2025_v45  ;;  %v2020_v28 = vsub.f32 %v4921_v16, %v1995_v13 }
 0x5b5   : > { %v5085_v11 = vpop.eup %4325  ;;  %4191 = vmatprep.subr.msk.bf16.mxu0 %vm1502_vm5, %v1852_v10  ;;  %v2010_v48 = vpop.permute.xlu0 %2009  ;;  %v2202_v21 = vsel %vm1502_vm5, %v1852_v10, 0 }
 0x5b6   : > { %v5089_v57 = vpop.eup %4327  ;;  %v2031_v25 = vmul.f32 1.442695, %v2020_v28  ;;  %v2023_v34 = vsub.f32 %v4933_v17, %v2010_v48  ;;  %4051 = vmatpush3.bf16.xpose.msra.mxu0 %v2202_v21 }
 0x5b7   : > { %v2000_v6 = vpop.permute.xlu1 %1999  ;;  %v1665_v23 = vpack.c.bf16 %v5085_v11, %v5089_v57 }
 0x5b8   : > { %4335 = vpow2.f32 %v2031_v25  ;;  %v2037_v26 = vmul.f32 1.442695, %v2023_v34  ;;  %v2021_v16 = vsub.f32 %v4935_v33, %v2000_v6 }
 0x5b9   : > { %4036 = vmatprep.mubr.msk.bf16.mxu0 %vm1502_vm5, %v1665_v23 }
 0x5ba   : > { %4337 = vpow2.f32 %v2037_v26  ;;  %4037 = vmatmul.mubr.msk.bf16.gmra.mrb[28].mxu0 %vm1502_vm5, %v1666_v40  ;;  %v4330_v31 = vpop.eup %4329  ;;  %v2033_v41 = vmul.f32 1.442695, %v2021_v16 }
 0x5bb   : > { %v2005_v15 = vpop.permute.xlu1 %2004  ;;  %v2071_v17 = vsel %vm1502_vm5, %v4330_v31, 0.0  ;;  %v4332_v0 = vpop.eup %4331 }
 0x5bc   : > { %v2022_v7 = vsub.f32 %v4943_v32, %v2005_v15  ;;  %2072 = vadd.xlane.f32.xlu0 %v2071_v17  ;;  %4339 = vpow2.f32 %v2033_v41  ;;  %v2068_v40 = vsel %vm1502_vm5, %v4332_v0, 0.0 }
 0x5be   : > { %v4334_v8 = vpop.eup %4333  ;;  %v2035_v45 = vmul.f32 1.442695, %v2022_v7  ;;  %v5890_v7 = vsub.f32 %v4879_v59, %v5006_v63  ;;  %v5891_v63 = vsub.f32 %v4877_v58, %v5024_v62 }
 0x5bf   : > { %v2015_v10 = vpop.permute.xlu1 %2014  ;;  %v2065_v33 = vsel %vm1502_vm5, %v4334_v8, 0.0  ;;  %v2105_v13 = vpack.c.bf16 %v4332_v0, %v4334_v8 }
 0x5c0   : > { %4341 = vpow2.f32 %v2035_v45  ;;  %v2024_v28 = vsub.f32 %v4939_v20, %v2015_v10  ;;  %2066 = vadd.xlane.f32.xlu1 %v2065_v33  ;;  %2069 = vadd.xlane.f32.xlu0 %v2068_v40  ;;  %v5889_v20 = vsub.f32 %v4853_v4, %v5014_v53  ;;  %v2061_v17 = vmul.f32 1.442695, %v5890_v7 }
 0x5c1   : > { %4052 = vmatprep.mubr.msk.bf16.mxu0 %vm1502_vm5, %v2105_v13  ;;  %v2063_v33 = vmul.f32 1.442695, %v5891_v63 }
 0x5c2   : > { %v4336_v32 = vpop.eup %4335  ;;  %v2039_v48 = vmul.f32 1.442695, %v2024_v28  ;;  %v2059_v23 = vmul.f32 1.442695, %v5889_v20  ;;  %v5126_v28 = vld [vmem:[%s5878_s9] sm:$0xff]  }
 0x5c3   : > { %v2106_v21 = vpack.c.bf16 %v4336_v32, %v4330_v31  ;;  %v2074_v25 = vsel %vm1502_vm5, %v4336_v32, 0.0  ;;  %4080 = vmatprep.mubr.msk.bf16.mxu1 %vm1421_vm4, %v5126_v28  ;;  %v2127_v40 = vpop.permute.xlu1 %2126  ;;  %v2122_v32 = vpop.permute.xlu0 %2121 }
 0x5c4   : > { %v4338_v34 = vpop.eup %4337  ;;  %4343 = vpow2.f32 %v2039_v48  ;;  %2075 = vadd.xlane.f32.xlu1 %v2074_v25 }
 0x5c5   : > { %4053 = vmatmul.mubr.msk.bf16.vlgmr.msra.gmra.mrb[32].mxu0 %vm1502_vm5, %v2106_v21  ;;  %v2083_v6 = vsel %vm1502_vm5, %v4338_v34, 0.0  ;;  %4345 = vpow2.f32 %v2059_v23 }
 0x5c6   : > { %v4340_v26 = vpop.eup %4339  ;;  %4347 = vpow2.f32 %v2061_v17 }
 0x5c7   : > { %v2077_v45 = vsel %vm1502_vm5, %v4340_v26, 0.0  ;;  %4349 = vpow2.f32 %v2063_v33  ;;  %v2117_v48 = vpop.permute.xlu1 %2116  ;;  %v2112_v21 = vpop.permute.xlu0 %2111 }
 0x5c8   : > { %2084 = vadd.xlane.f32.xlu1 %v2083_v6 }
 0x5ca   : > { %v4342_v16 = vpop.eup %4341 }
 0x5cb   : > { %v2080_v41 = vsel %vm1502_vm5, %v4342_v16, 0.0  ;;  %v2107_v15 = vpack.c.bf16 %v4342_v16, %v4340_v26  ;;  %v2132_v25 = vpop.permute.xlu1 %2131 }
 0x5cc   : > { %2081 = vadd.xlane.f32.xlu1 %v2080_v41 }
 0x5cd   : > { %4056 = vmatprep.mubr.msk.bf16.mxu0 %vm1502_vm5, %v2107_v15 }
 0x5ce   : > { %v4344_v31 = vpop.eup %4343 }
 0x5cf   : > { %v2108_v0 = vpack.c.bf16 %v4344_v31, %v4338_v34  ;;  %v4346_v53 = vpop.eup %4345  ;;  %v2086_v10 = vsel %vm1502_vm5, %v4344_v31, 0.0 }
 0x5d0   : > { %v5115_v8 = vpop.eup %4347 }
 0x5d1   : > { %4057 = vmatmul.mubr.msk.bf16.gmra.mrb[36].mxu0 %vm1502_vm5, %v2108_v0  ;;  %v4350_v13 = vpop.eup %4349  ;;  %v2149_v0 = vmul.f32 %v2112_v21, %v4776_v37 }
 0x5d6   : > { %2136 = vperm.xlu0 %4251, %v4346_v53  }
 0x5dd   : > { %2141 = vperm.xlu1 %4248, %v5115_v8  }
 0x5f5   : > { %2078 = vadd.xlane.f32.xlu0 %v2077_v45  ;;  %v2151_v45 = vmul.f32 %v2122_v32, %v4776_v37 }
 0x5f9   : > { %2087 = vadd.xlane.f32.xlu0 %v2086_v10  ;;  %v2152_v10 = vmul.f32 %v2127_v40, %v4776_v37 }
 0x60f   : > { %2146 = vperm.xlu0 %4251, %v4350_v13  }
 0x649   : > { %v2073_v34 = vpop.xlane.xlu0 %2072 }
 0x64a   : > { %v2091_v16 = vadd.f32 %v5031_v61, %v2073_v34 }
 0x64d   : > { %v2067_v6 = vpop.xlane.xlu1 %2066  ;;  %v2070_v62 = vpop.xlane.xlu0 %2069 }
 0x64e   : > { %v2089_v20 = vadd.f32 %v5037_v27, %v2067_v6  ;;  %v2090_v23 = vadd.f32 %v5046_v19, %v2070_v62  ;;  %v2150_v19 = vmul.f32 %v2117_v48, %v4776_v37 }
 0x650   : > { %4351 = vrcp.f32 %v2089_v20 }
 0x651   : > { %4353 = vrcp.f32 %v2090_v23  ;;  %v2076_v26 = vpop.xlane.xlu1 %2075 }
 0x652   : > { %v2092_v41 = vadd.f32 %v5043_v52, %v2076_v26  ;;  %4355 = vrcp.f32 %v2091_v16 }
 0x654   : > { %4357 = vrcp.f32 %v2092_v41 }
 0x655   : > { %v2085_v15 = vpop.xlane.xlu1 %2084  ;;  %v2137_v63 = vpop.permute.xlu0 %2136 }
 0x656   : > { %v2154_v33 = vmul.f32 %v2137_v63, %v4776_v37  ;;  %v2095_v23 = vadd.f32 %v5115_v8, %v2085_v15 }
 0x659   : > { %v2082_v7 = vpop.xlane.xlu1 %2081 }
 0x65a   : > { %v4352_v31 = vpop.eup %4351  ;;  %v2094_v27 = vadd.f32 %v4346_v53, %v2082_v7  ;;  %v2153_v7 = vmul.f32 %v2132_v25, %v4776_v37  ;;  %v5897_v25 = vmov 0  }
 0x65b   : > { %v4354_v17 = vpop.eup %4353  ;;  %2271 = vperm.xlu1 %4248, %v4352_v31  }
 0x65c   : > { %2276 = vperm.xlu0 %4251, %v4354_v17   ;;  %4359 = vrcp.f32 %v2094_v27  ;;  %v4356_v61 = vpop.eup %4355 }
 0x65d   : > { %v2142_v15 = vpop.permute.xlu1 %2141 }
 0x65e   : > { %v4358_v52 = vpop.eup %4357 }
 0x65f   : > { %2165 = vrot.lane.b32.xlu1 %v2149_v0, %s4525_s23 }
 0x660   : > { %2167 = vrot.lane.b32.xlu0 %v2150_v19, %s4525_s23 }
 0x663   : > { %2281 = vperm.xlu1 %4248, %v4356_v61  }
 0x664   : > { %2286 = vperm.xlu0 %4251, %v4358_v52   ;;  %v2155_v52 = vmul.f32 %v2142_v15, %v4776_v37 }
 0x666   : > { %v4360_v53 = vpop.eup %4359 }
 0x667   : > { %2169 = vrot.lane.b32.xlu1 %v2151_v45, %s4525_s23 }
 0x668   : > { %2171 = vrot.lane.b32.xlu0 %v2152_v10, %s4525_s23  ;;  %v985_v10 = vld [vmem:[%s5876_s7 + $0x10] sm:$0xff] }
 0x66c   : > { %2296 = vperm.xlu0 %4251, %v4360_v53   ;;  %v4284_v53 = vld [vmem:[%s5878_s9 + $0x8] sm:$0xff]  }
 0x670   : > { %2175 = vrot.lane.b32.xlu0 %v2154_v33, %s4525_s23 }
 0x682   : > { %v2079_v48 = vpop.xlane.xlu0 %2078 }
 0x683   : > { %v5144_v21 = vpop.f32.mrb[24].mxu0  ;;  %v2093_v34 = vadd.f32 %v5049_v35, %v2079_v48 }
 0x684   : > { %v5147_v6 = vpop.f32.mrb[25].mxu0 }
 0x685   : > { %v5149_v32 = vpop.f32.mrb[26].mxu0  ;;  %4361 = vrcp.f32 %v2093_v34 }
 0x686   : > { %5892 = vst [vmem:[#allocation2_spill] sm:$0xff] %v5149_v32  ;;  %v5151_v40 = vpop.f32.mrb[27].mxu0  ;;  %v2088_v62 = vpop.xlane.xlu0 %2087 }
 0x687   : > { %v2096_v20 = vadd.f32 %v4350_v13, %v2088_v62 }
 0x689   : > { %4363 = vrcp.f32 %v2096_v20 }
 0x68a   : > { %4365 = vrcp.f32 %v2095_v23 }
 0x68d   : > { %v5154_v26 = vpop.f32.mrb[28].mxu0 }
 0x68e   : > { %5893 = vst [vmem:[#allocation3_spill] sm:$0xff] %v5154_v26  ;;  %v5156_v16 = vpop.f32.mrb[29].mxu0  ;;  %v2147_v0 = vpop.permute.xlu0 %2146 }
 0x68f   : > { %5894 = vst [vmem:[#allocation4_spill] sm:$0xff] %v5156_v16  ;;  %v5158_v41 = vpop.f32.mrb[30].mxu0  ;;  %v4362_v35 = vpop.eup %4361  ;;  %v2156_v8 = vmul.f32 %v2147_v0, %v4776_v37 }
 0x690   : > { %5895 = vst [vmem:[#allocation5_spill] sm:$0xff] %v5158_v41  ;;  %v5160_v31 = vpop.f32.mrb[31].mxu0  ;;  %2291 = vperm.xlu1 %4248, %v4362_v35  }
 0x691   : > { %5896 = vst [vmem:[#allocation6_spill] sm:$0xff] %v5160_v31 }
 0x693   : > { %v4364_v17 = vpop.eup %4363 }
 0x694   : > { %2173 = vrot.lane.b32.xlu1 %v2153_v7, %s4525_s23  ;;  %2306 = vperm.xlu0 %4251, %v4364_v17   ;;  %v4366_v13 = vpop.eup %4365 }
 0x698   : > { %v4054_v27 = vpop.f32.mrb[32].mxu0  ;;  %2301 = vperm.xlu1 %4248, %v4366_v13   ;;  %2179 = vrot.lane.b32.xlu0 %v2156_v8, %s4525_s23 }
 0x699   : > { %v2238_v19 = vpop.f32.mrb[33].mxu0 }
 0x69a   : > { %v4055_v61 = vpop.f32.mrb[34].mxu0 }
 0x69b   : > { %v2241_v45 = vpop.f32.mrb[35].mxu0 }
 0x69c   : > { %2331 = vrot.lane.b32.xlu0 %v5126_v28, %s4525_s23  ;;  %2177 = vrot.lane.b32.xlu1 %v2155_v52, %s4525_s23 }
 0x69d   : > { %4252 = vset.pattern.permute.xlu1 %v5897_v25 }
 0x6a0   : > { %2471 = vrot.lane.b32.xlu0 %v4791_v56, %s4527_s26  ;;  %1111 = vperm.xlu1 %4252, %v985_v10  }
 0x6a4   : > { %v4058_v63 = vpop.f32.mrb[36].mxu0  ;;  %2475 = vrot.lane.b32.xlu0 %v4807_v24, %s4527_s26  ;;  %2333 = vrot.lane.b32.xlu1 %v4284_v53, %s4525_s23  ;;  %s4529_s23 = smov 104  }
 0x6a5   : > { %v2254_v28 = vpop.f32.mrb[37].mxu0 }
 0x6a6   : > { %v4059_v33 = vpop.f32.mrb[38].mxu0 }
 0x6a7   : > { %v2257_v48 = vpop.f32.mrb[39].mxu0 }
 0x6a8   : > { %2473 = vrot.lane.b32.xlu1 %v4788_v54, %s4527_s26 }
 0x6ac   : > { %2477 = vrot.lane.b32.xlu1 %v4804_v22, %s4527_s26 }
 0x6da   : > { %v2272_v34 = vpop.permute.xlu1 %2271 }
 0x6db   : > { %v2277_v62 = vpop.permute.xlu0 %2276 }
 0x6de   : > { %v2166_v20 = vpop.permute.xlu1 %2165 }
 0x6df   : > { %v2168_v23 = vpop.permute.xlu0 %2167  ;;  %v2239_v35 = vadd.f32 %v2238_v19, %v2166_v20 }
 0x6e0   : > { %v2242_v7 = vadd.f32 %v2241_v45, %v2168_v23 }
 0x6e1   : > { %v2309_v17 = vmul.f32 %v2272_v34, %v2239_v35 }
 0x6e2   : > { %v2310_v0 = vmul.f32 %v2277_v62, %v2242_v7  ;;  %v2282_v8 = vpop.permute.xlu1 %2281 }
 0x6e3   : > { %v2287_v13 = vpop.permute.xlu0 %2286 }
 0x6e4   : > { %v2317_v15 = vpack.c.bf16 %v2310_v0, %v2309_v17 }
 0x6e6   : > { %4192 = vmatprep.subr.msk.bf16.mxu0 %vm1421_vm4, %v2317_v15  ;;  %v2342_v52 = vsel %vm1421_vm4, %v2317_v15, 0  ;;  %v2170_v10 = vpop.permute.xlu1 %2169 }
 0x6e7   : > { %v2172_v53 = vpop.permute.xlu0 %2171  ;;  %4061 = vmatpush3.bf16.xpose.msra.mxu0 %v2342_v52  ;;  %v2247_v41 = vadd.f32 %v4054_v27, %v2170_v10 }
 0x6e8   : > { %v2250_v26 = vadd.f32 %v4055_v61, %v2172_v53 }
 0x6e9   : > { %v2311_v16 = vmul.f32 %v2282_v8, %v2247_v41 }
 0x6ea   : > { %v2312_v31 = vmul.f32 %v2287_v13, %v2250_v26 }
 0x6eb   : > { %v2297_v45 = vpop.permute.xlu0 %2296 }
 0x6ec   : > { %v2318_v32 = vpack.c.bf16 %v2312_v31, %v2311_v16 }
 0x6ee   : > { %4193 = vmatprep.subr.msk.bf16.mxu0 %vm1421_vm4, %v2318_v32  ;;  %v2345_v19 = vsel %vm1421_vm4, %v2318_v32, 0 }
 0x6ef   : > { %4063 = vmatpush3.bf16.xpose.msra.mxu0 %v2345_v19  ;;  %v2176_v34 = vpop.permute.xlu0 %2175 }
 0x6f0   : > { %v2258_v20 = vadd.f32 %v2257_v48, %v2176_v34 }
 0x6f2   : > { %v2314_v17 = vmul.f32 %v2297_v45, %v2258_v20 }
 0x70f   : > { %v2292_v62 = vpop.permute.xlu1 %2291 }
 0x713   : > { %v2307_v23 = vpop.permute.xlu0 %2306  ;;  %v2174_v35 = vpop.permute.xlu1 %2173 }
 0x714   : > { %v2255_v7 = vadd.f32 %v2254_v28, %v2174_v35 }
 0x716   : > { %v2313_v0 = vmul.f32 %v2292_v62, %v2255_v7 }
 0x717   : > { %v2180_v15 = vpop.permute.xlu0 %2179  ;;  %v2302_v27 = vpop.permute.xlu1 %2301 }
 0x718   : > { %v2319_v61 = vpack.c.bf16 %v2314_v17, %v2313_v0  ;;  %v2266_v41 = vadd.f32 %v4059_v33, %v2180_v15 }
 0x71a   : > { %4194 = vmatprep.subr.msk.bf16.mxu0 %vm1421_vm4, %v2319_v61  ;;  %v2348_v26 = vsel %vm1421_vm4, %v2319_v61, 0  ;;  %v2316_v48 = vmul.f32 %v2307_v23, %v2266_v41 }
 0x71b   : > { %v2332_v16 = vpop.permute.xlu0 %2331  ;;  %4065 = vmatpush3.bf16.xpose.msra.mxu0 %v2348_v26  ;;  %v2178_v32 = vpop.permute.xlu1 %2177 }
 0x71c   : > { %v2263_v31 = vadd.f32 %v4058_v63, %v2178_v32  ;;  %4068 = vmatprep.mubr.msk.bf16.mxu0 %vm1421_vm4, %v2332_v16 }
 0x71e   : > { %v2315_v8 = vmul.f32 %v2302_v27, %v2263_v31 }
 0x71f   : > { %v1112_v13 = vpop.permute.xlu1 %1111  ;;  %v2472_v19 = vpop.permute.xlu0 %2471 }
 0x720   : > { %v2320_v28 = vpack.c.bf16 %v2316_v48, %v2315_v8  ;;  %v1178_v52 = vadd.f32 %v4857_v39, %v1112_v13 }
 0x722   : > { %v2469_v10 = vpack.c.bf16 %v1178_v52, %v1178_v52  ;;  %4195 = vmatprep.subr.msk.bf16.mxu0 %vm1421_vm4, %v2320_v28  ;;  %v2351_v33 = vsel %vm1421_vm4, %v2320_v28, 0 }
 0x723   : > { %4067 = vmatpush3.bf16.xpose.msra.mxu0 %v2351_v33  ;;  %v2334_v53 = vpop.permute.xlu1 %2333  ;;  %v2476_v34 = vpop.permute.xlu0 %2475 }
 0x724   : > { %4200 = vmatprep.subr.msk.bf16.mxu0 %vm664_vm1, %v2469_v10  ;;  %v2492_v63 = vsel %vm664_vm1, %v2469_v10, 0  ;;  %v5883_v10 = vmov 2  }
 0x725   : > { %4253 = vset.pattern.permute.xlu1 %v5883_v10  ;;  %4254 = vset.pattern.permute.xlu0 %v5883_v10 }
 0x727   : > { %v2474_v45 = vpop.permute.xlu1 %2473 }
 0x72a   : > { %4069 = vmatmul.mubr.msk.bf16.vlgmr.msra.gmra.mrb[40].mxu0 %vm1421_vm4, %v2334_v53 }
 0x72b   : > { %4085 = vmatpush3.bf16.msra.mxu0 %v2492_v63  ;;  %4086 = vmatprep.mubr.msk.bf16.mxu0 %vm1421_vm4, %v2472_v19  ;;  %v2478_v39 = vpop.permute.xlu1 %2477 }
 0x732   : > { %4087 = vmatmul.mubr.msk.bf16.vlgmr.msra.gmra.mrb[44].mxu0 %vm1421_vm4, %v2474_v45 }
 0x733   : > { %4090 = vmatprep.mubr.msk.bf16.mxu0 %vm1421_vm4, %v2476_v34 }
 0x73a   : > { %4091 = vmatmul.mubr.msk.bf16.gmra.mrb[48].mxu0 %vm1421_vm4, %v2478_v39 }
 0x7fd   : > { %v5203_v62 = vpop.f32.mrb[40].mxu0 }
 0x7fe   : > { %5898 = vst [vmem:[#allocation7_spill] sm:$0xff] %v5203_v62  ;;  %v5205_v20 = vpop.f32.mrb[41].mxu0 }
 0x7ff   : > { %5899 = vst [vmem:[#allocation8_spill] sm:$0xff] %v5205_v20  ;;  %v5207_v23 = vpop.f32.mrb[42].mxu0 }
 0x800   : > { %5900 = vst [vmem:[#allocation9_spill] sm:$0xff] %v5207_v23  ;;  %v5209_v35 = vpop.f32.mrb[43].mxu0 }
 0x801   : > { %5901 = vst [vmem:[#allocation10_spill] sm:$0xff] %v5209_v35 }
 0x805   : > { %v5211_v7 = vpop.f32.mrb[44].mxu0 }
 0x806   : > { %v5213_v17 = vpop.f32.mrb[45].mxu0  ;;  %v2565_v41 = vsel %vm1502_vm5, %v5211_v7, -inf }
 0x807   : > { %v5215_v0 = vpop.f32.mrb[46].mxu0  ;;  %v2559_v15 = vsel %vm1502_vm5, %v5213_v17, -inf }
 0x808   : > { %2560 = vmax.xlane.f32.xlu0 %v2559_v15  ;;  %v5219_v27 = vpop.f32.mrb[47].mxu0  ;;  %v2568_v31 = vsel %vm1502_vm5, %v5215_v0, -inf }
 0x809   : > { %v2562_v61 = vsel %vm1502_vm5, %v5219_v27, -inf }
 0x80a   : > { %2563 = vmax.xlane.f32.xlu1 %v2562_v61 }
 0x80c   : > { %2566 = vmax.xlane.f32.xlu0 %v2565_v41 }
 0x80d   : > { %v5225_v26 = vpop.f32.mrb[48].mxu0 }
 0x80e   : > { %v5227_v16 = vpop.f32.mrb[49].mxu0  ;;  %v2577_v13 = vsel %vm1502_vm5, %v5225_v26, -inf }
 0x80f   : > { %v5229_v32 = vpop.f32.mrb[50].mxu0  ;;  %v2571_v48 = vsel %vm1502_vm5, %v5227_v16, -inf }
 0x810   : > { %2569 = vmax.xlane.f32.xlu0 %v2568_v31  ;;  %2572 = vmax.xlane.f32.xlu1 %v2571_v48  ;;  %v5235_v8 = vpop.f32.mrb[51].mxu0  ;;  %v2580_v52 = vsel %vm1502_vm5, %v5229_v32, -inf }
 0x811   : > { %v2574_v28 = vsel %vm1502_vm5, %v5235_v8, -inf }
 0x814   : > { %2578 = vmax.xlane.f32.xlu1 %v2577_v13  ;;  %2575 = vmax.xlane.f32.xlu0 %v2574_v28 }
 0x818   : > { %2581 = vmax.xlane.f32.xlu0 %v2580_v52 }
 0x895   : > { %v2561_v33 = vpop.xlane.xlu0 %2560 }
 0x896   : > { %v5246_v53 = vmax.f32 %v2561_v33, %v4847_v1 }
 0x897   : > { %v2564_v19 = vpop.xlane.xlu1 %2563 }
 0x898   : > { %v2655_v63 = vsub.f32 %v4847_v1, %v5246_v53  ;;  %v5251_v45 = vmax.f32 %v2564_v19, %v4845_v36  ;;  %2593 = vperm.xlu1 %4253, %v5246_v53  }
 0x899   : > { %v2567_v34 = vpop.xlane.xlu0 %2566 }
 0x89a   : > { %v5257_v15 = vmax.f32 %v2567_v34, %v4851_v3  ;;  %2598 = vperm.xlu0 %4254, %v5251_v45  }
 0x89c   : > { %2603 = vperm.xlu1 %4253, %v5257_v15   ;;  %v5917_v23 = vsub.f32 %v4851_v3, %v5257_v15 }
 0x89d   : > { %v2570_v41 = vpop.xlane.xlu0 %2569  ;;  %v2573_v31 = vpop.xlane.xlu1 %2572 }
 0x89e   : > { %v5264_v48 = vmax.f32 %v2570_v41, %v4849_v2  ;;  %v5267_v13 = vmax.f32 %v2573_v31, %v4855_v38  ;;  %3012 = vrot.lane.b32.xlu0 %v4791_v56, %s4529_s23  ;;  %v989_v56 = vld [vmem:[%s5876_s7 + $0x30] sm:$0xff]  ;;  %v990_v31 = vld [vmem:[%s5876_s7 + $0x38] sm:$0xff]  ;;  %v2667_v20 = vmul.f32 1.442695, %v5917_v23 }
 0x8a0   : > { %2608 = vperm.xlu1 %4253, %v5264_v48  }
 0x8a1   : > { %v2576_v33 = vpop.xlane.xlu0 %2575  ;;  %v2579_v19 = vpop.xlane.xlu1 %2578 }
 0x8a2   : > { %v5277_v34 = vmax.f32 %v2576_v33, %v4853_v4  ;;  %v5280_v41 = vmax.f32 %v2579_v19, %v4879_v59  ;;  %3016 = vrot.lane.b32.xlu0 %v4807_v24, %s4529_s23  ;;  %v1629_v24 = vsel %vm1502_vm5, %v5066_v5, 0.0  ;;  %v1635_v5 = vsel %vm1502_vm5, %v5089_v57, 0.0 }
 0x8a4   : > { %4255 = vset.pattern.permute.xlu1 %v5897_v25 }
 0x8a5   : > { %1196 = vperm.xlu1 %4255, %v989_v56   ;;  %v2582_v33 = vpop.xlane.xlu0 %2581  ;;  %v986_v56 = vld [vmem:[%s5876_s7 + $0x18] sm:$0xff] }
 0x8a6   : > { %v5293_v19 = vmax.f32 %v2582_v33, %v4877_v58  ;;  %v1623_v33 = vsel %vm1502_vm5, %v5062_v9, 0.0  ;;  %v1626_v9 = vsel %vm1502_vm5, %v5060_v50, 0.0 }
 0x8a9   : > { %4256 = vset.pattern.permute.xlu1 %v5883_v10 }
 0x8aa   : > { %2623 = vperm.xlu1 %4256, %v5280_v41  }
 0x8ae   : > { %2613 = vperm.xlu1 %4256, %v5267_v13  }
 0x8b2   : > { %2618 = vperm.xlu1 %4256, %v5277_v34  }
 0x8b6   : > { %2628 = vperm.xlu1 %4256, %v5293_v19  }
 0x8ba   : > { %4257 = vset.pattern.permute.xlu1 %v5897_v25 }
 0x8bb   : > { %1116 = vperm.xlu1 %4257, %v986_v56   ;;  %v1632_v56 = vsel %vm1502_vm5, %v5071_v47, 0.0  ;;  %v1641_v47 = vsel %vm1502_vm5, %v5077_v43, 0.0 }
 0x8bf   : > { %3014 = vrot.lane.b32.xlu1 %v4788_v54, %s4529_s23  ;;  %v1638_v54 = vsel %vm1502_vm5, %v5085_v11, 0.0 }
 0x8c1   : > { %1624 = vadd.xlane.f32.xlu0 %v1623_v33 }
 0x8c3   : > { %3018 = vrot.lane.b32.xlu1 %v4804_v22, %s4529_s23  ;;  %v1644_v22 = vsel %vm1502_vm5, %v5080_v30, 0.0 }
 0x8c5   : > { %1630 = vadd.xlane.f32.xlu0 %v1629_v24 }
 0x8c7   : > { %1201 = vperm.xlu1 %4257, %v990_v31  }
 0x8c9   : > { %1633 = vadd.xlane.f32.xlu0 %v1632_v56 }
 0x8cb   : > { %4258 = vset.pattern.permute.xlu1 %v5883_v10 }
 0x8cd   : > { %1639 = vadd.xlane.f32.xlu0 %v1638_v54 }
 0x8d1   : > { %1645 = vadd.xlane.f32.xlu0 %v1644_v22 }
 0x8eb   : > { %1627 = vadd.xlane.f32.xlu1 %v1626_v9 }
 0x8ef   : > { %1636 = vadd.xlane.f32.xlu1 %v1635_v5 }
 0x8f3   : > { %1642 = vadd.xlane.f32.xlu1 %v1641_v47 }
 0x917   : > { %v2594_v31 = vpop.permute.xlu1 %2593 }
 0x918   : > { %v2631_v11 = vsub.f32 %v5213_v17, %v2594_v31 }
 0x919   : > { %v2599_v24 = vpop.permute.xlu0 %2598 }
 0x91a   : > { %v2639_v33 = vmul.f32 1.442695, %v2631_v11  ;;  %v2632_v30 = vsub.f32 %v5219_v27, %v2599_v24 }
 0x91b   : > { %v2604_v56 = vpop.permute.xlu1 %2603 }
 0x91c   : > { %v2641_v54 = vmul.f32 1.442695, %v2632_v30  ;;  %v2633_v50 = vsub.f32 %v5211_v7, %v2604_v56  ;;  %4367 = vpow2.f32 %v2639_v33 }
 0x91e   : > { %4369 = vpow2.f32 %v2641_v54  ;;  %v2643_v22 = vmul.f32 1.442695, %v2633_v50 }
 0x91f   : > { %v2609_v57 = vpop.permute.xlu1 %2608 }
 0x920   : > { %4371 = vpow2.f32 %v2643_v22  ;;  %v2634_v9 = vsub.f32 %v5215_v0, %v2609_v57 }
 0x922   : > { %v2645_v43 = vmul.f32 1.442695, %v2634_v9 }
 0x924   : > { %4373 = vpow2.f32 %v2645_v43  ;;  %v1197_v5 = vpop.permute.xlu1 %1196 }
 0x925   : > { %v1263_v17 = vadd.f32 %v4864_v51, %v1197_v5 }
 0x926   : > { %v4368_v47 = vpop.eup %4367 }
 0x927   : > { %v2470_v31 = vpack.c.bf16 %v1263_v17, %v1263_v17  ;;  %v2679_v50 = vsel %vm1502_vm5, %v4368_v47, 0.0 }
 0x928   : > { %v4370_v11 = vpop.eup %4369 }
 0x929   : > { %4201 = vmatprep.subr.msk.bf16.mxu0 %vm1502_vm5, %v2470_v31  ;;  %v2624_v27 = vpop.permute.xlu1 %2623  ;;  %v2816_v7 = vsel %vm1502_vm5, %v2470_v31, 0  ;;  %v2719_v24 = vpack.c.bf16 %v4370_v11, %v4368_v47  ;;  %v2682_v17 = vsel %vm1502_vm5, %v4370_v11, 0.0 }
 0x92a   : > { %v4372_v33 = vpop.eup %4371  ;;  %4095 = vmatpush3.bf16.xpose.msra.mxu0 %v2816_v7  ;;  %v2637_v9 = vsub.f32 %v5225_v26, %v2624_v27 }
 0x92b   : > { %4096 = vmatprep.mubr.msk.bf16.mxu0 %vm1502_vm5, %v2719_v24  ;;  %v2685_v0 = vsel %vm1502_vm5, %v4372_v33, 0.0 }
 0x92c   : > { %2686 = vadd.xlane.f32.xlu1 %v2685_v0 }
 0x92d   : > { %v2614_v30 = vpop.permute.xlu1 %2613 }
 0x92e   : > { %v4374_v56 = vpop.eup %4373  ;;  %v2635_v51 = vsub.f32 %v5227_v16, %v2614_v30  ;;  %v2651_v16 = vmul.f32 1.442695, %v2637_v9  ;;  %v5903_v9 = vsub.f32 %v4851_v3, %v4965_v60  ;;  %v5905_v60 = vsub.f32 %v4853_v4, %v4986_v29 }
 0x92f   : > { %v2720_v54 = vpack.c.bf16 %v4374_v56, %v4372_v33  ;;  %v2688_v22 = vsel %vm1502_vm5, %v4374_v56, 0.0 }
 0x930   : > { %v2647_v57 = vmul.f32 1.442695, %v2635_v51  ;;  %2680 = vadd.xlane.f32.xlu1 %v2679_v50  ;;  %2689 = vadd.xlane.f32.xlu0 %v2688_v22 }
 0x931   : > { %4097 = vmatmul.mubr.msk.bf16.vlgmr.msra.gmra.mrb[52].mxu0 %vm1502_vm5, %v2720_v54  ;;  %v2619_v43 = vpop.permute.xlu1 %2618 }
 0x932   : > { %4375 = vpow2.f32 %v2647_v57  ;;  %v2636_v5 = vsub.f32 %v5235_v8, %v2619_v43  ;;  %v1611_v43 = vmul.f32 1.442695, %v5903_v9 }
 0x934   : > { %v2649_v31 = vmul.f32 1.442695, %v2636_v5  ;;  %2683 = vadd.xlane.f32.xlu0 %v2682_v17  ;;  %v3013_v5 = vpop.permute.xlu0 %3012 }
 0x935   : > { %v2629_v7 = vpop.permute.xlu1 %2628 }
 0x936   : > { %4377 = vpow2.f32 %v2649_v31  ;;  %v2638_v47 = vsub.f32 %v5229_v32, %v2629_v7  ;;  %v5902_v32 = vsub.f32 %v4847_v1, %v4955_v46 }
 0x937   : > { %4379 = vpow2.f32 %v2651_v16  ;;  %v5904_v16 = vsub.f32 %v4849_v2, %v4972_v14 }
 0x938   : > { %v2653_v24 = vmul.f32 1.442695, %v2638_v47  ;;  %v1607_v51 = vmul.f32 1.442695, %v5902_v32 }
 0x939   : > { %v1613_v7 = vmul.f32 1.442695, %v5904_v16 }
 0x93a   : > { %4381 = vpow2.f32 %v2653_v24  ;;  %v1117_v33 = vpop.permute.xlu1 %1116  ;;  %v3017_v24 = vpop.permute.xlu0 %3016 }
 0x93b   : > { %v1181_v26 = vadd.f32 %v4859_v44, %v1117_v33  ;;  %4383 = vpow2.f32 %v1607_v51  ;;  %v1617_v33 = vmul.f32 1.442695, %v5905_v60 }
 0x93c   : > { %v4376_v27 = vpop.eup %4375  ;;  %4385 = vpow2.f32 %v1611_v43 }
 0x93d   : > { %v3010_v0 = vpack.c.bf16 %v1181_v26, %v1181_v26  ;;  %v2691_v30 = vsel %vm1502_vm5, %v4376_v27, 0.0  ;;  %4387 = vpow2.f32 %v1613_v7 }
 0x93e   : > { %2692 = vadd.xlane.f32.xlu1 %v2691_v30  ;;  %v3015_v8 = vpop.permute.xlu1 %3014  ;;  %4389 = vpow2.f32 %v1617_v33 }
 0x93f   : > { %4206 = vmatprep.subr.msk.bf16.mxu0 %vm664_vm1, %v3010_v0  ;;  %v3033_v11 = vsel %vm664_vm1, %v3010_v0, 0 }
 0x940   : > { %v4378_v56 = vpop.eup %4377  ;;  %4117 = vmatpush3.bf16.msra.mxu0 %v3033_v11 }
 0x941   : > { %v2694_v54 = vsel %vm1502_vm5, %v4378_v56, 0.0  ;;  %v2721_v50 = vpack.c.bf16 %v4378_v56, %v4376_v27  ;;  %v5355_v22 = vpop.eup %4379 }
 0x942   : > { %2695 = vadd.xlane.f32.xlu0 %v2694_v54  ;;  %v3019_v44 = vpop.permute.xlu1 %3018 }
 0x943   : > { %4100 = vmatprep.mubr.msk.bf16.mxu0 %vm1502_vm5, %v2721_v50 }
 0x944   : > { %v5358_v57 = vpop.eup %4381 }
 0x945   : > { %v2722_v46 = vpack.c.bf16 %v5358_v57, %v5355_v22  ;;  %v5375_v26 = vpop.eup %4383 }
 0x946   : > { %v1202_v17 = vpop.permute.xlu1 %1201  ;;  %v5383_v0 = vpop.eup %4385 }
 0x947   : > { %v1266_v31 = vadd.f32 %v4871_v55, %v1202_v17  ;;  %4101 = vmatmul.mubr.msk.bf16.gmra.mrb[56].mxu0 %vm1502_vm5, %v2722_v46  ;;  %v5388_v11 = vpop.eup %4387 }
 0x948   : > { %4118 = vmatprep.mubr.msk.bf16.mxu0 %vm1421_vm4, %v3013_v5 }
 0x949   : > { %v3011_v47 = vpack.c.bf16 %v1266_v31, %v1266_v31 }
 0x94b   : > { %4207 = vmatprep.subr.msk.bf16.mxu0 %vm1502_vm5, %v3011_v47  ;;  %v3357_v14 = vsel %vm1502_vm5, %v3011_v47, 0 }
 0x94e   : > { %v1625_v55 = vpop.xlane.xlu0 %1624 }
 0x94f   : > { %v5378_v27 = vadd.f32 %v5375_v26, %v1625_v55  ;;  %4119 = vmatmul.mubr.msk.bf16.vlgmr.msra.gmra.mrb[60].mxu0 %vm1421_vm4, %v3015_v8  ;;  %v5394_v8 = vpop.eup %4389 }
 0x950   : > { %4127 = vmatpush3.bf16.xpose.msra.mxu0 %v3357_v14  ;;  %4122 = vmatprep.mubr.msk.bf16.mxu0 %vm1421_vm4, %v3017_v24  ;;  %v2663_v14 = vmul.f32 1.442695, %v2655_v63  ;;  %v5885_v63 = vmov 3  }
 0x951   : > { %4260 = vset.pattern.permute.xlu0 %v5885_v63 }
 0x952   : > { %v1631_v30 = vpop.xlane.xlu0 %1630  ;;  %4391 = vpow2.f32 %v2663_v14  ;;  %v2697_v14 = vsel %vm1502_vm5, %v5355_v22, 0.0 }
 0x953   : > { %v5386_v29 = vadd.f32 %v5383_v0, %v1631_v30  ;;  %4393 = vpow2.f32 %v2667_v20  ;;  %v5919_v20 = vsub.f32 %v4879_v59, %v5280_v41  ;;  %v5923_v41 = vmov 3  }
 0x956   : > { %v1634_v56 = vpop.xlane.xlu0 %1633 }
 0x957   : > { %v5391_v32 = vadd.f32 %v5388_v11, %v1634_v56  ;;  %4123 = vmatmul.mubr.msk.bf16.gmra.mrb[64].mxu0 %vm1421_vm4, %v3019_v44 }
 0x95a   : > { %v1640_v51 = vpop.xlane.xlu0 %1639 }
 0x95b   : > { %v5397_v54 = vadd.f32 %v5394_v8, %v1640_v51 }
 0x95c   : > { %v5447_v39 = vpop.eup %4391 }
 0x95e   : > { %v5461_v52 = vpop.xlane.xlu0 %1645 }
 0xa04   : > { %v5399_v50 = vpop.f32.mrb[52].mxu0 }
 0xa05   : > { %5906 = vst [vmem:[#allocation11_spill] sm:$0xff] %v5399_v50  ;;  %v5401_v9 = vpop.f32.mrb[53].mxu0  ;;  %v5918_v50 = vsub.f32 %v4849_v2, %v5264_v48  ;;  %v2675_v48 = vmul.f32 1.442695, %v5919_v20 }
 0xa06   : > { %5907 = vst [vmem:[#allocation12_spill] sm:$0xff] %v5401_v9  ;;  %v5403_v43 = vpop.f32.mrb[54].mxu0 }
 0xa07   : > { %5908 = vst [vmem:[#allocation13_spill] sm:$0xff] %v5403_v43  ;;  %v5405_v5 = vpop.f32.mrb[55].mxu0  ;;  %v2669_v43 = vmul.f32 1.442695, %v5918_v50 }
 0xa08   : > { %5909 = vst [vmem:[#allocation14_spill] sm:$0xff] %v5405_v5  ;;  %v2700_v5 = vsel %vm1502_vm5, %v5358_v57, 0.0 }
 0xa09   : > { %4395 = vpow2.f32 %v2669_v43  ;;  %v5514_v43 = vpop.eup %4393 }
 0xa0a   : > { %4397 = vpow2.f32 %v2675_v48  ;;  %v5925_v48 = vsub.f32 %v4855_v38, %v5267_v13  ;;  %v5928_v13 = vsub.f32 %v4845_v36, %v4960_v49  ;;  %v5929_v49 = vsub.f32 %v4877_v58, %v5293_v19 }
 0xa13   : > { %v5523_v15 = vpop.eup %4395 }
 0xa14   : > { %5921 = vst [vmem:[#allocation22_spill] sm:$0xff] %v5523_v15 }
 0xa1a   : > { %v5407_v46 = vpop.f32.mrb[56].mxu0 }
 0xa1b   : > { %5910 = vst [vmem:[#allocation15_spill] sm:$0xff] %v5407_v46  ;;  %v5409_v17 = vpop.f32.mrb[57].mxu0 }
 0xa1c   : > { %5911 = vst [vmem:[#allocation16_spill] sm:$0xff] %v5409_v17  ;;  %v5411_v31 = vpop.f32.mrb[58].mxu0 }
 0xa1d   : > { %5912 = vst [vmem:[#allocation17_spill] sm:$0xff] %v5411_v31  ;;  %v5413_v44 = vpop.f32.mrb[59].mxu0 }
 0xa1e   : > { %5913 = vst [vmem:[#allocation18_spill] sm:$0xff] %v5413_v44 }
 0xa22   : > { %v5415_v16 = vpop.f32.mrb[60].mxu0 }
 0xa23   : > { %v5417_v7 = vpop.f32.mrb[61].mxu0  ;;  %v3106_v47 = vsel %vm1502_vm5, %v5415_v16, -inf }
 0xa24   : > { %3107 = vmax.xlane.f32.xlu0 %v3106_v47  ;;  %v5421_v24 = vpop.f32.mrb[62].mxu0  ;;  %v3100_v55 = vsel %vm1502_vm5, %v5417_v7, -inf }
 0xa25   : > { %v5423_v60 = vpop.f32.mrb[63].mxu0  ;;  %v3109_v51 = vsel %vm1502_vm5, %v5421_v24, -inf }
 0xa26   : > { %v3103_v33 = vsel %vm1502_vm5, %v5423_v60, -inf }
 0xa27   : > { %3104 = vmax.xlane.f32.xlu1 %v3103_v33 }
 0xa28   : > { %3101 = vmax.xlane.f32.xlu0 %v3100_v55 }
 0xa2a   : > { %v5432_v30 = vpop.f32.mrb[64].mxu0 }
 0xa2b   : > { %v5434_v56 = vpop.f32.mrb[65].mxu0 }
 0xa2c   : > { %3110 = vmax.xlane.f32.xlu0 %v3109_v51  ;;  %v5438_v47 = vpop.f32.mrb[66].mxu0  ;;  %v3118_v51 = vsel %vm1502_vm5, %v5432_v30, -inf }
 0xa2d   : > { %v5440_v33 = vpop.f32.mrb[67].mxu0  ;;  %v3121_v55 = vsel %vm1502_vm5, %v5438_v47, -inf }
 0xa2e   : > { %v3115_v53 = vsel %vm1502_vm5, %v5440_v33, -inf }
 0xa30   : > { %3122 = vmax.xlane.f32.xlu0 %v3121_v55  ;;  %v3112_v55 = vsel %vm1502_vm5, %v5434_v56, -inf }
 0xa34   : > { %3116 = vmax.xlane.f32.xlu0 %v3115_v53  ;;  %v5457_v53 = vpop.xlane.xlu1 %1627 }
 0xa38   : > { %2725 = vperm.xlu1 %4258, %v5447_v39   ;;  %v5459_v10 = vpop.xlane.xlu1 %1636 }
 0xa3c   : > { %4259 = vset.pattern.permute.xlu1 %v5885_v63  ;;  %v5463_v28 = vpop.xlane.xlu1 %1642  ;;  %v5465_v63 = vpop.xlane.xlu0 %2689 }
 0xa3d   : > { %5914 = vst [vmem:[#allocation19_spill] sm:$0xff] %v5465_v63 }
 0xa40   : > { %v5467_v22 = vpop.xlane.xlu1 %2686 }
 0xa44   : > { %v5471_v61 = vpop.xlane.xlu1 %2680 }
 0xa48   : > { %v5475_v35 = vpop.xlane.xlu1 %2692 }
 0xa49   : > { %5916 = vst [vmem:[#allocation21_spill] sm:$0xff] %v5475_v35  ;;  %v2671_v35 = vmul.f32 1.442695, %v5925_v48 }
 0xa5c   : > { %2698 = vadd.xlane.f32.xlu1 %v2697_v14  ;;  %v5469_v14 = vpop.xlane.xlu0 %2683 }
 0xa5d   : > { %5915 = vst [vmem:[#allocation20_spill] sm:$0xff] %v5469_v14 }
 0xa60   : > { %3119 = vmax.xlane.f32.xlu1 %v3118_v51  ;;  %v5473_v51 = vpop.xlane.xlu0 %2695 }
 0xa64   : > { %3113 = vmax.xlane.f32.xlu1 %v3112_v55 }
 0xab1   : > { %v3108_v55 = vpop.xlane.xlu0 %3107 }
 0xab2   : > { %v5481_v62 = vmax.f32 %v3108_v55, %v4851_v3 }
 0xab4   : > { %3144 = vperm.xlu1 %4259, %v5481_v62   ;;  %v3105_v31 = vpop.xlane.xlu1 %3104 }
 0xab5   : > { %v5487_v17 = vmax.f32 %v3105_v31, %v4845_v36  ;;  %v3102_v44 = vpop.xlane.xlu0 %3101 }
 0xab6   : > { %v5493_v23 = vmax.f32 %v3102_v44, %v4847_v1  ;;  %v5920_v44 = vmov 2  }
 0xab7   : > { %3139 = vperm.xlu0 %4260, %v5487_v17  }
 0xab8   : > { %3134 = vperm.xlu1 %4259, %v5493_v23   ;;  %v5543_v63 = vpop.permute.xlu1 %2725 }
 0xab9   : > { %v3111_v31 = vpop.xlane.xlu0 %3110 }
 0xaba   : > { %v5505_v50 = vmax.f32 %v3111_v31, %v4849_v2 }
 0xabb   : > { %4261 = vset.pattern.permute.xlu0 %v5920_v44 }
 0xabc   : > { %3149 = vperm.xlu1 %4259, %v5505_v50  }
 0xabd   : > { %v3123_v46 = vpop.xlane.xlu0 %3122 }
 0xabe   : > { %v5512_v55 = vmax.f32 %v3123_v46, %v4877_v58  ;;  %v5528_v46 = vpop.eup %4397 }
 0xabf   : > { %5922 = vst [vmem:[#allocation23_spill] sm:$0xff] %v5528_v46 }
 0xac0   : > { %4262 = vset.pattern.permute.xlu1 %v5920_v44 }
 0xac1   : > { %2735 = vperm.xlu1 %4262, %v5514_v43   ;;  %v3117_v31 = vpop.xlane.xlu0 %3116 }
 0xac2   : > { %v5521_v20 = vmax.f32 %v3117_v31, %v4853_v4  ;;  %v5924_v31 = vsub.f32 %v4845_v36, %v5251_v45  ;;  %v5927_v45 = vsub.f32 %v4879_v59, %v4983_v12 }
 0xac4   : > { %v2665_v9 = vmul.f32 1.442695, %v5924_v31 }
 0xac5   : > { %2740 = vperm.xlu1 %4262, %v5523_v15   ;;  %v5926_v15 = vsub.f32 %v4853_v4, %v5277_v34 }
 0xac6   : > { %4399 = vpow2.f32 %v2665_v9  ;;  %v1619_v9 = vmul.f32 1.442695, %v5927_v45 }
 0xac7   : > { %4401 = vpow2.f32 %v2671_v35 }
 0xac9   : > { %2755 = vperm.xlu1 %4262, %v5528_v46   ;;  %v2673_v46 = vmul.f32 1.442695, %v5926_v15 }
 0xacb   : > { %4403 = vpow2.f32 %v2673_v46  ;;  %v2677_v46 = vmul.f32 1.442695, %v5929_v49 }
 0xacc   : > { %4405 = vpow2.f32 %v1619_v9 }
 0xacd   : > { %4263 = vset.pattern.permute.xlu1 %v5923_v41 }
 0xad0   : > { %v5547_v57 = vpop.eup %4399 }
 0xad1   : > { %v5559_v15 = vpop.eup %4401 }
 0xad5   : > { %v5572_v45 = vpop.eup %4403 }
 0xad6   : > { %2701 = vadd.xlane.f32.xlu0 %v2700_v5  ;;  %v1609_v5 = vmul.f32 1.442695, %v5928_v13  ;;  %v4406_v9 = vpop.eup %4405 }
 0xad8   : > { %4407 = vpow2.f32 %v1609_v5 }
 0xad9   : > { %4409 = vrcp.f32 %v5378_v27  ;;  %v1653_v27 = vadd.f32 %v4406_v9, %v5463_v28 }
 0xada   : > { %4411 = vpow2.f32 %v2677_v46 }
 0xadb   : > { %4413 = vrcp.f32 %v5397_v54 }
 0xadc   : > { %4415 = vrcp.f32 %v1653_v27  ;;  %v5933_v27 = vsub.f32 %v4851_v3, %v5481_v62 }
 0xae2   : > { %v4408_v19 = vpop.eup %4407 }
 0xae3   : > { %v1648_v13 = vadd.f32 %v4408_v19, %v5457_v53  ;;  %v4410_v5 = vpop.eup %4409 }
 0xae4   : > { %v5586_v49 = vpop.eup %4411 }
 0xae5   : > { %4417 = vrcp.f32 %v1648_v13  ;;  %v4414_v28 = vpop.eup %4413 }
 0xae9   : > { %v5545_v14 = vpop.xlane.xlu1 %2698 }
 0xaec   : > { %2730 = vperm.xlu0 %4261, %v5547_v57  }
 0xaed   : > { %v3120_v35 = vpop.xlane.xlu1 %3119 }
 0xaee   : > { %v5557_v34 = vmax.f32 %v3120_v35, %v4879_v59  ;;  %v5930_v35 = vsub.f32 %v4847_v1, %v5493_v23  ;;  %v4416_v1 = vpop.eup %4415 }
 0xaef   : > { %v4418_v53 = vpop.eup %4417 }
 0xaf0   : > { %v3202_v48 = vsub.f32 %v4879_v59, %v5557_v34  ;;  %2745 = vperm.xlu0 %4261, %v5559_v15   ;;  %3164 = vperm.xlu1 %4263, %v5557_v34  }
 0xaf1   : > { %v3114_v12 = vpop.xlane.xlu1 %3113 }
 0xaf2   : > { %v5570_v31 = vmax.f32 %v3114_v12, %v4855_v38  ;;  %v3204_v12 = vmul.f32 1.442695, %v5930_v35  ;;  %v5935_v35 = vsub.f32 %v4845_v36, %v5487_v17 }
 0xaf4   : > { %2750 = vperm.xlu0 %4261, %v5572_v45   ;;  %3154 = vperm.xlu1 %4263, %v5570_v31   ;;  %4419 = vpow2.f32 %v3204_v12 }
 0xaf5   : > { %4421 = vrcp.f32 %v5386_v29 }
 0xaf8   : > { %4265 = vset.pattern.permute.xlu0 %v5897_v25  ;;  %3169 = vperm.xlu1 %4263, %v5512_v55  }
 0xaf9   : > { %1669 = vperm.xlu0 %4265, %v5375_v26   ;;  %v5931_v26 = vsub.f32 %v4855_v38, %v4975_v18 }
 0xafb   : > { %v1615_v54 = vmul.f32 1.442695, %v5931_v26 }
 0xafc   : > { %3159 = vperm.xlu1 %4263, %v5521_v20  }
 0xafd   : > { %1801 = vperm.xlu0 %4265, %v4410_v5   ;;  %4423 = vpow2.f32 %v1615_v54 }
 0xafe   : > { %4425 = vrcp.f32 %v5391_v32  ;;  %v5932_v32 = vsub.f32 %v4877_v58, %v4994_v42  ;;  %v3206_v42 = vmul.f32 1.442695, %v5935_v35 }
 0xb00   : > { %4264 = vset.pattern.permute.xlu1 %v5920_v44 }
 0xb01   : > { %1679 = vperm.xlu0 %4265, %v5383_v0   ;;  %2760 = vperm.xlu1 %4264, %v5586_v49   ;;  %v5597_v0 = vpop.eup %4419 }
 0xb02   : > { %v4422_v18 = vpop.eup %4421 }
 0xb05   : > { %1826 = vperm.xlu0 %4265, %v4414_v28   ;;  %4266 = vset.pattern.permute.xlu1 %v5897_v25 }
 0xb06   : > { %1674 = vperm.xlu1 %4266, %v4408_v19   ;;  %v1621_v19 = vmul.f32 1.442695, %v5932_v32 }
 0xb07   : > { %v4424_v23 = vpop.eup %4423 }
 0xb08   : > { %v1651_v29 = vadd.f32 %v4424_v23, %v5459_v10  ;;  %v4426_v46 = vpop.eup %4425  ;;  %v5934_v10 = vsub.f32 %v4849_v2, %v5505_v50 }
 0xb09   : > { %1831 = vperm.xlu0 %4265, %v4416_v1  }
 0xb0a   : > { %1806 = vperm.xlu1 %4266, %v4418_v53   ;;  %4427 = vrcp.f32 %v1651_v29  ;;  %v3210_v5 = vmul.f32 1.442695, %v5934_v10 }
 0xb0b   : > { %4429 = vpow2.f32 %v1621_v19 }
 0xb0d   : > { %4268 = vset.pattern.permute.xlu0 %v5923_v41 }
 0xb0e   : > { %3266 = vperm.xlu0 %4268, %v5597_v0   ;;  %1684 = vperm.xlu1 %4266, %v5388_v11   ;;  %v3208_v11 = vmul.f32 1.442695, %v5933_v27 }
 0xb10   : > { %4431 = vpow2.f32 %v3208_v11 }
 0xb11   : > { %4433 = vpow2.f32 %v3210_v5 }
 0xb12   : > { %1811 = vperm.xlu1 %4266, %v4422_v18   ;;  %4435 = vpow2.f32 %v3206_v42 }
 0xb14   : > { %v4428_v13 = vpop.eup %4427 }
 0xb15   : > { %v4430_v12 = vpop.eup %4429 }
 0xb16   : > { %1816 = vperm.xlu1 %4266, %v4426_v46  }
 0xb1a   : > { %1689 = vperm.xlu1 %4266, %v4424_v23   ;;  %v5618_v62 = vpop.eup %4431 }
 0xb1b   : > { %v5622_v2 = vpop.eup %4433 }
 0xb1c   : > { %v5626_v17 = vpop.eup %4435 }
 0xb1e   : > { %1694 = vperm.xlu1 %4266, %v5394_v8   ;;  %v3200_v8 = vsub.f32 %v4855_v38, %v5570_v31 }
 0xb20   : > { %v3212_v3 = vmul.f32 1.442695, %v3200_v8  ;;  %v1654_v8 = vadd.f32 %v4430_v12, %v5461_v52 }
 0xb22   : > { %1821 = vperm.xlu1 %4266, %v4428_v13   ;;  %4437 = vpow2.f32 %v3212_v3 }
 0xb26   : > { %1699 = vperm.xlu1 %4266, %v4406_v9  }
 0xb2a   : > { %1704 = vperm.xlu1 %4266, %v4430_v12  }
 0xb2c   : > { %v5631_v1 = vpop.eup %4437 }
 0xb2e   : > { %4267 = vset.pattern.permute.xlu1 %v5923_v41 }
 0xb2f   : > { %3276 = vperm.xlu1 %4267, %v5618_v62  }
 0xb33   : > { %v3145_v50 = vpop.permute.xlu1 %3144  ;;  %3281 = vperm.xlu1 %4267, %v5622_v2  }
 0xb34   : > { %v3174_v36 = vsub.f32 %v5415_v16, %v3145_v50 }
 0xb36   : > { %v3184_v38 = vmul.f32 1.442695, %v3174_v36  ;;  %v3140_v31 = vpop.permute.xlu0 %3139 }
 0xb37   : > { %v3173_v9 = vsub.f32 %v5423_v60, %v3140_v31  ;;  %v3135_v28 = vpop.permute.xlu1 %3134  ;;  %3271 = vperm.xlu1 %4267, %v5626_v17  }
 0xb38   : > { %4439 = vpow2.f32 %v3184_v38  ;;  %v3172_v26 = vsub.f32 %v5417_v7, %v3135_v28 }
 0xb39   : > { %v3182_v54 = vmul.f32 1.442695, %v3173_v9 }
 0xb3a   : > { %v3180_v53 = vmul.f32 1.442695, %v3172_v26 }
 0xb3b   : > { %4441 = vpow2.f32 %v3182_v54  ;;  %v3150_v18 = vpop.permute.xlu1 %3149  ;;  %3286 = vperm.xlu1 %4267, %v5631_v1  }
 0xb3c   : > { %4443 = vpow2.f32 %v3180_v53  ;;  %v3175_v16 = vsub.f32 %v5421_v24, %v3150_v18  ;;  %v5936_v24 = vsub.f32 %v4853_v4, %v5521_v20  ;;  %v3216_v20 = vmul.f32 1.442695, %v3202_v48 }
 0xb3e   : > { %v3186_v23 = vmul.f32 1.442695, %v3175_v16  ;;  %v3214_v13 = vmul.f32 1.442695, %v5936_v24 }
 0xb3f   : > { %4269 = vset.pattern.permute.xlu1 %v5897_v25 }
 0xb40   : > { %4445 = vpow2.f32 %v3186_v23  ;;  %v5647_v35 = vpop.permute.xlu1 %2735 }
 0xb41   : > { %4447 = vpow2.f32 %v3214_v13 }
 0xb42   : > { %v4440_v60 = vpop.eup %4439  ;;  %4449 = vrcp.f32 %v1654_v8 }
 0xb43   : > { %v3226_v29 = vsel %vm1502_vm5, %v4440_v60, 0.0  ;;  %4451 = vpow2.f32 %v3216_v20 }
 0xb44   : > { %3227 = vadd.xlane.f32.xlu0 %v3226_v29  ;;  %v5651_v3 = vpop.permute.xlu1 %2740 }
 0xb45   : > { %v4442_v7 = vpop.eup %4441 }
 0xb46   : > { %v4444_v46 = vpop.eup %4443  ;;  %v3223_v32 = vsel %vm1502_vm5, %v4442_v7, 0.0 }
 0xb47   : > { %v3260_v19 = vpack.c.bf16 %v4442_v7, %v4444_v46  ;;  %v3220_v5 = vsel %vm1502_vm5, %v4444_v46, 0.0 }
 0xb48   : > { %3224 = vadd.xlane.f32.xlu0 %v3223_v32  ;;  %v5658_v50 = vpop.permute.xlu1 %2755 }
 0xb49   : > { %4128 = vmatprep.mubr.msk.bf16.mxu0 %vm1502_vm5, %v3260_v19 }
 0xb4a   : > { %v4446_v27 = vpop.eup %4445 }
 0xb4b   : > { %v3261_v11 = vpack.c.bf16 %v4446_v27, %v4440_v60  ;;  %v5643_v10 = vpop.eup %4447  ;;  %v3229_v42 = vsel %vm1502_vm5, %v4446_v27, 0.0 }
 0xb4c   : > { %v4450_v31 = vpop.eup %4449 }
 0xb4d   : > { %4129 = vmatmul.mubr.msk.bf16.vlgmr.msra.gmra.mrb[68].mxu0 %vm1502_vm5, %v3261_v11  ;;  %v5666_v53 = vpop.eup %4451 }
 0xb5e   : > { %3291 = vperm.xlu0 %4268, %v5643_v10  }
 0xb5f   : > { %3221 = vadd.xlane.f32.xlu1 %v3220_v5 }
 0xb63   : > { %3230 = vadd.xlane.f32.xlu1 %v3229_v42  ;;  %v5653_v4 = vpop.xlane.xlu0 %2701 }
 0xb6b   : > { %v5660_v36 = vpop.permute.xlu0 %2730 }
 0xb6f   : > { %v3165_v38 = vpop.permute.xlu1 %3164  ;;  %v5662_v9 = vpop.permute.xlu0 %2745 }
 0xb70   : > { %v3178_v52 = vsub.f32 %v5432_v30, %v3165_v38 }
 0xb72   : > { %v3192_v28 = vmul.f32 1.442695, %v3178_v52 }
 0xb73   : > { %v3155_v12 = vpop.permute.xlu1 %3154  ;;  %v5670_v34 = vpop.permute.xlu0 %2750 }
 0xb74   : > { %1836 = vperm.xlu1 %4269, %v4450_v31   ;;  %v3176_v26 = vsub.f32 %v5434_v56, %v3155_v12  ;;  %4453 = vpow2.f32 %v3192_v28 }
 0xb76   : > { %v3188_v18 = vmul.f32 1.442695, %v3176_v26 }
 0xb77   : > { %v3170_v54 = vpop.permute.xlu1 %3169 }
 0xb78   : > { %v3179_v59 = vsub.f32 %v5438_v47, %v3170_v54  ;;  %4270 = vset.pattern.permute.xlu1 %v5923_v41  ;;  %v1670_v23 = vpop.permute.xlu0 %1669 }
 0xb79   : > { %3296 = vperm.xlu1 %4270, %v5666_v53   ;;  %v1711_v60 = vmul.f32 %v4776_v37, %v1670_v23 }
 0xb7a   : > { %v3194_v48 = vmul.f32 1.442695, %v3179_v59  ;;  %v5937_v59 = vsub.f32 %v4877_v58, %v5512_v55 }
 0xb7b   : > { %v3160_v30 = vpop.permute.xlu1 %3159  ;;  %v1769_v32 = vadd.f32 %v5147_v6, %v1711_v60 }
 0xb7c   : > { %4455 = vpow2.f32 %v3194_v48  ;;  %v3177_v16 = vsub.f32 %v5440_v33, %v3160_v30  ;;  %v1802_v27 = vpop.permute.xlu0 %1801  ;;  %v3218_v48 = vmul.f32 1.442695, %v5937_v59  ;;  %v5938_v30 = vld [vmem:[#allocation2_spill] sm:$0xff] }
 0xb7d   : > { %4271 = vset.pattern.permute.xlu1 %v5920_v44  ;;  %4457 = vpow2.f32 %v3188_v18  ;;  %v1839_v8 = vmul.f32 %v1802_v27, %v1769_v32 }
 0xb7e   : > { %v3190_v56 = vmul.f32 1.442695, %v3177_v16  ;;  %v4454_v29 = vpop.eup %4453 }
 0xb80   : > { %4459 = vpow2.f32 %v3190_v56  ;;  %v5675_v47 = vpop.permute.xlu1 %2760  ;;  %v1680_v6 = vpop.permute.xlu0 %1679 }
 0xb81   : > { %v1713_v28 = vmul.f32 %v4776_v37, %v1680_v6  ;;  %4461 = vpow2.f32 %v3218_v48  ;;  %v2770_v48 = vmul.f32 %v5675_v47, %v4776_v37 }
 0xb83   : > { %v1777_v18 = vadd.f32 %v5144_v21, %v1713_v28  ;;  %v3238_v21 = vsel %vm1502_vm5, %v4454_v29, 0.0 }
 0xb85   : > { %v1675_v7 = vpop.permute.xlu1 %1674 }
 0xb86   : > { %v4456_v46 = vpop.eup %4455  ;;  %v1712_v19 = vmul.f32 %v4776_v37, %v1675_v7 }
 0xb87   : > { %v3241_v33 = vsel %vm1502_vm5, %v4456_v46, 0.0  ;;  %v3263_v11 = vpack.c.bf16 %v4456_v46, %v4454_v29  ;;  %v4458_v13 = vpop.eup %4457 }
 0xb88   : > { %3242 = vadd.xlane.f32.xlu0 %v3241_v33  ;;  %v1772_v24 = vadd.f32 %v5151_v40, %v1712_v19  ;;  %v2705_v19 = vadd.f32 %v5514_v43, %v5467_v22  ;;  %v5939_v33 = vld [vmem:[#allocation6_spill] sm:$0xff]  ;;  %v2703_v43 = vadd.f32 %v5447_v39, %v5471_v61 }
 0xb89   : > { %v1807_v5 = vpop.permute.xlu1 %1806 }
 0xb8a   : > { %v4460_v42 = vpop.eup %4459  ;;  %v1840_v20 = vmul.f32 %v1807_v5, %v1772_v24  ;;  %4463 = vrcp.f32 %v2705_v19  ;;  %v3232_v24 = vsel %vm1502_vm5, %v4458_v13, 0.0  ;;  %v5940_v5 = vld [vmem:[#allocation4_spill] sm:$0xff] }
 0xb8b   : > { %v3235_v38 = vsel %vm1502_vm5, %v4460_v42, 0.0  ;;  %v3262_v31 = vpack.c.bf16 %v4460_v42, %v4458_v13  ;;  %v2763_v13 = vmul.f32 %v5543_v63, %v4776_v37  ;;  %4465 = vrcp.f32 %v2703_v43 }
 0xb8c   : > { %v1847_v52 = vpack.c.bf16 %v1840_v20, %v1839_v8  ;;  %3236 = vadd.xlane.f32.xlu0 %v3235_v38  ;;  %v5704_v8 = vpop.eup %4461  ;;  %v1827_v20 = vpop.permute.xlu0 %1826  ;;  %v2710_v63 = vadd.f32 %v5586_v49, %v5653_v4  ;;  %v5944_v49 = vld [vmem:[#allocation21_spill] sm:$0xff]  ;;  %v2764_v4 = vmul.f32 %v5660_v36, %v4776_v37 }
 0xb8d   : > { %4132 = vmatprep.mubr.msk.bf16.mxu0 %vm1502_vm5, %v3262_v31  ;;  %v1685_v12 = vpop.permute.xlu1 %1684  ;;  %v2708_v31 = vadd.f32 %v5572_v45, %v5473_v51  ;;  %v2766_v51 = vmul.f32 %v5651_v3, %v4776_v37  ;;  %v5942_v45 = vld [vmem:[#allocation19_spill] sm:$0xff]  ;;  %v2707_v3 = vadd.f32 %v5559_v15, %v5944_v49  ;;  %v2765_v15 = vmul.f32 %v5647_v35, %v4776_v37 }
 0xb8e   : > { %4196 = vmatprep.subr.msk.bf16.mxu1 %vm1421_vm4, %v1847_v52  ;;  %4133 = vmatmul.mubr.msk.bf16.gmra.mrb[72].mxu0 %vm1502_vm5, %v3263_v11  ;;  %v2409_v40 = vsel %vm1421_vm4, %v1847_v52, 0  ;;  %v1714_v26 = vmul.f32 %v4776_v37, %v1685_v12  ;;  %v5941_v12 = vld [vmem:[#allocation20_spill] sm:$0xff]  ;;  %v2769_v35 = vmul.f32 %v5658_v50, %v4776_v37 }
 0xb8f   : > { %4073 = vmatpush3.bf16.xpose.msra.mxu1 %v2409_v40  ;;  %v2704_v39 = vadd.f32 %v5547_v57, %v5941_v12  ;;  %4467 = vrcp.f32 %v2708_v31  ;;  %v5943_v40 = vld [vmem:[#allocation22_spill] sm:$0xff] }
 0xb90   : > { %v1780_v16 = vadd.f32 %v5938_v30, %v1714_v26  ;;  %v2706_v28 = vadd.f32 %v5943_v40, %v5942_v45  ;;  %v5945_v30 = vld [vmem:[#allocation23_spill] sm:$0xff]  ;;  %v1832_v47 = vpop.permute.xlu0 %1831 }
 0xb91   : > { %v1812_v54 = vpop.permute.xlu1 %1811  ;;  %4469 = vrcp.f32 %v2704_v39 }
 0xb92   : > { %v1841_v23 = vmul.f32 %v1812_v54, %v1777_v18  ;;  %4471 = vrcp.f32 %v2710_v63 }
 0xb93   : > { %4473 = vrcp.f32 %v2706_v28 }
 0xb94   : > { %v4464_v61 = vpop.eup %4463  ;;  %4475 = vrcp.f32 %v2707_v3 }
 0xb95   : > { %v1817_v56 = vpop.permute.xlu1 %1816  ;;  %v4466_v57 = vpop.eup %4465 }
 0xb96   : > { %v1842_v60 = vmul.f32 %v1817_v56, %v1780_v16  ;;  %v2709_v16 = vadd.f32 %v5945_v30, %v5545_v14  ;;  %v3267_v14 = vpop.permute.xlu0 %3266 }
 0xb97   : > { %v3304_v19 = vmul.f32 %v3267_v14, %v4776_v37 }
 0xb98   : > { %v1848_v7 = vpack.c.bf16 %v1842_v60, %v1841_v23  ;;  %4477 = vrcp.f32 %v2709_v16  ;;  %v2767_v23 = vmul.f32 %v5662_v9, %v4776_v37 }
 0xb99   : > { %v1690_v46 = vpop.permute.xlu1 %1689  ;;  %v4468_v26 = vpop.eup %4467 }
 0xb9a   : > { %4197 = vmatprep.subr.msk.bf16.mxu1 %vm1421_vm4, %v1848_v7  ;;  %v2412_v32 = vsel %vm1421_vm4, %v1848_v7, 0  ;;  %v1715_v58 = vmul.f32 %v4776_v37, %v1690_v46 }
 0xb9b   : > { %4075 = vmatpush3.bf16.xpose.msra.mxu1 %v2412_v32  ;;  %v4470_v54 = vpop.eup %4469 }
 0xb9c   : > { %v1785_v42 = vadd.f32 %v5940_v5, %v1715_v58  ;;  %v4472_v59 = vpop.eup %4471 }
 0xb9d   : > { %v1695_v55 = vpop.permute.xlu1 %1694  ;;  %3239 = vadd.xlane.f32.xlu1 %v3238_v21  ;;  %v4474_v18 = vpop.eup %4473 }
 0xb9e   : > { %v1716_v27 = vmul.f32 %v4776_v37, %v1695_v55  ;;  %v4476_v56 = vpop.eup %4475 }
 0xba0   : > { %v1788_v11 = vadd.f32 %v5939_v33, %v1716_v27 }
 0xba1   : > { %3233 = vadd.xlane.f32.xlu1 %v3232_v24  ;;  %v1822_v22 = vpop.permute.xlu1 %1821 }
 0xba2   : > { %v1844_v29 = vmul.f32 %v1827_v20, %v1788_v11  ;;  %v1843_v38 = vmul.f32 %v1822_v22, %v1785_v42  ;;  %3301 = vperm.xlu0 %4268, %v5704_v8   ;;  %v4478_v7 = vpop.eup %4477  ;;  %v5946_v22 = vld [vmem:[#allocation3_spill] sm:$0xff] }
 0xba4   : > { %v1849_v52 = vpack.c.bf16 %v1844_v29, %v1843_v38  ;;  %v5947_v38 = vld [vmem:[#allocation5_spill] sm:$0xff] }
 0xba6   : > { %2779 = vrot.lane.b32.xlu0 %v2763_v13, %s4527_s26  ;;  %4198 = vmatprep.subr.msk.bf16.mxu1 %vm1421_vm4, %v1849_v52  ;;  %v2415_v6 = vsel %vm1421_vm4, %v1849_v52, 0 }
 0xba7   : > { %4077 = vmatpush3.bf16.xpose.msra.mxu1 %v2415_v6  ;;  %4272 = vset.pattern.permute.xlu0 %v5920_v44  ;;  %v2768_v44 = vmul.f32 %v5670_v34, %v4776_v37  ;;  %v1700_v34 = vpop.permute.xlu1 %1699 }
 0xbaa   : > { %2895 = vperm.xlu0 %4272, %v4464_v61  }
 0xbab   : > { %v1705_v36 = vpop.permute.xlu1 %1704 }
 0xbac   : > { %v1718_v42 = vmul.f32 %v4776_v37, %v1705_v36 }
 0xbae   : > { %2785 = vrot.lane.b32.xlu0 %v2766_v51, %s4527_s26  ;;  %v1796_v31 = vadd.f32 %v5947_v38, %v1718_v42  ;;  %v5952_v38 = vld [vmem:[#allocation18_spill] sm:$0xff] }
 0xbaf   : > { %v3277_v60 = vpop.permute.xlu1 %3276 }
 0xbb0   : > { %v3306_v24 = vmul.f32 %v3277_v60, %v4776_v37 }
 0xbb2   : > { %2910 = vperm.xlu0 %4272, %v4468_v26   ;;  %2885 = vperm.xlu1 %4271, %v4466_v57  }
 0xbb3   : > { %v3282_v46 = vpop.permute.xlu1 %3281 }
 0xbb4   : > { %v3307_v63 = vmul.f32 %v3282_v46, %v4776_v37  ;;  %v5949_v46 = vld [vmem:[#allocation14_spill] sm:$0xff] }
 0xbb6   : > { %2789 = vrot.lane.b32.xlu0 %v2768_v44, %s4527_s26  ;;  %2890 = vperm.xlu1 %4271, %v4470_v54  }
 0xbb7   : > { %v3272_v58 = vpop.permute.xlu1 %3271 }
 0xbb8   : > { %v3305_v55 = vmul.f32 %v3272_v58, %v4776_v37 }
 0xbba   : > { %2920 = vperm.xlu0 %4272, %v4472_v59   ;;  %2781 = vrot.lane.b32.xlu1 %v2764_v4, %s4527_s26 }
 0xbbe   : > { %2793 = vrot.lane.b32.xlu0 %v2770_v48, %s4527_s26  ;;  %2900 = vperm.xlu1 %4271, %v4474_v18  }
 0xbbf   : > { %4274 = vset.pattern.permute.xlu0 %v5923_v41 }
 0xbc2   : > { %2783 = vrot.lane.b32.xlu1 %v2765_v15, %s4527_s26 }
 0xbc6   : > { %2905 = vperm.xlu1 %4271, %v4476_v56  }
 0xbca   : > { %2787 = vrot.lane.b32.xlu1 %v2767_v23, %s4527_s26 }
 0xbce   : > { %2915 = vperm.xlu1 %4271, %v4478_v7  }
 0xbd1   : > { %v3228_v32 = vpop.xlane.xlu0 %3227 }
 0xbd2   : > { %2791 = vrot.lane.b32.xlu1 %v2769_v35, %s4527_s26  ;;  %v3246_v27 = vadd.f32 %v5618_v62, %v3228_v32  ;;  %v1717_v62 = vmul.f32 %v4776_v37, %v1700_v34 }
 0xbd3   : > { %4273 = vset.pattern.permute.xlu1 %v5923_v41  ;;  %v5756_v41 = vpop.permute.xlu1 %3286 }
 0xbd4   : > { %v1793_v43 = vadd.f32 %v5946_v22, %v1717_v62 }
 0xbd5   : > { %v3225_v21 = vpop.xlane.xlu0 %3224 }
 0xbd6   : > { %v3245_v9 = vadd.f32 %v5626_v17, %v3225_v21  ;;  %3320 = vrot.lane.b32.xlu1 %v3304_v19, %s4529_s23  ;;  %v5761_v17 = vld [vmem:[%s5878_s9] sm:$0xff]   ;;  %v1845_v52 = vmul.f32 %v1832_v47, %v1793_v43  ;;  %v3308_v21 = vmul.f32 %v5756_v41, %v4776_v37 }
 0xbd8   : > { %4479 = vrcp.f32 %v3245_v9 }
 0xbd9   : > { %4481 = vrcp.f32 %v3246_v27 }
 0xbda   : > { %3322 = vrot.lane.b32.xlu1 %v3305_v55, %s4529_s23 }
 0xbdd   : > { %v3292_v51 = vpop.permute.xlu0 %3291 }
 0xbde   : > { %v3309_v48 = vmul.f32 %v3292_v51, %v4776_v37 }
 0xbe2   : > { %v4480_v50 = vpop.eup %4479 }
 0xbe3   : > { %3431 = vperm.xlu0 %4274, %v4480_v50   ;;  %v4482_v33 = vpop.eup %4481 }
 0xbe7   : > { %3436 = vperm.xlu0 %4274, %v4482_v33  }
 0xbeb   : > { %2935 = vrot.lane.b32.xlu0 %v5761_v17, %s4527_s26 }
 0xbec   : > { %v3222_v11 = vpop.xlane.xlu1 %3221 }
 0xbed   : > { %v3244_v5 = vadd.f32 %v5597_v0, %v3222_v11  ;;  %v5950_v11 = vld [vmem:[#allocation13_spill] sm:$0xff] }
 0xbef   : > { %4483 = vrcp.f32 %v3244_v5  ;;  %3324 = vrot.lane.b32.xlu0 %v3306_v24, %s4529_s23  ;;  %v5951_v24 = vld [vmem:[#allocation11_spill] sm:$0xff] }
 0xbf0   : > { %v3231_v20 = vpop.xlane.xlu1 %3230 }
 0xbf1   : > { %v3247_v29 = vadd.f32 %v5622_v2, %v3231_v20  ;;  %v4496_v2 = vld [vmem:[%s5878_s9 + $0x8] sm:$0xff]  }
 0xbf3   : > { %4485 = vrcp.f32 %v3247_v29 }
 0xbf4   : > { %v1837_v13 = vpop.permute.xlu1 %1836 }
 0xbf5   : > { %v1846_v6 = vmul.f32 %v1837_v13, %v1796_v31 }
 0xbf7   : > { %v1850_v12 = vpack.c.bf16 %v1846_v6, %v1845_v52  ;;  %v5953_v6 = vld [vmem:[#allocation16_spill] sm:$0xff] }
 0xbf8   : > { %v3297_v59 = vpop.permute.xlu1 %3296 }
 0xbf9   : > { %v4484_v39 = vpop.eup %4483  ;;  %4199 = vmatprep.subr.msk.bf16.mxu1 %vm1421_vm4, %v1850_v12  ;;  %v2418_v0 = vsel %vm1421_vm4, %v1850_v12, 0  ;;  %v3310_v41 = vmul.f32 %v3297_v59, %v4776_v37 }
 0xbfa   : > { %3426 = vperm.xlu1 %4273, %v4484_v39   ;;  %4079 = vmatpush3.bf16.xpose.msra.mxu1 %v2418_v0 }
 0xbfd   : > { %v4486_v61 = vpop.eup %4485 }
 0xbfe   : > { %3441 = vperm.xlu1 %4273, %v4486_v61  }
 0xc01   : > { %4081 = vmatmul.mubr.msk.bf16.vlgmr.msra.gmra.mrb[40].mxu1 %vm1421_vm4, %v4496_v2 }
 0xc02   : > { %2937 = vrot.lane.b32.xlu1 %v4496_v2, %s4527_s26 }
 0xc06   : > { %3326 = vrot.lane.b32.xlu1 %v3307_v63, %s4529_s23  ;;  %v5954_v63 = vld [vmem:[#allocation17_spill] sm:$0xff] }
 0xc15   : > { %v3243_v45 = vpop.xlane.xlu0 %3242 }
 0xc16   : > { %v3251_v57 = vadd.f32 %v5704_v8, %v3243_v45 }
 0xc19   : > { %v3237_v40 = vpop.xlane.xlu0 %3236 }
 0xc1a   : > { %v3249_v28 = vadd.f32 %v5643_v10, %v3237_v40  ;;  %v5955_v40 = vld [vmem:[#allocation15_spill] sm:$0xff] }
 0xc1c   : > { %4487 = vrcp.f32 %v3249_v28 }
 0xc1d   : > { %4489 = vrcp.f32 %v3251_v57 }
 0xc20   : > { %v5784_v26 = vpop.f32.mrb[68].mxu0 }
 0xc21   : > { %v5786_v44 = vpop.f32.mrb[69].mxu0  ;;  %v3302_v3 = vpop.permute.xlu0 %3301 }
 0xc22   : > { %v5788_v54 = vpop.f32.mrb[70].mxu0  ;;  %v3311_v15 = vmul.f32 %v3302_v3, %v4776_v37 }
 0xc23   : > { %v5790_v49 = vpop.f32.mrb[71].mxu0 }
 0xc25   : > { %v2780_v18 = vpop.permute.xlu0 %2779 }
 0xc26   : > { %v4488_v4 = vpop.eup %4487 }
 0xc27   : > { %3451 = vperm.xlu1 %4273, %v4488_v4   ;;  %v4490_v8 = vpop.eup %4489  ;;  %v3551_v4 = vld [vmem:[%s5879_s10] sm:$0xff] }
 0xc29   : > { %v2896_v16 = vpop.permute.xlu0 %2895 }
 0xc2a   : > { %v3240_v10 = vpop.xlane.xlu1 %3239 }
 0xc2b   : > { %3330 = vrot.lane.b32.xlu1 %v3309_v48, %s4529_s23  ;;  %v3250_v56 = vadd.f32 %v5666_v53, %v3240_v10  ;;  %v3553_v48 = vld [vmem:[%s5879_s10 + $0x10] sm:$0xff] }
 0xc2d   : > { %v2786_v47 = vpop.permute.xlu0 %2785 }
 0xc2e   : > { %v3234_v34 = vpop.xlane.xlu1 %3233  ;;  %v2864_v62 = vadd.f32 %v5950_v11, %v2786_v47 }
 0xc2f   : > { %v3248_v30 = vadd.f32 %v5631_v1, %v3234_v34  ;;  %3461 = vperm.xlu1 %4273, %v4490_v8   ;;  %v5948_v1 = vld [vmem:[#allocation12_spill] sm:$0xff] }
 0xc30   : > { %v2853_v14 = vadd.f32 %v5948_v1, %v2780_v18  ;;  %v3554_v18 = vld [vmem:[%s5879_s10 + $0x18] sm:$0xff] }
 0xc31   : > { %4491 = vrcp.f32 %v3248_v30  ;;  %v2911_v32 = vpop.permute.xlu0 %2910 }
 0xc32   : > { %v2886_v36 = vpop.permute.xlu1 %2885  ;;  %4493 = vrcp.f32 %v3250_v56 }
 0xc33   : > { %3334 = vrot.lane.b32.xlu1 %v3311_v15, %s4529_s23  ;;  %v2923_v19 = vmul.f32 %v2886_v36, %v2853_v14 }
 0xc34   : > { %4276 = vset.pattern.permute.xlu1 %v5897_v25 }
 0xc35   : > { %v2790_v27 = vpop.permute.xlu0 %2789 }
 0xc36   : > { %v2891_v23 = vpop.permute.xlu1 %2890  ;;  %v2872_v31 = vadd.f32 %v5952_v38, %v2790_v27 }
 0xc37   : > { %3478 = vrot.lane.b32.xlu1 %v4496_v2, %s4529_s23 }
 0xc38   : > { %v2928_v37 = vmul.f32 %v2911_v32, %v2872_v31 }
 0xc39   : > { %v2921_v29 = vpop.permute.xlu0 %2920 }
 0xc3a   : > { %v2782_v60 = vpop.permute.xlu1 %2781 }
 0xc3b   : > { %v4492_v7 = vpop.eup %4491  ;;  %v2856_v35 = vadd.f32 %v5949_v46, %v2782_v60 }
 0xc3c   : > { %3446 = vperm.xlu0 %4274, %v4492_v7   ;;  %v4494_v33 = vpop.eup %4493 }
 0xc3d   : > { %v2924_v58 = vmul.f32 %v2891_v23, %v2856_v35  ;;  %v2794_v0 = vpop.permute.xlu0 %2793 }
 0xc3e   : > { %v2901_v9 = vpop.permute.xlu1 %2900  ;;  %v2880_v51 = vadd.f32 %v5954_v63, %v2794_v0 }
 0xc3f   : > { %v2931_v53 = vpack.c.bf16 %v2924_v58, %v2923_v19  ;;  %v2926_v42 = vmul.f32 %v2901_v9, %v2864_v62 }
 0xc40   : > { %3328 = vrot.lane.b32.xlu0 %v3308_v21, %s4529_s23  ;;  %v2930_v57 = vmul.f32 %v2921_v29, %v2880_v51 }
 0xc41   : > { %4202 = vmatprep.subr.msk.bf16.mxu1 %vm1421_vm4, %v2931_v53  ;;  %v2946_v55 = vsel %vm1421_vm4, %v2931_v53, 0 }
 0xc42   : > { %4105 = vmatpush3.bf16.xpose.msra.mxu1 %v2946_v55  ;;  %v2784_v50 = vpop.permute.xlu1 %2783 }
 0xc43   : > { %v2861_v5 = vadd.f32 %v5951_v24, %v2784_v50 }
 0xc44   : > { %3456 = vperm.xlu0 %4274, %v4494_v33  }
 0xc45   : > { %v2925_v20 = vmul.f32 %v2896_v16, %v2861_v5 }
 0xc46   : > { %v2906_v22 = vpop.permute.xlu1 %2905 }
 0xc47   : > { %v2932_v43 = vpack.c.bf16 %v2926_v42, %v2925_v20 }
 0xc48   : > { %3332 = vrot.lane.b32.xlu0 %v3310_v41, %s4529_s23 }
 0xc49   : > { %4203 = vmatprep.subr.msk.bf16.mxu1 %vm1421_vm4, %v2932_v43  ;;  %v2949_v13 = vsel %vm1421_vm4, %v2932_v43, 0  ;;  %4275 = vset.pattern.permute.xlu0 %v5897_v25 }
 0xc4a   : > { %4107 = vmatpush3.bf16.xpose.msra.mxu1 %v2949_v13  ;;  %v2788_v52 = vpop.permute.xlu1 %2787 }
 0xc4b   : > { %v2869_v12 = vadd.f32 %v5953_v6, %v2788_v52 }
 0xc4c   : > { %3476 = vrot.lane.b32.xlu0 %v5761_v17, %s4529_s23  ;;  %v3552_v17 = vld [vmem:[%s5879_s10 + $0x8] sm:$0xff] }
 0xc4d   : > { %v2927_v39 = vmul.f32 %v2906_v22, %v2869_v12  ;;  %3562 = vperm.xlu1 %4276, %v3552_v17   ;;  %v5958_v17 = vld [vmem:[#allocation9_spill] sm:$0xff] }
 0xc4e   : > { %v2916_v61 = vpop.permute.xlu1 %2915 }
 0xc4f   : > { %v2933_v2 = vpack.c.bf16 %v2928_v37, %v2927_v39 }
 0xc50   : > { %3557 = vperm.xlu0 %4275, %v3551_v4  }
 0xc51   : > { %4204 = vmatprep.subr.msk.bf16.mxu1 %vm1421_vm4, %v2933_v2  ;;  %v2952_v45 = vsel %vm1421_vm4, %v2933_v2, 0  ;;  %3567 = vperm.xlu1 %4276, %v3553_v48  }
 0xc52   : > { %4109 = vmatpush3.bf16.xpose.msra.mxu1 %v2952_v45  ;;  %v2792_v25 = vpop.permute.xlu1 %2791  ;;  %v5956_v45 = vld [vmem:[#allocation7_spill] sm:$0xff] }
 0xc53   : > { %v2877_v28 = vadd.f32 %v5955_v40, %v2792_v25 }
 0xc54   : > { %3572 = vperm.xlu0 %4275, %v3554_v18  }
 0xc55   : > { %v2929_v3 = vmul.f32 %v2916_v61, %v2877_v28  ;;  %v5957_v28 = vld [vmem:[#allocation8_spill] sm:$0xff] }
 0xc56   : > { %v3321_v47 = vpop.permute.xlu1 %3320 }
 0xc57   : > { %v2934_v59 = vpack.c.bf16 %v2930_v57, %v2929_v3  ;;  %v3394_v60 = vadd.f32 %v5786_v44, %v3321_v47 }
 0xc59   : > { %4205 = vmatprep.subr.msk.bf16.mxu1 %vm1421_vm4, %v2934_v59  ;;  %v2955_v10 = vsel %vm1421_vm4, %v2934_v59, 0 }
 0xc5a   : > { %4111 = vmatpush3.bf16.xpose.msra.mxu1 %v2955_v10  ;;  %v3323_v23 = vpop.permute.xlu1 %3322  ;;  %v5959_v10 = vld [vmem:[#allocation10_spill] sm:$0xff] }
 0xc5b   : > { %v3397_v7 = vadd.f32 %v5790_v49, %v3323_v23 }
 0xc61   : > { %v4134_v8 = vpop.f32.mrb[72].mxu0 }
 0xc62   : > { %v3409_v34 = vpop.f32.mrb[73].mxu0  ;;  %v3432_v30 = vpop.permute.xlu0 %3431 }
 0xc63   : > { %v4135_v16 = vpop.f32.mrb[74].mxu0  ;;  %v3465_v14 = vmul.f32 %v3432_v30, %v3397_v7 }
 0xc64   : > { %v3412_v15 = vpop.f32.mrb[75].mxu0 }
 0xc66   : > { %v3437_v36 = vpop.permute.xlu0 %3436 }
 0xc6a   : > { %v2936_v56 = vpop.permute.xlu0 %2935 }
 0xc6b   : > { %4112 = vmatprep.mubr.msk.bf16.mxu1 %vm1421_vm4, %v2936_v56 }
 0xc6e   : > { %v3325_v19 = vpop.permute.xlu0 %3324 }
 0xc6f   : > { %v3402_v9 = vadd.f32 %v5784_v26, %v3325_v19 }
 0xc71   : > { %v3466_v49 = vmul.f32 %v3437_v36, %v3402_v9 }
 0xc79   : > { %v3427_v1 = vpop.permute.xlu1 %3426 }
 0xc7a   : > { %v3464_v46 = vmul.f32 %v3427_v1, %v3394_v60 }
 0xc7c   : > { %v3472_v35 = vpack.c.bf16 %v3465_v14, %v3464_v46 }
 0xc7d   : > { %v3442_v32 = vpop.permute.xlu1 %3441 }
 0xc7e   : > { %4208 = vmatprep.subr.msk.bf16.mxu1 %vm1421_vm4, %v3472_v35  ;;  %v3487_v21 = vsel %vm1421_vm4, %v3472_v35, 0 }
 0xc81   : > { %v2938_v58 = vpop.permute.xlu1 %2937 }
 0xc82   : > { %4113 = vmatmul.mubr.msk.bf16.vlgmr.msra.gmra.mrb[40].mxu1 %vm1421_vm4, %v2938_v58 }
 0xc83   : > { %4137 = vmatpush3.bf16.xpose.msra.mxu1 %v3487_v21 }
 0xc85   : > { %v3327_v53 = vpop.permute.xlu1 %3326 }
 0xc86   : > { %v3405_v44 = vadd.f32 %v5788_v54, %v3327_v53 }
 0xc88   : > { %v3467_v55 = vmul.f32 %v3442_v32, %v3405_v44 }
 0xc8a   : > { %v3473_v27 = vpack.c.bf16 %v3467_v55, %v3466_v49 }
 0xc8c   : > { %4209 = vmatprep.subr.msk.bf16.mxu1 %vm1421_vm4, %v3473_v27  ;;  %v3490_v50 = vsel %vm1421_vm4, %v3473_v27, 0 }
 0xc8d   : > { %4139 = vmatpush3.bf16.xpose.msra.mxu1 %v3490_v50 }
 0xca6   : > { %v3452_v33 = vpop.permute.xlu1 %3451 }
 0xcaa   : > { %v3331_v11 = vpop.permute.xlu1 %3330 }
 0xcab   : > { %v3413_v5 = vadd.f32 %v3412_v15, %v3331_v11 }
 0xcad   : > { %v3469_v41 = vmul.f32 %v3452_v33, %v3413_v5 }
 0xcae   : > { %v3462_v24 = vpop.permute.xlu1 %3461 }
 0xcb2   : > { %v3335_v22 = vpop.permute.xlu1 %3334 }
 0xcb3   : > { %v3421_v29 = vadd.f32 %v4135_v16, %v3335_v22 }
 0xcb5   : > { %v3471_v52 = vmul.f32 %v3462_v24, %v3421_v29 }
 0xcb6   : > { %v3479_v0 = vpop.permute.xlu1 %3478 }
 0xcbb   : > { %v3447_v62 = vpop.permute.xlu0 %3446 }
 0xcbf   : > { %v3329_v42 = vpop.permute.xlu0 %3328 }
 0xcc0   : > { %v3410_v20 = vadd.f32 %v3409_v34, %v3329_v42 }
 0xcc2   : > { %v3468_v26 = vmul.f32 %v3447_v62, %v3410_v20 }
 0xcc3   : > { %v3457_v43 = vpop.permute.xlu0 %3456 }
 0xcc4   : > { %v3474_v54 = vpack.c.bf16 %v3469_v41, %v3468_v26 }
 0xcc6   : > { %4210 = vmatprep.subr.msk.bf16.mxu1 %vm1421_vm4, %v3474_v54  ;;  %v3493_v38 = vsel %vm1421_vm4, %v3474_v54, 0 }
 0xcc7   : > { %v3333_v31 = vpop.permute.xlu0 %3332  ;;  %4141 = vmatpush3.bf16.xpose.msra.mxu1 %v3493_v38 }
 0xcc8   : > { %v3418_v13 = vadd.f32 %v4134_v8, %v3333_v31 }
 0xcca   : > { %v3470_v6 = vmul.f32 %v3457_v43, %v3418_v13 }
 0xccb   : > { %v3477_v12 = vpop.permute.xlu0 %3476 }
 0xccc   : > { %v3475_v37 = vpack.c.bf16 %v3471_v52, %v3470_v6  ;;  %4144 = vmatprep.mubr.msk.bf16.mxu1 %vm1421_vm4, %v3477_v12  ;;  %v3563_v61 = vpop.permute.xlu1 %3562 }
 0xcce   : > { %4211 = vmatprep.subr.msk.bf16.mxu1 %vm1421_vm4, %v3475_v37  ;;  %v3496_v39 = vsel %vm1421_vm4, %v3475_v37, 0 }
 0xccf   : > { %4143 = vmatpush3.bf16.xpose.msra.mxu1 %v3496_v39  ;;  %v3558_v2 = vpop.permute.xlu0 %3557 }
 0xcd0   : > { %v3568_v51 = vpop.permute.xlu1 %3567 }
 0xcd3   : > { %v3573_v34 = vpop.permute.xlu0 %3572 }
 0xcd6   : > { %4145 = vmatmul.mubr.msk.bf16.vlgmr.msra.gmra.mrb[40].mxu1 %vm1421_vm4, %v3479_v0 }
 0xda9   : > { %v4146_v63 = vpop.f32.mrb[40].mxu1 }
 0xdaa   : > { %v4174_v25 = vadd.f32 %v4146_v63, %v5956_v45  ;;  %v3532_v40 = vpop.f32.mrb[41].mxu1 }
 0xdab   : > { %v4175_v57 = vadd.f32 %v3532_v40, %v5957_v28  ;;  %v4147_v3 = vpop.f32.mrb[42].mxu1 }
 0xdac   : > { %v4176_v4 = vadd.f32 %v4147_v3, %v5958_v17  ;;  %v3577_v59 = vadd.f32 %v4174_v25, %v3568_v51  ;;  %v3535_v48 = vpop.f32.mrb[43].mxu1 }
 0xdad   : > { %v3575_v18 = vadd.f32 %v4175_v57, %v3558_v2  ;;  %v4177_v8 = vadd.f32 %v3535_v48, %v5959_v10 }
 0xdae   : > { %3582 = vst.msk [vmem:[%s462_s15 + $0x10] sm:$0xff] %vm3579_vm6, %v3577_v59  ;;  %v3578_v30 = vadd.f32 %v4176_v4, %v3573_v34 }
 0xdaf   : > { %3580 = vst.msk [vmem:[%s462_s15] sm:$0xff] %vm3579_vm6, %v3575_v18  ;;  %v3576_v16 = vadd.f32 %v4177_v8, %v3563_v61 }
 0xdb0   : > { %3583 = vst.msk [vmem:[%s462_s15 + $0x18] sm:$0xff] %vm3579_vm6, %v3578_v30 }
 0xdb1   : > { %3581 = vst.msk [vmem:[%s462_s15 + $0x8] sm:$0xff] %vm3579_vm6, %v3576_v16 }
 0xdb2 PF: > { %s21_s19 = sadd.s32 1, %s4519_s19   ;;  %s5960_s17 = smov %s4515_s18 }
 0xdb3   : > { %p18_p5 = scmp.ge.s32.totalorder %s21_s19, 4   ;;  %s5961_s18 = smov %s5963_s20 }
 0xdb5   :  { %20 = sbr.rel (!%p18_p5) target bundleno = 2 (0x2), region = 100 }

</bundles_post_ra>
